<compile_context>
chip_gen: v6e
topology: v6e:2x2x1
jax: 0.10.0
libtpu: 0.0.40
codegen_flags: <defaults>
</compile_context>

<pallas_src>
import functools
import math

import jax
import jax.numpy as jnp
import numpy as np
from jax import lax
from jax.experimental import pallas as pl
from jax.experimental.pallas import tpu as pltpu


# ----------------------------------------------------------------------------
# Parameter construction (mirrors ED_Conv.__init__, deterministic)
# ----------------------------------------------------------------------------
def make_ed_conv_params(key, *, input_size=16, layers=3, widening=2,
                        strides=2, skips=False):
    layer_specs = [1] + [16 * widening ** i for i in range(layers)]
    layer_specs = layer_specs[: layers + 1]

    num_strides, ins = 0, input_size
    while ins % strides == 0:
        num_strides += 1
        ins //= strides
    strides_l = np.asarray([(l + 1) * num_strides / layers for l in range(layers)])
    strides_l = strides_l.round()
    strides_l[1:] = strides_l[1:] - strides_l[:-1]

    encoders = []
    # encoder 0: ReplicationPad2d(1) + Conv2d(1, c1, 3x3, stride, padding=0)
    in_ch, out_ch = layer_specs[0], layer_specs[1]
    s0 = strides if strides_l[0] == 1.0 else 1
    gain = math.sqrt(2.0)
    fan = in_ch * 3 * 3
    key, sub = jax.random.split(key)
    w = (gain / math.sqrt(fan)) * jax.random.normal(
        sub, (out_ch, in_ch, 3, 3), jnp.float32)
    b = jnp.full((out_ch,), 0.01, jnp.float32)
    encoders.append(dict(w=w, b=b, stride=int(s0), padding=1,
                         relu=False, pad_mode="edge"))
    last_ch = out_ch

    # remaining encoders: ReLU + Conv2d (weights zeroed, identity at center)
    for i, ch_out in enumerate(layer_specs[2:]):
        s = strides if strides_l[i + 1] == 1.0 else 1
        w = np.zeros((ch_out, last_ch, 3, 3), np.float32)
        for j in range(min(last_ch, ch_out)):
            w[j, j, 1, 1] = 1.0
        b = jnp.full((ch_out,), 0.01, jnp.float32)
        encoders.append(dict(w=jnp.asarray(w), b=b, stride=int(s), padding=1,
                             relu=True, pad_mode="zeros"))
        last_ch = ch_out

    # decoders: ReLU + ConvTranspose2d (weights zeroed, identity at [j,j,1,1])
    specs_rev = list(reversed(layer_specs))
    decoders = []
    for i, ch_out in enumerate(specs_rev[1:]):
        sl = strides_l[layers - 1 - i]
        s = strides if sl == 1.0 else 1
        k_sz = 3 if strides == 1 or not sl == 1.0 else 4
        w = np.zeros((last_ch, ch_out, k_sz, k_sz), np.float32)   # (Cin,Cout,k,k)
        if not skips:
            for j in range(min(last_ch, ch_out)):
                w[j, j, 1, 1] = 1.0
        b = jnp.full((ch_out,), 0.01, jnp.float32)
        decoders.append(dict(w=jnp.asarray(w), b=b, stride=int(s),
                             padding=1, relu=True))
        last_ch = ch_out

    return dict(encoders=encoders, decoders=decoders, skips=skips)


# ----------------------------------------------------------------------------
# Host-side lowering of Conv2d / ConvTranspose2d to (R, B, bias_row) operands
#   R: (kh, NB*H_out, NB*H_in)  block-diagonal over the NB stacked images
#   B: (kh, W_in*Cin, W_out*Cout)
# ----------------------------------------------------------------------------
def _block_diag(R_ky, nb):
    return np.kron(np.eye(nb, dtype=np.float32), R_ky)


def _conv_layer_operands(w_oihw, bias, *, stride, padding, pad_mode,
                         h_in, w_in, nb):
    w = np.asarray(w_oihw, np.float32)          # (Cout, Cin, kH, kW)
    cout, cin, kh, kw = w.shape
    h_out = (h_in + 2 * padding - kh) // stride + 1
    w_out = (w_in + 2 * padding - kw) // stride + 1

    R = np.zeros((kh, h_out, h_in), np.float32)
    for ky in range(kh):
        for oy in range(h_out):
            iy = stride * oy + ky - padding
            if pad_mode == "edge":
                iy = min(max(iy, 0), h_in - 1)
            elif not (0 <= iy < h_in):
                continue
            R[ky, oy, iy] = 1.0
    Rb = np.stack([_block_diag(R[ky], nb) for ky in range(kh)])

    B = np.zeros((kh, w_in * cin, w_out * cout), np.float32)
    for ky in range(kh):
        for ox in range(w_out):
            for kx in range(kw):
                ix = stride * ox + kx - padding
                if pad_mode == "edge":
                    ix = min(max(ix, 0), w_in - 1)
                elif not (0 <= ix < w_in):
                    continue
                B[ky, ix * cin:(ix + 1) * cin,
                  ox * cout:(ox + 1) * cout] += w[:, :, ky, kx].T
    brow = np.tile(np.asarray(bias, np.float32), w_out).reshape(1, w_out * cout)
    return (Rb, B, brow), (h_out, w_out, cout)


def _convT_layer_operands(w_iohw, bias, *, stride, padding, h_in, w_in, nb):
    w = np.asarray(w_iohw, np.float32)          # (Cin, Cout, kH, kW)
    cin, cout, kh, kw = w.shape
    h_out = (h_in - 1) * stride - 2 * padding + kh
    w_out = (w_in - 1) * stride - 2 * padding + kw

    R = np.zeros((kh, h_out, h_in), np.float32)
    for ky in range(kh):
        for iy in range(h_in):
            oy = stride * iy + ky - padding
            if 0 <= oy < h_out:
                R[ky, oy, iy] = 1.0
    Rb = np.stack([_block_diag(R[ky], nb) for ky in range(kh)])

    B = np.zeros((kh, w_in * cin, w_out * cout), np.float32)
    for ky in range(kh):
        for ix in range(w_in):
            for kx in range(kw):
                ox = stride * ix + kx - padding
                if 0 <= ox < w_out:
                    B[ky, ix * cin:(ix + 1) * cin,
                      ox * cout:(ox + 1) * cout] += w[:, :, ky, kx]
    brow = np.tile(np.asarray(bias, np.float32), w_out).reshape(1, w_out * cout)
    return (Rb, B, brow), (h_out, w_out, cout)


def build_fused_plan(params, height, width, nb):
    operands, relu_flags, r_first = [], [], []
    h, w, ch = height, width, 1
    for e in params["encoders"]:
        ops, (ho, wo, co) = _conv_layer_operands(
            e["w"], e["b"], stride=e["stride"], padding=e["padding"],
            pad_mode=e["pad_mode"], h_in=h, w_in=w, nb=nb)
        operands.extend(ops)
        relu_flags.append(e["relu"])
        r_first.append(ho <= h)                 # downsample -> contract rows first
        h, w, ch = ho, wo, co
    n_enc = len(params["encoders"])
    for d in params["decoders"]:
        ops, (ho, wo, co) = _convT_layer_operands(
            d["w"], d["b"], stride=d["stride"], padding=d["padding"],
            h_in=h, w_in=w, nb=nb)
        operands.extend(ops)
        relu_flags.append(d["relu"])
        r_first.append(ho <= h)                 # upsample -> contract lanes first
        h, w, ch = ho, wo, co
    # final residual add (x + src) requires output spatial == input, C == 1
    assert (h, w, ch) == (height, width, 1), (h, w, ch)
    return operands, relu_flags, r_first, n_enc


# ----------------------------------------------------------------------------
# Single fused Pallas kernel: whole forward pass for one tile of NB images
# ----------------------------------------------------------------------------
def _ed_fused_kernel(x_ref, *args, relu_flags, r_first_flags, n_enc, skips):
    o_ref = args[-1]
    prm = args[:-1]                              # 3 operands per layer
    n_layers = len(relu_flags)

    x = x_ref[0]                                 # (NB*H, W*C) with C=1
    src = x
    enc_outs = []
    for li in range(n_layers):
        r_ref, b_ref, bias_ref = prm[3 * li], prm[3 * li + 1], prm[3 * li + 2]
        kh = r_ref.shape[0]
        a = jnp.maximum(x, 0.0) if relu_flags[li] else x

        acc = None
        for ky in range(kh):                     # static unroll over vertical taps
            if r_first_flags[li]:
                rows = jnp.dot(r_ref[ky], a, preferred_element_type=jnp.float32)
                part = jnp.dot(rows, b_ref[ky], preferred_element_type=jnp.float32)
            else:
                cols = jnp.dot(a, b_ref[ky], preferred_element_type=jnp.float32)
                part = jnp.dot(r_ref[ky], cols, preferred_element_type=jnp.float32)
            acc = part if acc is None else acc + part
        x = acc + bias_ref[...]

        if li < n_enc:
            enc_outs.append(x)
        elif skips and li < n_layers - 1:
            x = x + enc_outs[-((li - n_enc) + 2)]

    o_ref[0] = (x + src).astype(o_ref.dtype)


def make_ed_conv_forward(params, batch, height, width, images_per_tile=None):
    if images_per_tile is None:
        # largest divisor of the batch (<= 8) so stacked activations stay small
        images_per_tile = next(nb for nb in range(min(batch, 8), 0, -1)
                               if batch % nb == 0)
    nb = images_per_tile
    assert batch % nb == 0
    n_tiles = batch // nb

    operands, relu_flags, r_first, n_enc = build_fused_plan(
        params, height, width, nb)
    operands = [jnp.asarray(o) for o in operands]

    kernel = functools.partial(
        _ed_fused_kernel,
        relu_flags=tuple(bool(r) for r in relu_flags),
        r_first_flags=tuple(bool(r) for r in r_first),
        n_enc=n_enc, skips=bool(params["skips"]))

    in_specs = [pl.BlockSpec((1, nb * height, width), lambda t: (t, 0, 0))]
    for op in operands:                          # constant index maps: DMA'd once
        in_specs.append(pl.BlockSpec(op.shape,
                                     lambda t, _nd=op.ndim: (0,) * _nd))

    call = pl.pallas_call(
        kernel,
        out_shape=jax.ShapeDtypeStruct((n_tiles, nb * height, width), jnp.float32),
        grid=(n_tiles,),
        in_specs=in_specs,
        out_specs=pl.BlockSpec((1, nb * height, width), lambda t: (t, 0, 0)),
        compiler_params=pltpu.CompilerParams(
            dimension_semantics=("parallel",)),   # batch tiles split across cores
    )

    def forward(x_nchw):
        # C == 1: NCHW -> (n_tiles, NB*H, W) is a free reshape (no transpose).
        assert x_nchw.shape == (batch, 1, height, width), x_nchw.shape
        x2d = x_nchw.reshape(n_tiles, nb * height, width).astype(jnp.float32)
        y = call(x2d, *operands)
        return y.reshape(batch, 1, height, width)

    return forward


# ----------------------------------------------------------------------------
# Pure-XLA reference (NCHW, PyTorch semantics) for validation
# ----------------------------------------------------------------------------
def _ref_conv(x, w, b, stride, padding, pad_mode, relu):
    if relu:
        x = jax.nn.relu(x)
    if pad_mode == "edge":
        x = jnp.pad(x, ((0, 0), (0, 0), (padding, padding), (padding, padding)),
                    mode="edge")
        pads = (0, 0)
    else:
        pads = (padding, padding)
    y = lax.conv_general_dilated(
        x, w, (stride, stride), [pads, pads],
        dimension_numbers=("NCHW", "OIHW", "NCHW"))
    return y + b[None, :, None, None]


def _ref_convT(x, w_io, b, stride, padding, relu):
    if relu:
        x = jax.nn.relu(x)
    cin, cout, kH, kW = w_io.shape
    w = jnp.transpose(w_io[:, :, ::-1, ::-1], (1, 0, 2, 3))     # -> OIHW flipped
    y = lax.conv_general_dilated(
        x, w, (1, 1),
        [(kH - 1 - padding,) * 2, (kW - 1 - padding,) * 2],
        lhs_dilation=(stride, stride),
        dimension_numbers=("NCHW", "OIHW", "NCHW"))
    return y + b[None, :, None, None]


def ed_conv_reference(params, x):
    src = x
    enc_outs = []
    for e in params["encoders"]:
        x = _ref_conv(x, e["w"], e["b"], e["stride"], e["padding"],
                      e["pad_mode"], e["relu"])
        enc_outs.append(x)
    decs = params["decoders"]
    for i, d in enumerate(decs[:-1]):
        x = _ref_convT(x, d["w"], d["b"], d["stride"], d["padding"], d["relu"])
        if params["skips"]:
            x = x + enc_outs[-(i + 2)]
    d = decs[-1]
    x = _ref_convT(x, d["w"], d["b"], d["stride"], d["padding"], d["relu"])
    return x + src


# ----------------------------------------------------------------------------
if __name__ == "__main__":
    key = jax.random.PRNGKey(0)
    pkey, xkey = jax.random.split(key)
    params = make_ed_conv_params(pkey, input_size=16, layers=3, widening=2,
                                 strides=2, skips=False)
    # NCHW input like the PyTorch module: batch=2, channels=1, 16x16 spatial
    N, C, H, W = 2, 1, 16, 16
    x = jax.random.normal(xkey, (N, C, H, W), jnp.float32)

    fwd = jax.jit(make_ed_conv_forward(params, N, H, W))
    out = jax.block_until_ready(fwd(x))
    assert out.shape == x.shape, out.shape

    ref = jax.block_until_ready(ed_conv_reference(params, x))
    np.testing.assert_allclose(np.asarray(out), np.asarray(ref),
                               rtol=1e-3, atol=1e-3)
    print("KERNEL_OK")
</pallas_src>

<mosaic_0001>
module attributes {stable_mosaic.version = 11 : i64} {
  func.func @_ed_fused_kernel(%arg0: i32, %arg1: memref<1x32x16xf32, #tpu.memory_space<vmem>>, %arg2: memref<3x16x32xf32, #tpu.memory_space<vmem>>, %arg3: memref<3x16x128xf32, #tpu.memory_space<vmem>>, %arg4: memref<1x128xf32, #tpu.memory_space<vmem>>, %arg5: memref<3x16x16xf32, #tpu.memory_space<vmem>>, %arg6: memref<3x128x256xf32, #tpu.memory_space<vmem>>, %arg7: memref<1x256xf32, #tpu.memory_space<vmem>>, %arg8: memref<3x8x16xf32, #tpu.memory_space<vmem>>, %arg9: memref<3x256x256xf32, #tpu.memory_space<vmem>>, %arg10: memref<1x256xf32, #tpu.memory_space<vmem>>, %arg11: memref<4x16x8xf32, #tpu.memory_space<vmem>>, %arg12: memref<4x256x256xf32, #tpu.memory_space<vmem>>, %arg13: memref<1x256xf32, #tpu.memory_space<vmem>>, %arg14: memref<3x16x16xf32, #tpu.memory_space<vmem>>, %arg15: memref<3x256x128xf32, #tpu.memory_space<vmem>>, %arg16: memref<1x128xf32, #tpu.memory_space<vmem>>, %arg17: memref<4x32x16xf32, #tpu.memory_space<vmem>>, %arg18: memref<4x128x16xf32, #tpu.memory_space<vmem>>, %arg19: memref<1x16xf32, #tpu.memory_space<vmem>>, %arg20: memref<1x32x16xf32, #tpu.memory_space<vmem>>) attributes {dimension_semantics = [#tpu.dimension_semantics<parallel>], iteration_bounds = array<i64: 1>, scalar_prefetch = 0 : i64, scratch_operands = 0 : i64, tpu.core_type = #tpu.core_type<tc>, window_params = [{transform_indices = @transform_0, window_bounds = array<i64: 1, 32, 16>}, {pipeline_mode = #tpu.pipeline_mode<synchronous>, transform_indices = @transform_1, window_bounds = array<i64: 3, 16, 32>}, {pipeline_mode = #tpu.pipeline_mode<synchronous>, transform_indices = @transform_2, window_bounds = array<i64: 3, 16, 128>}, {pipeline_mode = #tpu.pipeline_mode<synchronous>, transform_indices = @transform_3, window_bounds = array<i64: 1, 128>}, {pipeline_mode = #tpu.pipeline_mode<synchronous>, transform_indices = @transform_4, window_bounds = array<i64: 3, 16, 16>}, {pipeline_mode = #tpu.pipeline_mode<synchronous>, transform_indices = @transform_5, window_bounds = array<i64: 3, 128, 256>}, {pipeline_mode = #tpu.pipeline_mode<synchronous>, transform_indices = @transform_6, window_bounds = array<i64: 1, 256>}, {pipeline_mode = #tpu.pipeline_mode<synchronous>, transform_indices = @transform_7, window_bounds = array<i64: 3, 8, 16>}, {pipeline_mode = #tpu.pipeline_mode<synchronous>, transform_indices = @transform_8, window_bounds = array<i64: 3, 256, 256>}, {pipeline_mode = #tpu.pipeline_mode<synchronous>, transform_indices = @transform_9, window_bounds = array<i64: 1, 256>}, {pipeline_mode = #tpu.pipeline_mode<synchronous>, transform_indices = @transform_10, window_bounds = array<i64: 4, 16, 8>}, {pipeline_mode = #tpu.pipeline_mode<synchronous>, transform_indices = @transform_11, window_bounds = array<i64: 4, 256, 256>}, {pipeline_mode = #tpu.pipeline_mode<synchronous>, transform_indices = @transform_12, window_bounds = array<i64: 1, 256>}, {pipeline_mode = #tpu.pipeline_mode<synchronous>, transform_indices = @transform_13, window_bounds = array<i64: 3, 16, 16>}, {pipeline_mode = #tpu.pipeline_mode<synchronous>, transform_indices = @transform_14, window_bounds = array<i64: 3, 256, 128>}, {pipeline_mode = #tpu.pipeline_mode<synchronous>, transform_indices = @transform_15, window_bounds = array<i64: 1, 128>}, {pipeline_mode = #tpu.pipeline_mode<synchronous>, transform_indices = @transform_16, window_bounds = array<i64: 4, 32, 16>}, {pipeline_mode = #tpu.pipeline_mode<synchronous>, transform_indices = @transform_17, window_bounds = array<i64: 4, 128, 16>}, {pipeline_mode = #tpu.pipeline_mode<synchronous>, transform_indices = @transform_18, window_bounds = array<i64: 1, 16>}, {transform_indices = @transform_19, window_bounds = array<i64: 1, 32, 16>}]} {
    %c0 = arith.constant 0 : index
    %c0_0 = arith.constant 0 : index
    %c0_1 = arith.constant 0 : index
    %0 = vector.load %arg1[%c0, %c0_0, %c0_1] : memref<1x32x16xf32, #tpu.memory_space<vmem>>, vector<1x32x16xf32>
    %1 = vector.shape_cast %0 : vector<1x32x16xf32> to vector<32x16xf32>
    %c0_2 = arith.constant 0 : index
    %c0_3 = arith.constant 0 : index
    %c0_4 = arith.constant 0 : index
    %2 = vector.load %arg2[%c0_2, %c0_3, %c0_4] : memref<3x16x32xf32, #tpu.memory_space<vmem>>, vector<1x16x32xf32>
    %3 = vector.shape_cast %2 : vector<1x16x32xf32> to vector<16x32xf32>
    %cst = arith.constant dense<0.000000e+00> : vector<16x16xf32>
    %4 = tpu.matmul %3, %1, %cst {dimension_numbers = #tpu.dot_dimension_numbers<[1], [0], [0], [1], [0, 0, 1, 1], [], []>} : vector<16x32xf32>, vector<32x16xf32>, vector<16x16xf32> -> vector<16x16xf32>
    %c0_5 = arith.constant 0 : index
    %c0_6 = arith.constant 0 : index
    %c0_7 = arith.constant 0 : index
    %5 = vector.load %arg3[%c0_5, %c0_6, %c0_7] : memref<3x16x128xf32, #tpu.memory_space<vmem>>, vector<1x16x128xf32>
    %6 = vector.shape_cast %5 : vector<1x16x128xf32> to vector<16x128xf32>
    %cst_8 = arith.constant dense<0.000000e+00> : vector<16x128xf32>
    %7 = tpu.matmul %4, %6, %cst_8 {dimension_numbers = #tpu.dot_dimension_numbers<[1], [0], [0], [1], [0, 0, 1, 1], [], []>} : vector<16x16xf32>, vector<16x128xf32>, vector<16x128xf32> -> vector<16x128xf32>
    %c1 = arith.constant 1 : index
    %c0_9 = arith.constant 0 : index
    %c0_10 = arith.constant 0 : index
    %8 = vector.load %arg2[%c1, %c0_9, %c0_10] : memref<3x16x32xf32, #tpu.memory_space<vmem>>, vector<1x16x32xf32>
    %9 = vector.shape_cast %8 : vector<1x16x32xf32> to vector<16x32xf32>
    %cst_11 = arith.constant dense<0.000000e+00> : vector<16x16xf32>
    %10 = tpu.matmul %9, %1, %cst_11 {dimension_numbers = #tpu.dot_dimension_numbers<[1], [0], [0], [1], [0, 0, 1, 1], [], []>} : vector<16x32xf32>, vector<32x16xf32>, vector<16x16xf32> -> vector<16x16xf32>
    %c1_12 = arith.constant 1 : index
    %c0_13 = arith.constant 0 : index
    %c0_14 = arith.constant 0 : index
    %11 = vector.load %arg3[%c1_12, %c0_13, %c0_14] : memref<3x16x128xf32, #tpu.memory_space<vmem>>, vector<1x16x128xf32>
    %12 = vector.shape_cast %11 : vector<1x16x128xf32> to vector<16x128xf32>
    %cst_15 = arith.constant dense<0.000000e+00> : vector<16x128xf32>
    %13 = tpu.matmul %10, %12, %cst_15 {dimension_numbers = #tpu.dot_dimension_numbers<[1], [0], [0], [1], [0, 0, 1, 1], [], []>} : vector<16x16xf32>, vector<16x128xf32>, vector<16x128xf32> -> vector<16x128xf32>
    %14 = arith.addf %7, %13 : vector<16x128xf32>
    %c2 = arith.constant 2 : index
    %c0_16 = arith.constant 0 : index
    %c0_17 = arith.constant 0 : index
    %15 = vector.load %arg2[%c2, %c0_16, %c0_17] : memref<3x16x32xf32, #tpu.memory_space<vmem>>, vector<1x16x32xf32>
    %16 = vector.shape_cast %15 : vector<1x16x32xf32> to vector<16x32xf32>
    %cst_18 = arith.constant dense<0.000000e+00> : vector<16x16xf32>
    %17 = tpu.matmul %16, %1, %cst_18 {dimension_numbers = #tpu.dot_dimension_numbers<[1], [0], [0], [1], [0, 0, 1, 1], [], []>} : vector<16x32xf32>, vector<32x16xf32>, vector<16x16xf32> -> vector<16x16xf32>
    %c2_19 = arith.constant 2 : index
    %c0_20 = arith.constant 0 : index
    %c0_21 = arith.constant 0 : index
    %18 = vector.load %arg3[%c2_19, %c0_20, %c0_21] : memref<3x16x128xf32, #tpu.memory_space<vmem>>, vector<1x16x128xf32>
    %19 = vector.shape_cast %18 : vector<1x16x128xf32> to vector<16x128xf32>
    %cst_22 = arith.constant dense<0.000000e+00> : vector<16x128xf32>
    %20 = tpu.matmul %17, %19, %cst_22 {dimension_numbers = #tpu.dot_dimension_numbers<[1], [0], [0], [1], [0, 0, 1, 1], [], []>} : vector<16x16xf32>, vector<16x128xf32>, vector<16x128xf32> -> vector<16x128xf32>
    %21 = arith.addf %14, %20 : vector<16x128xf32>
    %c0_23 = arith.constant 0 : index
    %c0_24 = arith.constant 0 : index
    %22 = vector.load %arg4[%c0_23, %c0_24] : memref<1x128xf32, #tpu.memory_space<vmem>>, vector<1x128xf32>
    %23 = vector.broadcast %22 : vector<1x128xf32> to vector<16x128xf32>
    %24 = arith.addf %21, %23 : vector<16x128xf32>
    %cst_25 = arith.constant 0.000000e+00 : f32
    %25 = vector.broadcast %cst_25 : f32 to vector<16x128xf32>
    %26 = arith.maximumf %24, %25 : vector<16x128xf32>
    %c0_26 = arith.constant 0 : index
    %c0_27 = arith.constant 0 : index
    %c0_28 = arith.constant 0 : index
    %27 = vector.load %arg5[%c0_26, %c0_27, %c0_28] : memref<3x16x16xf32, #tpu.memory_space<vmem>>, vector<1x16x16xf32>
    %28 = vector.shape_cast %27 : vector<1x16x16xf32> to vector<16x16xf32>
    %cst_29 = arith.constant dense<0.000000e+00> : vector<16x128xf32>
    %29 = tpu.matmul %28, %26, %cst_29 {dimension_numbers = #tpu.dot_dimension_numbers<[1], [0], [0], [1], [0, 0, 1, 1], [], []>} : vector<16x16xf32>, vector<16x128xf32>, vector<16x128xf32> -> vector<16x128xf32>
    %c0_30 = arith.constant 0 : index
    %c0_31 = arith.constant 0 : index
    %c0_32 = arith.constant 0 : index
    %30 = vector.load %arg6[%c0_30, %c0_31, %c0_32] : memref<3x128x256xf32, #tpu.memory_space<vmem>>, vector<1x128x256xf32>
    %31 = vector.shape_cast %30 : vector<1x128x256xf32> to vector<128x256xf32>
    %cst_33 = arith.constant dense<0.000000e+00> : vector<16x256xf32>
    %32 = tpu.matmul %29, %31, %cst_33 {dimension_numbers = #tpu.dot_dimension_numbers<[1], [0], [0], [1], [0, 0, 1, 1], [], []>} : vector<16x128xf32>, vector<128x256xf32>, vector<16x256xf32> -> vector<16x256xf32>
    %c1_34 = arith.constant 1 : index
    %c0_35 = arith.constant 0 : index
    %c0_36 = arith.constant 0 : index
    %33 = vector.load %arg5[%c1_34, %c0_35, %c0_36] : memref<3x16x16xf32, #tpu.memory_space<vmem>>, vector<1x16x16xf32>
    %34 = vector.shape_cast %33 : vector<1x16x16xf32> to vector<16x16xf32>
    %cst_37 = arith.constant dense<0.000000e+00> : vector<16x128xf32>
    %35 = tpu.matmul %34, %26, %cst_37 {dimension_numbers = #tpu.dot_dimension_numbers<[1], [0], [0], [1], [0, 0, 1, 1], [], []>} : vector<16x16xf32>, vector<16x128xf32>, vector<16x128xf32> -> vector<16x128xf32>
    %c1_38 = arith.constant 1 : index
    %c0_39 = arith.constant 0 : index
    %c0_40 = arith.constant 0 : index
    %36 = vector.load %arg6[%c1_38, %c0_39, %c0_40] : memref<3x128x256xf32, #tpu.memory_space<vmem>>, vector<1x128x256xf32>
    %37 = vector.shape_cast %36 : vector<1x128x256xf32> to vector<128x256xf32>
    %cst_41 = arith.constant dense<0.000000e+00> : vector<16x256xf32>
    %38 = tpu.matmul %35, %37, %cst_41 {dimension_numbers = #tpu.dot_dimension_numbers<[1], [0], [0], [1], [0, 0, 1, 1], [], []>} : vector<16x128xf32>, vector<128x256xf32>, vector<16x256xf32> -> vector<16x256xf32>
    %39 = arith.addf %32, %38 : vector<16x256xf32>
    %c2_42 = arith.constant 2 : index
    %c0_43 = arith.constant 0 : index
    %c0_44 = arith.constant 0 : index
    %40 = vector.load %arg5[%c2_42, %c0_43, %c0_44] : memref<3x16x16xf32, #tpu.memory_space<vmem>>, vector<1x16x16xf32>
    %41 = vector.shape_cast %40 : vector<1x16x16xf32> to vector<16x16xf32>
    %cst_45 = arith.constant dense<0.000000e+00> : vector<16x128xf32>
    %42 = tpu.matmul %41, %26, %cst_45 {dimension_numbers = #tpu.dot_dimension_numbers<[1], [0], [0], [1], [0, 0, 1, 1], [], []>} : vector<16x16xf32>, vector<16x128xf32>, vector<16x128xf32> -> vector<16x128xf32>
    %c2_46 = arith.constant 2 : index
    %c0_47 = arith.constant 0 : index
    %c0_48 = arith.constant 0 : index
    %43 = vector.load %arg6[%c2_46, %c0_47, %c0_48] : memref<3x128x256xf32, #tpu.memory_space<vmem>>, vector<1x128x256xf32>
    %44 = vector.shape_cast %43 : vector<1x128x256xf32> to vector<128x256xf32>
    %cst_49 = arith.constant dense<0.000000e+00> : vector<16x256xf32>
    %45 = tpu.matmul %42, %44, %cst_49 {dimension_numbers = #tpu.dot_dimension_numbers<[1], [0], [0], [1], [0, 0, 1, 1], [], []>} : vector<16x128xf32>, vector<128x256xf32>, vector<16x256xf32> -> vector<16x256xf32>
    %46 = arith.addf %39, %45 : vector<16x256xf32>
    %c0_50 = arith.constant 0 : index
    %c0_51 = arith.constant 0 : index
    %47 = vector.load %arg7[%c0_50, %c0_51] : memref<1x256xf32, #tpu.memory_space<vmem>>, vector<1x256xf32>
    %48 = vector.broadcast %47 : vector<1x256xf32> to vector<16x256xf32>
    %49 = arith.addf %46, %48 : vector<16x256xf32>
    %cst_52 = arith.constant 0.000000e+00 : f32
    %50 = vector.broadcast %cst_52 : f32 to vector<16x256xf32>
    %51 = arith.maximumf %49, %50 : vector<16x256xf32>
    %c0_53 = arith.constant 0 : index
    %c0_54 = arith.constant 0 : index
    %c0_55 = arith.constant 0 : index
    %52 = vector.load %arg8[%c0_53, %c0_54, %c0_55] : memref<3x8x16xf32, #tpu.memory_space<vmem>>, vector<1x8x16xf32>
    %53 = vector.shape_cast %52 : vector<1x8x16xf32> to vector<8x16xf32>
    %cst_56 = arith.constant dense<0.000000e+00> : vector<8x256xf32>
    %54 = tpu.matmul %53, %51, %cst_56 {dimension_numbers = #tpu.dot_dimension_numbers<[1], [0], [0], [1], [0, 0, 1, 1], [], []>} : vector<8x16xf32>, vector<16x256xf32>, vector<8x256xf32> -> vector<8x256xf32>
    %c0_57 = arith.constant 0 : index
    %c0_58 = arith.constant 0 : index
    %c0_59 = arith.constant 0 : index
    %55 = vector.load %arg9[%c0_57, %c0_58, %c0_59] : memref<3x256x256xf32, #tpu.memory_space<vmem>>, vector<1x256x256xf32>
    %56 = vector.shape_cast %55 : vector<1x256x256xf32> to vector<256x256xf32>
    %cst_60 = arith.constant dense<0.000000e+00> : vector<8x256xf32>
    %57 = tpu.matmul %54, %56, %cst_60 {dimension_numbers = #tpu.dot_dimension_numbers<[1], [0], [0], [1], [0, 0, 1, 1], [], []>} : vector<8x256xf32>, vector<256x256xf32>, vector<8x256xf32> -> vector<8x256xf32>
    %c1_61 = arith.constant 1 : index
    %c0_62 = arith.constant 0 : index
    %c0_63 = arith.constant 0 : index
    %58 = vector.load %arg8[%c1_61, %c0_62, %c0_63] : memref<3x8x16xf32, #tpu.memory_space<vmem>>, vector<1x8x16xf32>
    %59 = vector.shape_cast %58 : vector<1x8x16xf32> to vector<8x16xf32>
    %cst_64 = arith.constant dense<0.000000e+00> : vector<8x256xf32>
    %60 = tpu.matmul %59, %51, %cst_64 {dimension_numbers = #tpu.dot_dimension_numbers<[1], [0], [0], [1], [0, 0, 1, 1], [], []>} : vector<8x16xf32>, vector<16x256xf32>, vector<8x256xf32> -> vector<8x256xf32>
    %c1_65 = arith.constant 1 : index
    %c0_66 = arith.constant 0 : index
    %c0_67 = arith.constant 0 : index
    %61 = vector.load %arg9[%c1_65, %c0_66, %c0_67] : memref<3x256x256xf32, #tpu.memory_space<vmem>>, vector<1x256x256xf32>
    %62 = vector.shape_cast %61 : vector<1x256x256xf32> to vector<256x256xf32>
    %cst_68 = arith.constant dense<0.000000e+00> : vector<8x256xf32>
    %63 = tpu.matmul %60, %62, %cst_68 {dimension_numbers = #tpu.dot_dimension_numbers<[1], [0], [0], [1], [0, 0, 1, 1], [], []>} : vector<8x256xf32>, vector<256x256xf32>, vector<8x256xf32> -> vector<8x256xf32>
    %64 = arith.addf %57, %63 : vector<8x256xf32>
    %c2_69 = arith.constant 2 : index
    %c0_70 = arith.constant 0 : index
    %c0_71 = arith.constant 0 : index
    %65 = vector.load %arg8[%c2_69, %c0_70, %c0_71] : memref<3x8x16xf32, #tpu.memory_space<vmem>>, vector<1x8x16xf32>
    %66 = vector.shape_cast %65 : vector<1x8x16xf32> to vector<8x16xf32>
    %cst_72 = arith.constant dense<0.000000e+00> : vector<8x256xf32>
    %67 = tpu.matmul %66, %51, %cst_72 {dimension_numbers = #tpu.dot_dimension_numbers<[1], [0], [0], [1], [0, 0, 1, 1], [], []>} : vector<8x16xf32>, vector<16x256xf32>, vector<8x256xf32> -> vector<8x256xf32>
    %c2_73 = arith.constant 2 : index
    %c0_74 = arith.constant 0 : index
    %c0_75 = arith.constant 0 : index
    %68 = vector.load %arg9[%c2_73, %c0_74, %c0_75] : memref<3x256x256xf32, #tpu.memory_space<vmem>>, vector<1x256x256xf32>
    %69 = vector.shape_cast %68 : vector<1x256x256xf32> to vector<256x256xf32>
    %cst_76 = arith.constant dense<0.000000e+00> : vector<8x256xf32>
    %70 = tpu.matmul %67, %69, %cst_76 {dimension_numbers = #tpu.dot_dimension_numbers<[1], [0], [0], [1], [0, 0, 1, 1], [], []>} : vector<8x256xf32>, vector<256x256xf32>, vector<8x256xf32> -> vector<8x256xf32>
    %71 = arith.addf %64, %70 : vector<8x256xf32>
    %c0_77 = arith.constant 0 : index
    %c0_78 = arith.constant 0 : index
    %72 = vector.load %arg10[%c0_77, %c0_78] : memref<1x256xf32, #tpu.memory_space<vmem>>, vector<1x256xf32>
    %73 = vector.broadcast %72 : vector<1x256xf32> to vector<8x256xf32>
    %74 = arith.addf %71, %73 : vector<8x256xf32>
    %cst_79 = arith.constant 0.000000e+00 : f32
    %75 = vector.broadcast %cst_79 : f32 to vector<8x256xf32>
    %76 = arith.maximumf %74, %75 : vector<8x256xf32>
    %c0_80 = arith.constant 0 : index
    %c0_81 = arith.constant 0 : index
    %c0_82 = arith.constant 0 : index
    %77 = vector.load %arg12[%c0_80, %c0_81, %c0_82] : memref<4x256x256xf32, #tpu.memory_space<vmem>>, vector<1x256x256xf32>
    %78 = vector.shape_cast %77 : vector<1x256x256xf32> to vector<256x256xf32>
    %cst_83 = arith.constant dense<0.000000e+00> : vector<8x256xf32>
    %79 = tpu.matmul %76, %78, %cst_83 {dimension_numbers = #tpu.dot_dimension_numbers<[1], [0], [0], [1], [0, 0, 1, 1], [], []>} : vector<8x256xf32>, vector<256x256xf32>, vector<8x256xf32> -> vector<8x256xf32>
    %c0_84 = arith.constant 0 : index
    %c0_85 = arith.constant 0 : index
    %c0_86 = arith.constant 0 : index
    %80 = vector.load %arg11[%c0_84, %c0_85, %c0_86] : memref<4x16x8xf32, #tpu.memory_space<vmem>>, vector<1x16x8xf32>
    %81 = vector.shape_cast %80 : vector<1x16x8xf32> to vector<16x8xf32>
    %cst_87 = arith.constant dense<0.000000e+00> : vector<16x256xf32>
    %82 = tpu.matmul %81, %79, %cst_87 {dimension_numbers = #tpu.dot_dimension_numbers<[1], [0], [0], [1], [0, 0, 1, 1], [], []>} : vector<16x8xf32>, vector<8x256xf32>, vector<16x256xf32> -> vector<16x256xf32>
    %c1_88 = arith.constant 1 : index
    %c0_89 = arith.constant 0 : index
    %c0_90 = arith.constant 0 : index
    %83 = vector.load %arg12[%c1_88, %c0_89, %c0_90] : memref<4x256x256xf32, #tpu.memory_space<vmem>>, vector<1x256x256xf32>
    %84 = vector.shape_cast %83 : vector<1x256x256xf32> to vector<256x256xf32>
    %cst_91 = arith.constant dense<0.000000e+00> : vector<8x256xf32>
    %85 = tpu.matmul %76, %84, %cst_91 {dimension_numbers = #tpu.dot_dimension_numbers<[1], [0], [0], [1], [0, 0, 1, 1], [], []>} : vector<8x256xf32>, vector<256x256xf32>, vector<8x256xf32> -> vector<8x256xf32>
    %c1_92 = arith.constant 1 : index
    %c0_93 = arith.constant 0 : index
    %c0_94 = arith.constant 0 : index
    %86 = vector.load %arg11[%c1_92, %c0_93, %c0_94] : memref<4x16x8xf32, #tpu.memory_space<vmem>>, vector<1x16x8xf32>
    %87 = vector.shape_cast %86 : vector<1x16x8xf32> to vector<16x8xf32>
    %cst_95 = arith.constant dense<0.000000e+00> : vector<16x256xf32>
    %88 = tpu.matmul %87, %85, %cst_95 {dimension_numbers = #tpu.dot_dimension_numbers<[1], [0], [0], [1], [0, 0, 1, 1], [], []>} : vector<16x8xf32>, vector<8x256xf32>, vector<16x256xf32> -> vector<16x256xf32>
    %89 = arith.addf %82, %88 : vector<16x256xf32>
    %c2_96 = arith.constant 2 : index
    %c0_97 = arith.constant 0 : index
    %c0_98 = arith.constant 0 : index
    %90 = vector.load %arg12[%c2_96, %c0_97, %c0_98] : memref<4x256x256xf32, #tpu.memory_space<vmem>>, vector<1x256x256xf32>
    %91 = vector.shape_cast %90 : vector<1x256x256xf32> to vector<256x256xf32>
    %cst_99 = arith.constant dense<0.000000e+00> : vector<8x256xf32>
    %92 = tpu.matmul %76, %91, %cst_99 {dimension_numbers = #tpu.dot_dimension_numbers<[1], [0], [0], [1], [0, 0, 1, 1], [], []>} : vector<8x256xf32>, vector<256x256xf32>, vector<8x256xf32> -> vector<8x256xf32>
    %c2_100 = arith.constant 2 : index
    %c0_101 = arith.constant 0 : index
    %c0_102 = arith.constant 0 : index
    %93 = vector.load %arg11[%c2_100, %c0_101, %c0_102] : memref<4x16x8xf32, #tpu.memory_space<vmem>>, vector<1x16x8xf32>
    %94 = vector.shape_cast %93 : vector<1x16x8xf32> to vector<16x8xf32>
    %cst_103 = arith.constant dense<0.000000e+00> : vector<16x256xf32>
    %95 = tpu.matmul %94, %92, %cst_103 {dimension_numbers = #tpu.dot_dimension_numbers<[1], [0], [0], [1], [0, 0, 1, 1], [], []>} : vector<16x8xf32>, vector<8x256xf32>, vector<16x256xf32> -> vector<16x256xf32>
    %96 = arith.addf %89, %95 : vector<16x256xf32>
    %c3 = arith.constant 3 : index
    %c0_104 = arith.constant 0 : index
    %c0_105 = arith.constant 0 : index
    %97 = vector.load %arg12[%c3, %c0_104, %c0_105] : memref<4x256x256xf32, #tpu.memory_space<vmem>>, vector<1x256x256xf32>
    %98 = vector.shape_cast %97 : vector<1x256x256xf32> to vector<256x256xf32>
    %cst_106 = arith.constant dense<0.000000e+00> : vector<8x256xf32>
    %99 = tpu.matmul %76, %98, %cst_106 {dimension_numbers = #tpu.dot_dimension_numbers<[1], [0], [0], [1], [0, 0, 1, 1], [], []>} : vector<8x256xf32>, vector<256x256xf32>, vector<8x256xf32> -> vector<8x256xf32>
    %c3_107 = arith.constant 3 : index
    %c0_108 = arith.constant 0 : index
    %c0_109 = arith.constant 0 : index
    %100 = vector.load %arg11[%c3_107, %c0_108, %c0_109] : memref<4x16x8xf32, #tpu.memory_space<vmem>>, vector<1x16x8xf32>
    %101 = vector.shape_cast %100 : vector<1x16x8xf32> to vector<16x8xf32>
    %cst_110 = arith.constant dense<0.000000e+00> : vector<16x256xf32>
    %102 = tpu.matmul %101, %99, %cst_110 {dimension_numbers = #tpu.dot_dimension_numbers<[1], [0], [0], [1], [0, 0, 1, 1], [], []>} : vector<16x8xf32>, vector<8x256xf32>, vector<16x256xf32> -> vector<16x256xf32>
    %103 = arith.addf %96, %102 : vector<16x256xf32>
    %c0_111 = arith.constant 0 : index
    %c0_112 = arith.constant 0 : index
    %104 = vector.load %arg13[%c0_111, %c0_112] : memref<1x256xf32, #tpu.memory_space<vmem>>, vector<1x256xf32>
    %105 = vector.broadcast %104 : vector<1x256xf32> to vector<16x256xf32>
    %106 = arith.addf %103, %105 : vector<16x256xf32>
    %cst_113 = arith.constant 0.000000e+00 : f32
    %107 = vector.broadcast %cst_113 : f32 to vector<16x256xf32>
    %108 = arith.maximumf %106, %107 : vector<16x256xf32>
    %c0_114 = arith.constant 0 : index
    %c0_115 = arith.constant 0 : index
    %c0_116 = arith.constant 0 : index
    %109 = vector.load %arg14[%c0_114, %c0_115, %c0_116] : memref<3x16x16xf32, #tpu.memory_space<vmem>>, vector<1x16x16xf32>
    %110 = vector.shape_cast %109 : vector<1x16x16xf32> to vector<16x16xf32>
    %cst_117 = arith.constant dense<0.000000e+00> : vector<16x256xf32>
    %111 = tpu.matmul %110, %108, %cst_117 {dimension_numbers = #tpu.dot_dimension_numbers<[1], [0], [0], [1], [0, 0, 1, 1], [], []>} : vector<16x16xf32>, vector<16x256xf32>, vector<16x256xf32> -> vector<16x256xf32>
    %c0_118 = arith.constant 0 : index
    %c0_119 = arith.constant 0 : index
    %c0_120 = arith.constant 0 : index
    %112 = vector.load %arg15[%c0_118, %c0_119, %c0_120] : memref<3x256x128xf32, #tpu.memory_space<vmem>>, vector<1x256x128xf32>
    %113 = vector.shape_cast %112 : vector<1x256x128xf32> to vector<256x128xf32>
    %cst_121 = arith.constant dense<0.000000e+00> : vector<16x128xf32>
    %114 = tpu.matmul %111, %113, %cst_121 {dimension_numbers = #tpu.dot_dimension_numbers<[1], [0], [0], [1], [0, 0, 1, 1], [], []>} : vector<16x256xf32>, vector<256x128xf32>, vector<16x128xf32> -> vector<16x128xf32>
    %c1_122 = arith.constant 1 : index
    %c0_123 = arith.constant 0 : index
    %c0_124 = arith.constant 0 : index
    %115 = vector.load %arg14[%c1_122, %c0_123, %c0_124] : memref<3x16x16xf32, #tpu.memory_space<vmem>>, vector<1x16x16xf32>
    %116 = vector.shape_cast %115 : vector<1x16x16xf32> to vector<16x16xf32>
    %cst_125 = arith.constant dense<0.000000e+00> : vector<16x256xf32>
    %117 = tpu.matmul %116, %108, %cst_125 {dimension_numbers = #tpu.dot_dimension_numbers<[1], [0], [0], [1], [0, 0, 1, 1], [], []>} : vector<16x16xf32>, vector<16x256xf32>, vector<16x256xf32> -> vector<16x256xf32>
    %c1_126 = arith.constant 1 : index
    %c0_127 = arith.constant 0 : index
    %c0_128 = arith.constant 0 : index
    %118 = vector.load %arg15[%c1_126, %c0_127, %c0_128] : memref<3x256x128xf32, #tpu.memory_space<vmem>>, vector<1x256x128xf32>
    %119 = vector.shape_cast %118 : vector<1x256x128xf32> to vector<256x128xf32>
    %cst_129 = arith.constant dense<0.000000e+00> : vector<16x128xf32>
    %120 = tpu.matmul %117, %119, %cst_129 {dimension_numbers = #tpu.dot_dimension_numbers<[1], [0], [0], [1], [0, 0, 1, 1], [], []>} : vector<16x256xf32>, vector<256x128xf32>, vector<16x128xf32> -> vector<16x128xf32>
    %121 = arith.addf %114, %120 : vector<16x128xf32>
    %c2_130 = arith.constant 2 : index
    %c0_131 = arith.constant 0 : index
    %c0_132 = arith.constant 0 : index
    %122 = vector.load %arg14[%c2_130, %c0_131, %c0_132] : memref<3x16x16xf32, #tpu.memory_space<vmem>>, vector<1x16x16xf32>
    %123 = vector.shape_cast %122 : vector<1x16x16xf32> to vector<16x16xf32>
    %cst_133 = arith.constant dense<0.000000e+00> : vector<16x256xf32>
    %124 = tpu.matmul %123, %108, %cst_133 {dimension_numbers = #tpu.dot_dimension_numbers<[1], [0], [0], [1], [0, 0, 1, 1], [], []>} : vector<16x16xf32>, vector<16x256xf32>, vector<16x256xf32> -> vector<16x256xf32>
    %c2_134 = arith.constant 2 : index
    %c0_135 = arith.constant 0 : index
    %c0_136 = arith.constant 0 : index
    %125 = vector.load %arg15[%c2_134, %c0_135, %c0_136] : memref<3x256x128xf32, #tpu.memory_space<vmem>>, vector<1x256x128xf32>
    %126 = vector.shape_cast %125 : vector<1x256x128xf32> to vector<256x128xf32>
    %cst_137 = arith.constant dense<0.000000e+00> : vector<16x128xf32>
    %127 = tpu.matmul %124, %126, %cst_137 {dimension_numbers = #tpu.dot_dimension_numbers<[1], [0], [0], [1], [0, 0, 1, 1], [], []>} : vector<16x256xf32>, vector<256x128xf32>, vector<16x128xf32> -> vector<16x128xf32>
    %128 = arith.addf %121, %127 : vector<16x128xf32>
    %c0_138 = arith.constant 0 : index
    %c0_139 = arith.constant 0 : index
    %129 = vector.load %arg16[%c0_138, %c0_139] : memref<1x128xf32, #tpu.memory_space<vmem>>, vector<1x128xf32>
    %130 = vector.broadcast %129 : vector<1x128xf32> to vector<16x128xf32>
    %131 = arith.addf %128, %130 : vector<16x128xf32>
    %cst_140 = arith.constant 0.000000e+00 : f32
    %132 = vector.broadcast %cst_140 : f32 to vector<16x128xf32>
    %133 = arith.maximumf %131, %132 : vector<16x128xf32>
    %c0_141 = arith.constant 0 : index
    %c0_142 = arith.constant 0 : index
    %c0_143 = arith.constant 0 : index
    %134 = vector.load %arg18[%c0_141, %c0_142, %c0_143] : memref<4x128x16xf32, #tpu.memory_space<vmem>>, vector<1x128x16xf32>
    %135 = vector.shape_cast %134 : vector<1x128x16xf32> to vector<128x16xf32>
    %cst_144 = arith.constant dense<0.000000e+00> : vector<16x16xf32>
    %136 = tpu.matmul %133, %135, %cst_144 {dimension_numbers = #tpu.dot_dimension_numbers<[1], [0], [0], [1], [0, 0, 1, 1], [], []>} : vector<16x128xf32>, vector<128x16xf32>, vector<16x16xf32> -> vector<16x16xf32>
    %c0_145 = arith.constant 0 : index
    %c0_146 = arith.constant 0 : index
    %c0_147 = arith.constant 0 : index
    %137 = vector.load %arg17[%c0_145, %c0_146, %c0_147] : memref<4x32x16xf32, #tpu.memory_space<vmem>>, vector<1x32x16xf32>
    %138 = vector.shape_cast %137 : vector<1x32x16xf32> to vector<32x16xf32>
    %cst_148 = arith.constant dense<0.000000e+00> : vector<32x16xf32>
    %139 = tpu.matmul %138, %136, %cst_148 {dimension_numbers = #tpu.dot_dimension_numbers<[1], [0], [0], [1], [0, 0, 1, 1], [], []>} : vector<32x16xf32>, vector<16x16xf32>, vector<32x16xf32> -> vector<32x16xf32>
    %c1_149 = arith.constant 1 : index
    %c0_150 = arith.constant 0 : index
    %c0_151 = arith.constant 0 : index
    %140 = vector.load %arg18[%c1_149, %c0_150, %c0_151] : memref<4x128x16xf32, #tpu.memory_space<vmem>>, vector<1x128x16xf32>
    %141 = vector.shape_cast %140 : vector<1x128x16xf32> to vector<128x16xf32>
    %cst_152 = arith.constant dense<0.000000e+00> : vector<16x16xf32>
    %142 = tpu.matmul %133, %141, %cst_152 {dimension_numbers = #tpu.dot_dimension_numbers<[1], [0], [0], [1], [0, 0, 1, 1], [], []>} : vector<16x128xf32>, vector<128x16xf32>, vector<16x16xf32> -> vector<16x16xf32>
    %c1_153 = arith.constant 1 : index
    %c0_154 = arith.constant 0 : index
    %c0_155 = arith.constant 0 : index
    %143 = vector.load %arg17[%c1_153, %c0_154, %c0_155] : memref<4x32x16xf32, #tpu.memory_space<vmem>>, vector<1x32x16xf32>
    %144 = vector.shape_cast %143 : vector<1x32x16xf32> to vector<32x16xf32>
    %cst_156 = arith.constant dense<0.000000e+00> : vector<32x16xf32>
    %145 = tpu.matmul %144, %142, %cst_156 {dimension_numbers = #tpu.dot_dimension_numbers<[1], [0], [0], [1], [0, 0, 1, 1], [], []>} : vector<32x16xf32>, vector<16x16xf32>, vector<32x16xf32> -> vector<32x16xf32>
    %146 = arith.addf %139, %145 : vector<32x16xf32>
    %c2_157 = arith.constant 2 : index
    %c0_158 = arith.constant 0 : index
    %c0_159 = arith.constant 0 : index
    %147 = vector.load %arg18[%c2_157, %c0_158, %c0_159] : memref<4x128x16xf32, #tpu.memory_space<vmem>>, vector<1x128x16xf32>
    %148 = vector.shape_cast %147 : vector<1x128x16xf32> to vector<128x16xf32>
    %cst_160 = arith.constant dense<0.000000e+00> : vector<16x16xf32>
    %149 = tpu.matmul %133, %148, %cst_160 {dimension_numbers = #tpu.dot_dimension_numbers<[1], [0], [0], [1], [0, 0, 1, 1], [], []>} : vector<16x128xf32>, vector<128x16xf32>, vector<16x16xf32> -> vector<16x16xf32>
    %c2_161 = arith.constant 2 : index
    %c0_162 = arith.constant 0 : index
    %c0_163 = arith.constant 0 : index
    %150 = vector.load %arg17[%c2_161, %c0_162, %c0_163] : memref<4x32x16xf32, #tpu.memory_space<vmem>>, vector<1x32x16xf32>
    %151 = vector.shape_cast %150 : vector<1x32x16xf32> to vector<32x16xf32>
    %cst_164 = arith.constant dense<0.000000e+00> : vector<32x16xf32>
    %152 = tpu.matmul %151, %149, %cst_164 {dimension_numbers = #tpu.dot_dimension_numbers<[1], [0], [0], [1], [0, 0, 1, 1], [], []>} : vector<32x16xf32>, vector<16x16xf32>, vector<32x16xf32> -> vector<32x16xf32>
    %153 = arith.addf %146, %152 : vector<32x16xf32>
    %c3_165 = arith.constant 3 : index
    %c0_166 = arith.constant 0 : index
    %c0_167 = arith.constant 0 : index
    %154 = vector.load %arg18[%c3_165, %c0_166, %c0_167] : memref<4x128x16xf32, #tpu.memory_space<vmem>>, vector<1x128x16xf32>
    %155 = vector.shape_cast %154 : vector<1x128x16xf32> to vector<128x16xf32>
    %cst_168 = arith.constant dense<0.000000e+00> : vector<16x16xf32>
    %156 = tpu.matmul %133, %155, %cst_168 {dimension_numbers = #tpu.dot_dimension_numbers<[1], [0], [0], [1], [0, 0, 1, 1], [], []>} : vector<16x128xf32>, vector<128x16xf32>, vector<16x16xf32> -> vector<16x16xf32>
    %c3_169 = arith.constant 3 : index
    %c0_170 = arith.constant 0 : index
    %c0_171 = arith.constant 0 : index
    %157 = vector.load %arg17[%c3_169, %c0_170, %c0_171] : memref<4x32x16xf32, #tpu.memory_space<vmem>>, vector<1x32x16xf32>
    %158 = vector.shape_cast %157 : vector<1x32x16xf32> to vector<32x16xf32>
    %cst_172 = arith.constant dense<0.000000e+00> : vector<32x16xf32>
    %159 = tpu.matmul %158, %156, %cst_172 {dimension_numbers = #tpu.dot_dimension_numbers<[1], [0], [0], [1], [0, 0, 1, 1], [], []>} : vector<32x16xf32>, vector<16x16xf32>, vector<32x16xf32> -> vector<32x16xf32>
    %160 = arith.addf %153, %159 : vector<32x16xf32>
    %c0_173 = arith.constant 0 : index
    %c0_174 = arith.constant 0 : index
    %161 = vector.load %arg19[%c0_173, %c0_174] : memref<1x16xf32, #tpu.memory_space<vmem>>, vector<1x16xf32>
    %162 = vector.broadcast %161 : vector<1x16xf32> to vector<32x16xf32>
    %163 = arith.addf %160, %162 : vector<32x16xf32>
    %164 = arith.addf %163, %1 : vector<32x16xf32>
    %c0_175 = arith.constant 0 : index
    %c0_176 = arith.constant 0 : index
    %c0_177 = arith.constant 0 : index
    %165 = vector.load %arg20[%c0_175, %c0_176, %c0_177] : memref<1x32x16xf32, #tpu.memory_space<vmem>>, vector<1x32x16xf32>
    %166 = vector.shape_cast %165 : vector<1x32x16xf32> to vector<32x16xf32>
    %167 = vector.shape_cast %164 : vector<32x16xf32> to vector<1x32x16xf32>
    tpu.vector_store %arg20[%c0_175, %c0_176, %c0_177], %167 {strides = array<i32>} : memref<1x32x16xf32, #tpu.memory_space<vmem>>, vector<1x32x16xf32>,
    return
  }
  func.func @transform_0(%arg0: i32) -> (i32, i32, i32) {
    %c0_i32 = arith.constant 0 : i32
    %c0_i32_0 = arith.constant 0 : i32
    %c0_i32_1 = arith.constant 0 : i32
    return %arg0, %c0_i32, %c0_i32_0 : i32, i32, i32
  }
  func.func @transform_1(%arg0: i32) -> (i32, i32, i32) {
    %c0_i32 = arith.constant 0 : i32
    %c0_i32_0 = arith.constant 0 : i32
    %c0_i32_1 = arith.constant 0 : i32
    %c0_i32_2 = arith.constant 0 : i32
    return %c0_i32, %c0_i32_0, %c0_i32_1 : i32, i32, i32
  }
  func.func @transform_2(%arg0: i32) -> (i32, i32, i32) {
    %c0_i32 = arith.constant 0 : i32
    %c0_i32_0 = arith.constant 0 : i32
    %c0_i32_1 = arith.constant 0 : i32
    %c0_i32_2 = arith.constant 0 : i32
    return %c0_i32, %c0_i32_0, %c0_i32_1 : i32, i32, i32
  }
  func.func @transform_3(%arg0: i32) -> (i32, i32) {
    %c0_i32 = arith.constant 0 : i32
    %c0_i32_0 = arith.constant 0 : i32
    %c0_i32_1 = arith.constant 0 : i32
    return %c0_i32, %c0_i32_0 : i32, i32
  }
  func.func @transform_4(%arg0: i32) -> (i32, i32, i32) {
    %c0_i32 = arith.constant 0 : i32
    %c0_i32_0 = arith.constant 0 : i32
    %c0_i32_1 = arith.constant 0 : i32
    %c0_i32_2 = arith.constant 0 : i32
    return %c0_i32, %c0_i32_0, %c0_i32_1 : i32, i32, i32
  }
  func.func @transform_5(%arg0: i32) -> (i32, i32, i32) {
    %c0_i32 = arith.constant 0 : i32
    %c0_i32_0 = arith.constant 0 : i32
    %c0_i32_1 = arith.constant 0 : i32
    %c0_i32_2 = arith.constant 0 : i32
    return %c0_i32, %c0_i32_0, %c0_i32_1 : i32, i32, i32
  }
  func.func @transform_6(%arg0: i32) -> (i32, i32) {
    %c0_i32 = arith.constant 0 : i32
    %c0_i32_0 = arith.constant 0 : i32
    %c0_i32_1 = arith.constant 0 : i32
    return %c0_i32, %c0_i32_0 : i32, i32
  }
  func.func @transform_7(%arg0: i32) -> (i32, i32, i32) {
    %c0_i32 = arith.constant 0 : i32
    %c0_i32_0 = arith.constant 0 : i32
    %c0_i32_1 = arith.constant 0 : i32
    %c0_i32_2 = arith.constant 0 : i32
    return %c0_i32, %c0_i32_0, %c0_i32_1 : i32, i32, i32
  }
  func.func @transform_8(%arg0: i32) -> (i32, i32, i32) {
    %c0_i32 = arith.constant 0 : i32
    %c0_i32_0 = arith.constant 0 : i32
    %c0_i32_1 = arith.constant 0 : i32
    %c0_i32_2 = arith.constant 0 : i32
    return %c0_i32, %c0_i32_0, %c0_i32_1 : i32, i32, i32
  }
  func.func @transform_9(%arg0: i32) -> (i32, i32) {
    %c0_i32 = arith.constant 0 : i32
    %c0_i32_0 = arith.constant 0 : i32
    %c0_i32_1 = arith.constant 0 : i32
    return %c0_i32, %c0_i32_0 : i32, i32
  }
  func.func @transform_10(%arg0: i32) -> (i32, i32, i32) {
    %c0_i32 = arith.constant 0 : i32
    %c0_i32_0 = arith.constant 0 : i32
    %c0_i32_1 = arith.constant 0 : i32
    %c0_i32_2 = arith.constant 0 : i32
    return %c0_i32, %c0_i32_0, %c0_i32_1 : i32, i32, i32
  }
  func.func @transform_11(%arg0: i32) -> (i32, i32, i32) {
    %c0_i32 = arith.constant 0 : i32
    %c0_i32_0 = arith.constant 0 : i32
    %c0_i32_1 = arith.constant 0 : i32
    %c0_i32_2 = arith.constant 0 : i32
    return %c0_i32, %c0_i32_0, %c0_i32_1 : i32, i32, i32
  }
  func.func @transform_12(%arg0: i32) -> (i32, i32) {
    %c0_i32 = arith.constant 0 : i32
    %c0_i32_0 = arith.constant 0 : i32
    %c0_i32_1 = arith.constant 0 : i32
    return %c0_i32, %c0_i32_0 : i32, i32
  }
  func.func @transform_13(%arg0: i32) -> (i32, i32, i32) {
    %c0_i32 = arith.constant 0 : i32
    %c0_i32_0 = arith.constant 0 : i32
    %c0_i32_1 = arith.constant 0 : i32
    %c0_i32_2 = arith.constant 0 : i32
    return %c0_i32, %c0_i32_0, %c0_i32_1 : i32, i32, i32
  }
  func.func @transform_14(%arg0: i32) -> (i32, i32, i32) {
    %c0_i32 = arith.constant 0 : i32
    %c0_i32_0 = arith.constant 0 : i32
    %c0_i32_1 = arith.constant 0 : i32
    %c0_i32_2 = arith.constant 0 : i32
    return %c0_i32, %c0_i32_0, %c0_i32_1 : i32, i32, i32
  }
  func.func @transform_15(%arg0: i32) -> (i32, i32) {
    %c0_i32 = arith.constant 0 : i32
    %c0_i32_0 = arith.constant 0 : i32
    %c0_i32_1 = arith.constant 0 : i32
    return %c0_i32, %c0_i32_0 : i32, i32
  }
  func.func @transform_16(%arg0: i32) -> (i32, i32, i32) {
    %c0_i32 = arith.constant 0 : i32
    %c0_i32_0 = arith.constant 0 : i32
    %c0_i32_1 = arith.constant 0 : i32
    %c0_i32_2 = arith.constant 0 : i32
    return %c0_i32, %c0_i32_0, %c0_i32_1 : i32, i32, i32
  }
  func.func @transform_17(%arg0: i32) -> (i32, i32, i32) {
    %c0_i32 = arith.constant 0 : i32
    %c0_i32_0 = arith.constant 0 : i32
    %c0_i32_1 = arith.constant 0 : i32
    %c0_i32_2 = arith.constant 0 : i32
    return %c0_i32, %c0_i32_0, %c0_i32_1 : i32, i32, i32
  }
  func.func @transform_18(%arg0: i32) -> (i32, i32) {
    %c0_i32 = arith.constant 0 : i32
    %c0_i32_0 = arith.constant 0 : i32
    %c0_i32_1 = arith.constant 0 : i32
    return %c0_i32, %c0_i32_0 : i32, i32
  }
  func.func @transform_19(%arg0: i32) -> (i32, i32, i32) {
    %c0_i32 = arith.constant 0 : i32
    %c0_i32_0 = arith.constant 0 : i32
    %c0_i32_1 = arith.constant 0 : i32
    return %arg0, %c0_i32, %c0_i32_0 : i32, i32, i32
  }
}

</mosaic_0001>

<bundles_post_ra>
// kernel: forward.1
= control target key start
LH: loop header
LB: loop body
LE: loop exit
PB: predicated region body
PF: predicated region fallthrough
CT: control target
= control target key end

     0   :  { %s5668_s0 = inlined_call_operand.hbm [shape: f32[1,32,16], index: 0, kind: input, shape index: {}]   ;;  %s5669_s1 = inlined_call_operand.hbm [shape: f32[3,16,32], index: 1, kind: input, shape index: {}]   ;;  %s5670_s2 = inlined_call_operand.hbm [shape: f32[3,16,128], index: 2, kind: input, shape index: {}]   ;;  %s5671_s3 = inlined_call_operand.vmem [shape: f32[1,128], index: 3, kind: input, shape index: {}, may-alias: {3,15}]   ;;  %s5672_s4 = inlined_call_operand.hbm [shape: f32[3,16,16], index: 4, kind: input, shape index: {}]   ;;  %s5673_s5 = inlined_call_operand.hbm [shape: f32[3,128,256], index: 5, kind: input, shape index: {}]   ;;  %s5674_s6 = inlined_call_operand.vmem [shape: f32[1,256], index: 6, kind: input, shape index: {}, may-alias: {6,9,12}]   ;;  %s5675_s7 = inlined_call_operand.hbm [shape: f32[3,8,16], index: 7, kind: input, shape index: {}]   ;;  %s5676_s8 = inlined_call_operand.hbm [shape: f32[3,256,256], index: 8, kind: input, shape index: {}]   ;;  %s5677_s9 = inlined_call_operand.vmem [shape: f32[1,256], index: 9, kind: input, shape index: {}, may-alias: {6,9,12}]   ;;  %s5678_s10 = inlined_call_operand.hbm [shape: f32[4,16,8], index: 10, kind: input, shape index: {}]   ;;  %s5679_s11 = inlined_call_operand.hbm [shape: f32[4,256,256], index: 11, kind: input, shape index: {}]   ;;  %s5680_s12 = inlined_call_operand.vmem [shape: f32[1,256], index: 12, kind: input, shape index: {}, may-alias: {6,9,12}]   ;;  %s5681_s13 = inlined_call_operand.hbm [shape: f32[3,16,16], index: 13, kind: input, shape index: {}]   ;;  %s5682_s14 = inlined_call_operand.hbm [shape: f32[3,256,128], index: 14, kind: input, shape index: {}]   ;;  %s5683_s15 = inlined_call_operand.vmem [shape: f32[1,128], index: 15, kind: input, shape index: {}, may-alias: {3,15}]   ;;  %s5684_s16 = inlined_call_operand.hbm [shape: f32[4,32,16], index: 16, kind: input, shape index: {}]   ;;  %s5685_s17 = inlined_call_operand.hbm [shape: f32[4,128,16], index: 17, kind: input, shape index: {}]   ;;  %s5686_s18 = inlined_call_operand.vmem [shape: f32[1,16], index: 18, kind: input, shape index: {}]   ;;  %s5687_s19 = inlined_call_operand.hbm [shape: f32[1,32,16], index: 19, kind: output, shape index: {}]  }
   0x1   :  { %5688 = sst [smem:[#allocation32_spill]] %s5668_s0 }
   0x2   :  { %5689 = sst [smem:[#allocation33_spill]] %s5669_s1 }
   0x3   :  { %5690 = sst [smem:[#allocation34_spill]] %s5670_s2 }
   0x4   :  { %5691 = sst [smem:[#allocation35_spill]] %s5671_s3 }
   0x5   :  { %24 = vsyncpa [#allocation3], 0 }
   0x6   :  { %25 = vsyncpa [#allocation6], 0 }
   0x7   :  { %26 = vsyncpa [#allocation9], 0 }
   0x8   :  { %27 = vsyncpa [#allocation12], 0 }
   0x9   :  { %28 = vsyncpa [#allocation15], 0 }
   0xa   :  { %29 = vsyncpa [#allocation18], 0 }
   0xb   :  { %30 = vsyncpa [#allocation21], 0 }
   0xc   :  { %31 = vsyncpa [#allocation4], 0  ;;  %s5228_s0 = smov [#allocation5]   ;;  %s5229_s20 = smov [#allocation8]  }
   0xd   :  { %s49_s30 = sshll.u32 %s5228_s0, 4  ;;  %s75_s21 = sshll.u32 %s5229_s20, 4  ;;  %s50_s30 = int_to_ptr.vmem [resolvable:$true] %s49_s30  ;;  %s76_s21 = int_to_ptr.vmem [resolvable:$true] %s75_s21 }
   0xe   :  { %s4940_s1 = scalar_lea.vmem %s50_s30, 768  ;;  %p4945_p1 = scmp.lt.s32.totalorder %s50_s30, %s50_s30 }
   0xf   :  { %p4941_p0 = scmp.ne.s32.totalorder %s50_s30, %s4940_s1  ;;  %p4946_p2 = scmp.lt.s32.totalorder %s4940_s1, %s4940_s1 }
  0x11   :  { %p4947_p3 = por %p4946_p2, %p4945_p1 }
  0x13   :  { %p4948_p4 = pnand %p4947_p3, %p4941_p0 }
  0x15   :  { %4951 = shalt.err (!%p4948_p4)
}
  0x16   :  { %s5230_s22 = smov 128   ;;  %s5231_s2 = smov 8  }
  0x17   :  { %s5692_s25 = sld [smem:[#allocation33_spill]]  ;;  %s4960_s3 = scalar_lea.vmem %s76_s21, 768 }
  0x18   :  { %p4961_p5 = scmp.ne.s32.totalorder %s76_s21, %s4960_s3  ;;  %p4965_p6 = scmp.lt.s32.totalorder %s76_s21, %s76_s21 }
  0x19   :  { %p4966_p7 = scmp.lt.s32.totalorder %s4960_s3, %s4960_s3 }
  0x1b   :  { %p4967_p8 = por %p4966_p7, %p4965_p6 }
  0x1d   :  { %55 = dma.hbm_to_vmem [thread:$0]  %s5692_s25, 768, %s50_s30, [#allocation6], %s5230_s22, %s5230_s22, %s5231_s2  }
  0x1e   :  { %p4968_p9 = pnand %p4967_p8, %p4961_p5 }
  0x20   :  { %4971 = shalt.err (!%p4968_p9)
}
  0x21   :  { %81 = dma.hbm_to_vmem [thread:$0]  %s5672_s4, 768, %s76_s21, [#allocation9], %s5230_s22, %s5230_s22, %s5231_s2  }
  0x22   :  { %s5232_s28 = smov [#allocation11]   ;;  %s5233_s0 = smov [#allocation14]  }
  0x23   :  { %s101_s29 = sshll.u32 %s5232_s28, 4  ;;  %s127_s20 = sshll.u32 %s5233_s0, 4  ;;  %s102_s29 = int_to_ptr.vmem [resolvable:$true] %s101_s29  ;;  %s128_s20 = int_to_ptr.vmem [resolvable:$true] %s127_s20 }
  0x24   :  { %s4980_s30 = scalar_lea.vmem %s102_s29, 384  ;;  %p4985_p11 = scmp.lt.s32.totalorder %s102_s29, %s102_s29 }
  0x25   :  { %p4981_p10 = scmp.ne.s32.totalorder %s102_s29, %s4980_s30  ;;  %p4986_p12 = scmp.lt.s32.totalorder %s4980_s30, %s4980_s30 }
  0x27   :  { %p4987_p13 = por %p4986_p12, %p4985_p11 }
  0x29   :  { %p4988_p0 = pnand %p4987_p13, %p4981_p10 }
  0x2b   :  { %4991 = shalt.err (!%p4988_p0)
}
  0x2c   :  { %107 = dma.hbm_to_vmem [thread:$0]  %s5675_s7, 384, %s102_s29, [#allocation12], %s5230_s22, %s5230_s22, %s5231_s2  }
  0x2d   :  { %s5000_s4 = scalar_lea.vmem %s128_s20, 1024  ;;  %p5005_p2 = scmp.lt.s32.totalorder %s128_s20, %s128_s20 }
  0x2e   :  { %p5001_p1 = scmp.ne.s32.totalorder %s128_s20, %s5000_s4  ;;  %p5006_p3 = scmp.lt.s32.totalorder %s5000_s4, %s5000_s4 }
  0x30   :  { %p5007_p4 = por %p5006_p3, %p5005_p2 }
  0x32   :  { %p5008_p5 = pnand %p5007_p4, %p5001_p1 }
  0x34   :  { %5011 = shalt.err (!%p5008_p5)
}
  0x35   :  { %133 = dma.hbm_to_vmem [thread:$0]  %s5678_s10, 1024, %s128_s20, [#allocation15], %s5230_s22, %s5230_s22, %s5231_s2  }
  0x36   :  { %s5234_s25 = smov [#allocation17]   ;;  %s5235_s26 = smov [#allocation20]  }
  0x37   :  { %s153_s3 = sshll.u32 %s5234_s25, 4  ;;  %s179_s27 = sshll.u32 %s5235_s26, 4  ;;  %s154_s3 = int_to_ptr.vmem [resolvable:$true] %s153_s3  ;;  %s180_s27 = int_to_ptr.vmem [resolvable:$true] %s179_s27 }
  0x38   :  { %s5020_s7 = scalar_lea.vmem %s154_s3, 768  ;;  %p5025_p7 = scmp.lt.s32.totalorder %s154_s3, %s154_s3 }
  0x39   :  { %p5021_p6 = scmp.ne.s32.totalorder %s154_s3, %s5020_s7  ;;  %p5026_p8 = scmp.lt.s32.totalorder %s5020_s7, %s5020_s7 }
  0x3b   :  { %p5027_p9 = por %p5026_p8, %p5025_p7 }
  0x3d   :  { %p5028_p10 = pnand %p5027_p9, %p5021_p6 }
  0x3f   :  { %5031 = shalt.err (!%p5028_p10)
}
  0x40   :  { %159 = dma.hbm_to_vmem [thread:$0]  %s5681_s13, 768, %s154_s3, [#allocation18], %s5230_s22, %s5230_s22, %s5231_s2  }
  0x41   :  { %s5040_s10 = scalar_lea.vmem %s180_s27, 2048  ;;  %p5045_p12 = scmp.lt.s32.totalorder %s180_s27, %s180_s27 }
  0x42   :  { %p5041_p11 = scmp.ne.s32.totalorder %s180_s27, %s5040_s10  ;;  %p5046_p13 = scmp.lt.s32.totalorder %s5040_s10, %s5040_s10 }
  0x44   :  { %p5047_p0 = por %p5046_p13, %p5045_p12 }
  0x46   :  { %p5048_p1 = pnand %p5047_p0, %p5041_p11 }
  0x48   :  { %5051 = shalt.err (!%p5048_p1)
}
  0x49   :  { %185 = dma.hbm_to_vmem [thread:$0]  %s5684_s16, 2048, %s180_s27, [#allocation21], %s5230_s22, %s5230_s22, %s5231_s2  }
  0x4a   :  { %s5236_s30 = smov [#allocation2]   ;;  %s5237_s23 = smov [#allocation7]  }
  0x4b   :  { %s37_s1 = sshll.u32 %s5236_s30, 4  ;;  %s61_s4 = sshll.u32 %s5237_s23, 4  ;;  %s38_s1 = int_to_ptr.vmem [resolvable:$true] %s37_s1  ;;  %s62_s4 = int_to_ptr.vmem [resolvable:$true] %s61_s4 }
  0x4c   :  { %s5060_s13 = scalar_lea.vmem %s38_s1, 512  ;;  %p5065_p3 = scmp.lt.s32.totalorder %s38_s1, %s38_s1 }
  0x4d   :  { %p5061_p2 = scmp.ne.s32.totalorder %s38_s1, %s5060_s13  ;;  %p5066_p4 = scmp.lt.s32.totalorder %s5060_s13, %s5060_s13 }
  0x4f   :  { %p5067_p5 = por %p5066_p4, %p5065_p3 }
  0x51   :  { %p5068_p6 = pnand %p5067_p5, %p5061_p2 }
  0x53   :  { %5071 = shalt.err (!%p5068_p6)
}
  0x54   :  { %s5693_s25 = sld [smem:[#allocation32_spill]]  ;;  %s5080_s16 = scalar_lea.vmem %s62_s4, 768 }
  0x55   :  { %p5081_p7 = scmp.ne.s32.totalorder %s62_s4, %s5080_s16  ;;  %p5085_p8 = scmp.lt.s32.totalorder %s62_s4, %s62_s4 }
  0x56   :  { %p5086_p9 = scmp.lt.s32.totalorder %s5080_s16, %s5080_s16 }
  0x58   :  { %p5087_p10 = por %p5086_p9, %p5085_p8 }
  0x5a   :  { %43 = dma.hbm_to_vmem [thread:$0]  %s5693_s25, 512, %s38_s1, [#allocation3], %s5230_s22, %s5230_s22, %s5231_s2  }
  0x5b   :  { %p5088_p11 = pnand %p5087_p10, %p5081_p7 }
  0x5d   :  { %5091 = shalt.err (!%p5088_p11)
}
  0x5e   :  { %s5694_s27 = sld [smem:[#allocation34_spill]]  ;;  %s5238_s7 = smov [#allocation10]  }
  0x5f   :  { %s87_s28 = sshll.u32 %s5238_s7, 4  ;;  %s88_s28 = int_to_ptr.vmem [resolvable:$true] %s87_s28 }
  0x60   :  { %s5100_s29 = scalar_lea.vmem %s88_s28, 12288  ;;  %p5105_p13 = scmp.lt.s32.totalorder %s88_s28, %s88_s28 }
  0x61   :  { %p5101_p12 = scmp.ne.s32.totalorder %s88_s28, %s5100_s29  ;;  %p5106_p0 = scmp.lt.s32.totalorder %s5100_s29, %s5100_s29 }
  0x63   :  { %p5107_p1 = por %p5106_p0, %p5105_p13 }
  0x64   :  { %67 = dma.hbm_to_vmem [thread:$0]  %s5694_s27, 768, %s62_s4, [#allocation6], %s5230_s22, %s5230_s22, %s5231_s2  }
  0x65   :  { %p5108_p2 = pnand %p5107_p1, %p5101_p12 }
  0x67   :  { %5111 = shalt.err (!%p5108_p2)
}
  0x68   :  { %s5239_s10 = smov 256   ;;  %s5240_s0 = smov 16  }
  0x69   :  { %93 = dma.hbm_to_vmem [thread:$0]  %s5673_s5, 12288, %s88_s28, [#allocation9], %s5239_s10, %s5239_s10, %s5240_s0  }
  0x6a   :  { %s5241_s1 = smov [#allocation13]   ;;  %s5242_s4 = smov [#allocation16]  }
  0x6b   :  { %s113_s23 = sshll.u32 %s5241_s1, 4  ;;  %s139_s13 = sshll.u32 %s5242_s4, 4  ;;  %s114_s23 = int_to_ptr.vmem [resolvable:$true] %s113_s23  ;;  %s140_s13 = int_to_ptr.vmem [resolvable:$true] %s139_s13 }
  0x6c   :  { %s5120_s21 = scalar_lea.vmem %s114_s23, 24576  ;;  %p5125_p4 = scmp.lt.s32.totalorder %s114_s23, %s114_s23 }
  0x6d   :  { %p5121_p3 = scmp.ne.s32.totalorder %s114_s23, %s5120_s21  ;;  %p5126_p5 = scmp.lt.s32.totalorder %s5120_s21, %s5120_s21 }
  0x6f   :  { %p5127_p6 = por %p5126_p5, %p5125_p4 }
  0x71   :  { %p5128_p7 = pnand %p5127_p6, %p5121_p3 }
  0x73   :  { %5131 = shalt.err (!%p5128_p7)
}
  0x74   :  { %119 = dma.hbm_to_vmem [thread:$0]  %s5676_s8, 24576, %s114_s23, [#allocation12], %s5239_s10, %s5239_s10, %s5240_s0  }
  0x75   :  { %s5140_s16 = scalar_lea.vmem %s140_s13, 32768  ;;  %p5145_p9 = scmp.lt.s32.totalorder %s140_s13, %s140_s13 }
  0x76   :  { %p5141_p8 = scmp.ne.s32.totalorder %s140_s13, %s5140_s16  ;;  %p5146_p10 = scmp.lt.s32.totalorder %s5140_s16, %s5140_s16 }
  0x78   :  { %p5147_p11 = por %p5146_p10, %p5145_p9 }
  0x7a   :  { %p5148_p12 = pnand %p5147_p11, %p5141_p8 }
  0x7c   :  { %5151 = shalt.err (!%p5148_p12)
}
  0x7d   :  { %145 = dma.hbm_to_vmem [thread:$0]  %s5679_s11, 32768, %s140_s13, [#allocation15], %s5239_s10, %s5239_s10, %s5240_s0  }
  0x7e   :  { %s5243_s26 = smov [#allocation19]   ;;  %s5244_s7 = smov [#allocation22]  }
  0x7f   :  { %s165_s27 = sshll.u32 %s5243_s26, 4  ;;  %s191_s28 = sshll.u32 %s5244_s7, 4  ;;  %s166_s27 = int_to_ptr.vmem [resolvable:$true] %s165_s27  ;;  %s192_s28 = int_to_ptr.vmem [resolvable:$true] %s191_s28 }
  0x80   :  { %s5160_s29 = scalar_lea.vmem %s166_s27, 12288  ;;  %p5165_p0 = scmp.lt.s32.totalorder %s166_s27, %s166_s27 }
  0x81   :  { %p5161_p13 = scmp.ne.s32.totalorder %s166_s27, %s5160_s29  ;;  %p5166_p1 = scmp.lt.s32.totalorder %s5160_s29, %s5160_s29 }
  0x83   :  { %p5167_p2 = por %p5166_p1, %p5165_p0 }
  0x85   :  { %p5168_p3 = pnand %p5167_p2, %p5161_p13 }
  0x87   :  { %5171 = shalt.err (!%p5168_p3)
}
  0x88   :  { %171 = dma.hbm_to_vmem [thread:$0]  %s5682_s14, 12288, %s166_s27, [#allocation18], %s5230_s22, %s5230_s22, %s5231_s2  }
  0x89   :  { %s5180_s11 = scalar_lea.vmem %s192_s28, 8192  ;;  %p5185_p5 = scmp.lt.s32.totalorder %s192_s28, %s192_s28 }
  0x8a   :  { %p5181_p4 = scmp.ne.s32.totalorder %s192_s28, %s5180_s11  ;;  %p5186_p6 = scmp.lt.s32.totalorder %s5180_s11, %s5180_s11 }
  0x8c   :  { %p5187_p7 = por %p5186_p6, %p5185_p5 }
  0x8e   :  { %p5188_p8 = pnand %p5187_p7, %p5181_p4 }
  0x90   :  { %5191 = shalt.err (!%p5188_p8)
}
  0x91   :  { %197 = dma.hbm_to_vmem [thread:$0]  %s5685_s17, 8192, %s192_s28, [#allocation21], %s5230_s22, %s5230_s22, %s5231_s2  }
  0x92   :  { %5212 = dma.done.wait [#allocation3], 512  }
  0x93   :  { %5213 = vsyncadd [#allocation3], 4294966784 }
  0x94   :  { %5214 = dma.done.wait [#allocation6], 1536  }
  0x95   :  { %5215 = vsyncadd [#allocation6], 4294965760 }
  0x96   :  { %5216 = dma.done.wait [#allocation9], 13056  }
  0x97   :  { %5217 = vsyncadd [#allocation9], 4294954240 }
  0x98   :  { %5218 = dma.done.wait [#allocation12], 24960  }
  0x99   :  { %5219 = vsyncadd [#allocation12], 4294942336 }
  0x9a   :  { %5220 = dma.done.wait [#allocation15], 33792  }
  0x9b   :  { %5221 = vsyncadd [#allocation15], 4294933504 }
  0x9c   :  { %5222 = dma.done.wait [#allocation18], 13056  }
  0x9d   :  { %5223 = vsyncadd [#allocation18], 4294954240 }
  0x9e   :  { %5224 = dma.done.wait [#allocation21], 10240  }
  0x9f   :  { %5225 = vsyncadd [#allocation21], 4294957056  ;;  %v242_v0 = vld [vmem:[#allocation2 + $0x18] sm:$0xff]  ;;  %v241_v1 = vld [vmem:[#allocation2 + $0x10] sm:$0xff]  ;;  %vm245_vm0 = vcmask 261120   ;;  %vm416_vm1 = vcmask 130048  }
  0xa0   :  { %4654 = vmatprep.subr.mxu0 %v242_v0  ;;  %4665 = vmatprep.subr.mxu1 %v242_v0  ;;  %v240_v2 = vld [vmem:[#allocation2 + $0x8] sm:$0xff]  ;;  %v239_v3 = vld [vmem:[#allocation2] sm:$0xff]  ;;  %v330_v5 = vld [vmem:[#allocation5 + $0x10] sm:$0xff]  ;;  %s5695_s30 = sld [smem:[#allocation35_spill]]  ;;  %vm2292_vm2 = vcmask 64512   ;;  %s5246_s25 = smov [#allocation23]  }
  0xa1   :  { %4655 = vmatpush3.msra.mxu0 %v242_v0  ;;  %4666 = vmatpush3.msra.mxu1 %v242_v0  ;;  %v243_v4 = vld [vmem:[#allocation5] sm:$0xff]  ;;  %v244_v6 = vld [vmem:[#allocation5 + $0x8] sm:$0xff]  ;;  %v331_v7 = vld [vmem:[#allocation5 + $0x18] sm:$0xff]  ;;  %s4330_s16 = sshll.u32 %s5246_s25, 4  ;;  %s4331_s16 = int_to_ptr.vmem [resolvable:$true] %s4330_s16 }
  0xa2   :  { %4656 = vmatprep.subr.mxu0 %v241_v1  ;;  %4667 = vmatprep.subr.mxu1 %v241_v1  ;;  %v415_v8 = vld [vmem:[#allocation7 + $0x18] sm:$0xff]  ;;  %v328_v9 = vld [vmem:[#allocation7 + $0x8] sm:$0xff]  ;;  %v414_v10 = vld [vmem:[#allocation7 + $0x10] sm:$0xff]  ;;  %p5197_p10 = scmp.lt.s32.totalorder %s4331_s16, %s4331_s16 }
  0xa3   :  { %4657 = vmatpush3.msra.mxu0 %v241_v1  ;;  %4668 = vmatpush3.msra.mxu1 %v241_v1  ;;  %v327_v11 = vld [vmem:[#allocation7] sm:$0xff]  ;;  %v580_v16 = vld [vmem:[#allocation5 + $0x20] sm:$0xff]  ;;  %v581_v17 = vld [vmem:[#allocation5 + $0x28] sm:$0xff] }
  0xa4   :  { %4658 = vmatprep.subr.mxu0 %v240_v2  ;;  %4669 = vmatprep.subr.mxu1 %v240_v2  ;;  %v665_v18 = vld [vmem:[#allocation7 + $0x28] sm:$0xff]  ;;  %v664_v19 = vld [vmem:[#allocation7 + $0x20] sm:$0xff]  ;;  %v760_v24 = vld [vmem:[#allocation8] sm:$0xff] }
  0xa5   :  { %4659 = vmatpush3.msra.mxu0 %v240_v2  ;;  %4670 = vmatpush3.msra.mxu1 %v240_v2  ;;  %v876_v25 = vld [vmem:[#allocation8 + $0x10] sm:$0xff]  ;;  %v761_v39 = vld [vmem:[#allocation8 + $0x8] sm:$0xff]  ;;  %v877_v40 = vld [vmem:[#allocation8 + $0x18] sm:$0xff] }
  0xa6   :  { %4660 = vmatprep.subr.mxu0 %v239_v3  ;;  %4671 = vmatprep.subr.mxu1 %v239_v3  ;;  %v4360_v30 = vld [vmem:[%s5695_s30] ss:$0 sm:$0xff]  ;;  %v991_v41 = vld [vmem:[#allocation10 + $0x1f8] sm:$0xff]  ;;  %v989_v45 = vld [vmem:[#allocation10 + $0x1e8] sm:$0xff] }
  0xa7   :  { %4661 = vmatpush3.msra.mxu0 %v239_v3  ;;  %4662 = vmatprep.mubr.msk.f32.mxu0 %vm245_vm0, %v243_v4  ;;  %v874_v42 = vld [vmem:[#allocation10 + $0xf8] sm:$0xff]  ;;  %v990_v43 = vld [vmem:[#allocation10 + $0x1f0] sm:$0xff]  ;;  %v872_v46 = vld [vmem:[#allocation10 + $0xe8] sm:$0xff] }
  0xa8   :  { %4672 = vmatpush3.msra.mxu1 %v239_v3  ;;  %4673 = vmatprep.mubr.msk.f32.mxu1 %vm245_vm0, %v330_v5  ;;  %v873_v44 = vld [vmem:[#allocation10 + $0xf0] sm:$0xff]  ;;  %v988_v47 = vld [vmem:[#allocation10 + $0x1e0] sm:$0xff]  ;;  %v987_v49 = vld [vmem:[#allocation10 + $0x1d8] sm:$0xff] }
  0xa9   :  { %4663 = vmatmul.mubr.msk.f32.vlgmr.msra.gmra.mxu0 %vm245_vm0, %v244_v6  ;;  %4674 = vmatmul.mubr.msk.f32.vlgmr.msra.gmra.mxu1 %vm245_vm0, %v331_v7  ;;  %v871_v48 = vld [vmem:[#allocation10 + $0xe0] sm:$0xff]  ;;  %v870_v50 = vld [vmem:[#allocation10 + $0xd8] sm:$0xff]  ;;  %v986_v51 = vld [vmem:[#allocation10 + $0x1d0] sm:$0xff] }
  0xaa   :  { %4676 = vmatprep.subr.mxu0 %v415_v8  ;;  %4683 = vmatprep.subr.mxu1 %v328_v9  ;;  %v869_v52 = vld [vmem:[#allocation10 + $0xd0] sm:$0xff]  ;;  %v985_v53 = vld [vmem:[#allocation10 + $0x1c8] sm:$0xff]  ;;  %v984_v55 = vld [vmem:[#allocation10 + $0x1c0] sm:$0xff] }
  0xab   :  { %4677 = vmatpush3.msra.mxu0 %v415_v8  ;;  %4684 = vmatpush3.msra.mxu1 %v328_v9  ;;  %v868_v54 = vld [vmem:[#allocation10 + $0xc8] sm:$0xff]  ;;  %v867_v56 = vld [vmem:[#allocation10 + $0xc0] sm:$0xff]  ;;  %v983_v57 = vld [vmem:[#allocation10 + $0x1b8] sm:$0xff] }
  0xac   :  { %4678 = vmatprep.subr.mxu0 %v414_v10  ;;  %4685 = vmatprep.subr.mxu1 %v327_v11  ;;  %v866_v58 = vld [vmem:[#allocation10 + $0xb8] sm:$0xff]  ;;  %v982_v59 = vld [vmem:[#allocation10 + $0x1b0] sm:$0xff]  ;;  %v981_v61 = vld [vmem:[#allocation10 + $0x1a8] sm:$0xff] }
  0xad   :  { %4679 = vmatpush3.msra.mxu0 %v414_v10  ;;  %4686 = vmatpush3.msra.mxu1 %v327_v11  ;;  %v865_v60 = vld [vmem:[#allocation10 + $0xb0] sm:$0xff]  ;;  %v864_v62 = vld [vmem:[#allocation10 + $0xa8] sm:$0xff]  ;;  %v980_v63 = vld [vmem:[#allocation10 + $0x1a0] sm:$0xff] }
  0xae   :  { %4690 = vmatprep.subr.mxu0 %v242_v0  ;;  %4701 = vmatprep.subr.mxu1 %v665_v18  ;;  %v861_v4 = vld [vmem:[#allocation10 + $0x90] sm:$0xff]  ;;  %v977_v5 = vld [vmem:[#allocation10 + $0x188] sm:$0xff]  ;;  %v976_v7 = vld [vmem:[#allocation10 + $0x180] sm:$0xff] }
  0xaf   :  { %v860_v6 = vld [vmem:[#allocation10 + $0x88] sm:$0xff]  ;;  %v859_v8 = vld [vmem:[#allocation10 + $0x80] sm:$0xff]  ;;  %v975_v9 = vld [vmem:[#allocation10 + $0x178] sm:$0xff] }
  0xb0   :  { %v858_v10 = vld [vmem:[#allocation10 + $0x78] sm:$0xff]  ;;  %v974_v11 = vld [vmem:[#allocation10 + $0x170] sm:$0xff] }
 0x169   :  { %v4664_v12 = vpop.f32.mrf.mxu0  ;;  %v4675_v13 = vpop.f32.mrf.mxu1 }
 0x16b   :  { %v318_v14 = vpop.f32.mrf.mxu0  ;;  %v404_v15 = vpop.f32.mrf.mxu1 }
 0x16c   :  { %4680 = vmatprep.mubr.msk.f32.mxu0 %vm416_vm1, %v404_v15  ;;  %4687 = vmatprep.mubr.msk.f32.mxu1 %vm416_vm1, %v318_v14  ;;  %v856_v14 = vld [vmem:[#allocation10 + $0x68] sm:$0xff]  ;;  %v972_v15 = vld [vmem:[#allocation10 + $0x160] sm:$0xff] }
 0x16d   :  { %4681 = vmatmul.mubr.msk.f32.vlgmr.msra.gmra.mxu0 %vm416_vm1, %v4675_v13  ;;  %4688 = vmatmul.mubr.msk.f32.vlgmr.msra.gmra.mxu1 %vm416_vm1, %v4664_v12  ;;  %v857_v12 = vld [vmem:[#allocation10 + $0x70] sm:$0xff]  ;;  %v973_v13 = vld [vmem:[#allocation10 + $0x168] sm:$0xff] }
 0x16e   :  { %4691 = vmatpush3.msra.mxu0 %v242_v0  ;;  %4698 = vmatprep.mubr.msk.f32.mxu0 %vm245_vm0, %v580_v16  ;;  %v863_v0 = vld [vmem:[#allocation10 + $0xa0] sm:$0xff] }
 0x16f   :  { %4692 = vmatprep.subr.mxu0 %v241_v1  ;;  %4702 = vmatpush3.msra.mxu1 %v665_v18  ;;  %v855_v16 = vld [vmem:[#allocation10 + $0x60] sm:$0xff]  ;;  %v854_v18 = vld [vmem:[#allocation10 + $0x58] sm:$0xff] }
 0x170   :  { %4693 = vmatpush3.msra.mxu0 %v241_v1  ;;  %4703 = vmatprep.subr.mxu1 %v664_v19  ;;  %v979_v1 = vld [vmem:[#allocation10 + $0x198] sm:$0xff] }
 0x171   :  { %4694 = vmatprep.subr.mxu0 %v240_v2  ;;  %4704 = vmatpush3.msra.mxu1 %v664_v19  ;;  %v970_v19 = vld [vmem:[#allocation10 + $0x150] sm:$0xff] }
 0x172   :  { %4695 = vmatpush3.msra.mxu0 %v240_v2  ;;  %v862_v2 = vld [vmem:[#allocation10 + $0x98] sm:$0xff] }
 0x173   :  { %4696 = vmatprep.subr.mxu0 %v239_v3 }
 0x174   :  { %4697 = vmatpush3.msra.mxu0 %v239_v3  ;;  %v978_v3 = vld [vmem:[#allocation10 + $0x190] sm:$0xff] }
 0x175   :  { %4699 = vmatmul.mubr.msk.f32.vlgmr.msra.gmra.mxu0 %vm245_vm0, %v581_v17  ;;  %v971_v17 = vld [vmem:[#allocation10 + $0x158] sm:$0xff] }
 0x176   :  { %4719 = vmatprep.mubr.msk.f32.mxu0 %vm416_vm1, %v876_v25  ;;  %v967_v25 = vld [vmem:[#allocation10 + $0x138] sm:$0xff] }
 0x22d   :  { %v4682_v20 = vpop.f32.mrf.mxu0  ;;  %v4689_v26 = vpop.f32.mrf.mxu1 }
 0x22e   :  { %v576_v28 = vadd.f32 %v4689_v26, %v4682_v20  ;;  %v853_v20 = vld [vmem:[#allocation10 + $0x50] sm:$0xff]  ;;  %v850_v26 = vld [vmem:[#allocation10 + $0x38] sm:$0xff] }
 0x22f   :  { %v489_v21 = vpop.f32.mrf.mxu0  ;;  %v570_v27 = vpop.f32.mrf.mxu1 }
 0x230   :  { %v571_v31 = vadd.f32 %v570_v27, %v489_v21  ;;  %v969_v21 = vld [vmem:[#allocation10 + $0x148] sm:$0xff]  ;;  %v966_v27 = vld [vmem:[#allocation10 + $0x130] sm:$0xff] }
 0x235   :  { %v4700_v22 = vpop.f32.mrf.mxu0 }
 0x237   :  { %v654_v23 = vpop.f32.mrf.mxu0 }
 0x238   :  { %4705 = vmatprep.mubr.msk.f32.mxu1 %vm416_vm1, %v654_v23  ;;  %v968_v23 = vld [vmem:[#allocation10 + $0x140] sm:$0xff] }
 0x239   :  { %4706 = vmatmul.mubr.msk.f32.vlgmr.msra.gmra.mxu1 %vm416_vm1, %v4700_v22  ;;  %v852_v22 = vld [vmem:[#allocation10 + $0x48] sm:$0xff] }
 0x23a   :  { %4712 = vmatprep.mubr.msk.f32.mxu1 %vm416_vm1, %v760_v24  ;;  %v851_v24 = vld [vmem:[#allocation10 + $0x40] sm:$0xff] }
 0x2f9   :  { %v4707_v29 = vpop.f32.mrf.mxu1 }
 0x2fa   :  { %v748_v32 = vadd.f32 %v4707_v29, %v576_v28  ;;  %v849_v28 = vld [vmem:[#allocation10 + $0x30] sm:$0xff]  ;;  %v965_v29 = vld [vmem:[#allocation10 + $0x128] sm:$0xff] }
 0x2fb   :  { %v738_v33 = vpop.f32.mrf.mxu1 }
 0x2fc   :  { %v757_v34 = vadd.f32 %v4360_v30, %v748_v32  ;;  %v747_v35 = vadd.f32 %v738_v33, %v571_v31  ;;  %v964_v31 = vld [vmem:[#allocation10 + $0x120] sm:$0xff]  ;;  %v963_v33 = vld [vmem:[#allocation10 + $0x118] sm:$0xff] }
 0x2fd   :  { %v847_v32 = vld [vmem:[#allocation10 + $0x20] sm:$0xff] }
 0x2fe   :  { %v5433_v36 = vmax.f32 %v757_v34, 0.0  ;;  %v756_v37 = vadd.f32 %v4360_v30, %v747_v35  ;;  %v848_v30 = vld [vmem:[#allocation10 + $0x28] sm:$0xff]  ;;  %v846_v34 = vld [vmem:[#allocation10 + $0x18] sm:$0xff]  ;;  %v962_v35 = vld [vmem:[#allocation10 + $0x110] sm:$0xff] }
 0x300   :  { %v5435_v38 = vmax.f32 %v756_v37, 0.0  ;;  %4708 = vmatprep.subr.mxu1 %v5433_v36  ;;  %4715 = vmatprep.subr.mxu0 %v5433_v36  ;;  %v961_v37 = vld [vmem:[#allocation10 + $0x108] sm:$0xff] }
 0x301   :  { %4709 = vmatpush3.msra.mxu1 %v5433_v36  ;;  %4716 = vmatpush3.msra.mxu0 %v5433_v36 }
 0x302   :  { %4710 = vmatprep.subr.mxu1 %v5435_v38  ;;  %4717 = vmatprep.subr.mxu0 %v5435_v38 }
 0x303   :  { %4711 = vmatpush3.msra.mxu1 %v5435_v38  ;;  %4718 = vmatpush3.msra.mxu0 %v5435_v38 }
 0x304   :  { %4713 = vmatmul.mubr.msk.f32.vlgmr.msra.gmra.mxu1 %vm416_vm1, %v761_v39  ;;  %4720 = vmatmul.mubr.msk.f32.vlgmr.msra.gmra.mxu0 %vm416_vm1, %v877_v40  ;;  %v960_v39 = vld [vmem:[#allocation10 + $0x100] sm:$0xff]  ;;  %v845_v40 = vld [vmem:[#allocation10 + $0x10] sm:$0xff] }
 0x305   :  { %992 = vmatprep.subr.mxu1 %v991_v41  ;;  %1069 = vmatprep.subr.mxu0 %v874_v42  ;;  %v844_v41 = vld [vmem:[#allocation10 + $0x8] sm:$0xff]  ;;  %v843_v42 = vld [vmem:[#allocation10] sm:$0xff] }
 0x306   :  { %993 = vmatpush1.msra.mxu1 %v990_v43  ;;  %1070 = vmatpush1.msra.mxu0 %v873_v44  ;;  %v5245_v43 = vmov 0.0   ;;  %v1262_v44 = vld [vmem:[#allocation10 + $0x2f8] sm:$0xff] }
 0x307   :  { %994 = vmatprep.subr.mxu1 %v989_v45  ;;  %1071 = vmatprep.subr.mxu0 %v872_v46 }
 0x308   :  { %995 = vmatpush1.msra.mxu1 %v988_v47  ;;  %1072 = vmatpush1.msra.mxu0 %v871_v48 }
 0x309   :  { %996 = vmatprep.subr.mxu1 %v987_v49  ;;  %1073 = vmatprep.subr.mxu0 %v870_v50  ;;  %v1261_v49 = vld [vmem:[#allocation10 + $0x2f0] sm:$0xff] }
 0x30a   :  { %997 = vmatpush1.msra.mxu1 %v986_v51  ;;  %1074 = vmatpush1.msra.mxu0 %v869_v52  ;;  %v1147_v50 = vld [vmem:[#allocation8 + $0x20] sm:$0xff]  ;;  %v1260_v51 = vld [vmem:[#allocation10 + $0x2e8] sm:$0xff]  ;;  %v1259_v52 = vld [vmem:[#allocation10 + $0x2e0] sm:$0xff] }
 0x30b   :  { %998 = vmatprep.subr.mxu1 %v985_v53  ;;  %1075 = vmatprep.subr.mxu0 %v868_v54  ;;  %v1258_v53 = vld [vmem:[#allocation10 + $0x2d8] sm:$0xff] }
 0x30c   :  { %999 = vmatpush1.msra.mxu1 %v984_v55  ;;  %1076 = vmatpush1.msra.mxu0 %v867_v56  ;;  %v1148_v54 = vld [vmem:[#allocation8 + $0x28] sm:$0xff]  ;;  %v1256_v55 = vld [vmem:[#allocation10 + $0x2c8] sm:$0xff]  ;;  %v1255_v56 = vld [vmem:[#allocation10 + $0x2c0] sm:$0xff] }
 0x30d   :  { %1000 = vmatprep.subr.mxu1 %v983_v57  ;;  %1077 = vmatprep.subr.mxu0 %v866_v58  ;;  %v1253_v57 = vld [vmem:[#allocation10 + $0x2b0] sm:$0xff]  ;;  %v1252_v58 = vld [vmem:[#allocation10 + $0x2a8] sm:$0xff] }
 0x30e   :  { %1001 = vmatpush1.msra.mxu1 %v982_v59  ;;  %1078 = vmatpush1.msra.mxu0 %v865_v60  ;;  %v1251_v59 = vld [vmem:[#allocation10 + $0x2a0] sm:$0xff]  ;;  %v1250_v60 = vld [vmem:[#allocation10 + $0x298] sm:$0xff] }
 0x30f   :  { %1002 = vmatprep.subr.mxu1 %v981_v61  ;;  %1079 = vmatprep.subr.mxu0 %v864_v62  ;;  %v1249_v61 = vld [vmem:[#allocation10 + $0x290] sm:$0xff]  ;;  %v1248_v62 = vld [vmem:[#allocation10 + $0x288] sm:$0xff] }
 0x310   :  { %1003 = vmatpush1.msra.mxu1 %v980_v63  ;;  %1080 = vmatpush1.msra.mxu0 %v863_v0  ;;  %v1247_v63 = vld [vmem:[#allocation10 + $0x280] sm:$0xff]  ;;  %v1246_v0 = vld [vmem:[#allocation10 + $0x278] sm:$0xff] }
 0x311   :  { %1004 = vmatprep.subr.mxu1 %v979_v1  ;;  %1081 = vmatprep.subr.mxu0 %v862_v2  ;;  %v1245_v1 = vld [vmem:[#allocation10 + $0x270] sm:$0xff]  ;;  %v1244_v2 = vld [vmem:[#allocation10 + $0x268] sm:$0xff] }
 0x312   :  { %1005 = vmatpush1.msra.mxu1 %v978_v3  ;;  %1082 = vmatpush1.msra.mxu0 %v861_v4  ;;  %v1243_v3 = vld [vmem:[#allocation10 + $0x260] sm:$0xff]  ;;  %v1242_v4 = vld [vmem:[#allocation10 + $0x258] sm:$0xff] }
 0x313   :  { %1006 = vmatprep.subr.mxu1 %v977_v5  ;;  %1083 = vmatprep.subr.mxu0 %v860_v6  ;;  %v1241_v5 = vld [vmem:[#allocation10 + $0x250] sm:$0xff]  ;;  %v1240_v6 = vld [vmem:[#allocation10 + $0x248] sm:$0xff] }
 0x314   :  { %1007 = vmatpush1.msra.mxu1 %v976_v7  ;;  %1084 = vmatpush1.msra.mxu0 %v859_v8  ;;  %v1239_v7 = vld [vmem:[#allocation10 + $0x240] sm:$0xff]  ;;  %v1238_v8 = vld [vmem:[#allocation10 + $0x238] sm:$0xff] }
 0x315   :  { %1008 = vmatprep.subr.mxu1 %v975_v9  ;;  %1085 = vmatprep.subr.mxu0 %v858_v10  ;;  %v1237_v9 = vld [vmem:[#allocation10 + $0x230] sm:$0xff]  ;;  %v1236_v10 = vld [vmem:[#allocation10 + $0x228] sm:$0xff] }
 0x316   :  { %1009 = vmatpush1.msra.mxu1 %v974_v11  ;;  %1086 = vmatpush1.msra.mxu0 %v857_v12  ;;  %v1235_v11 = vld [vmem:[#allocation10 + $0x220] sm:$0xff]  ;;  %v1234_v12 = vld [vmem:[#allocation10 + $0x218] sm:$0xff] }
 0x317   :  { %1010 = vmatprep.subr.mxu1 %v973_v13  ;;  %1087 = vmatprep.subr.mxu0 %v856_v14  ;;  %v1233_v13 = vld [vmem:[#allocation10 + $0x210] sm:$0xff]  ;;  %v1232_v14 = vld [vmem:[#allocation10 + $0x208] sm:$0xff] }
 0x318   :  { %1011 = vmatpush1.msra.mxu1 %v972_v15  ;;  %1088 = vmatpush1.msra.mxu0 %v855_v16  ;;  %v1231_v15 = vld [vmem:[#allocation10 + $0x200] sm:$0xff] }
 0x319   :  { %1012 = vmatprep.subr.mxu1 %v971_v17  ;;  %1089 = vmatprep.subr.mxu0 %v854_v18 }
 0x31a   :  { %1013 = vmatpush1.msra.mxu1 %v970_v19  ;;  %1090 = vmatpush1.msra.mxu0 %v853_v20 }
 0x31b   :  { %1014 = vmatprep.subr.mxu1 %v969_v21  ;;  %1091 = vmatprep.subr.mxu0 %v852_v22  ;;  %v1470_v22 = vld [vmem:[#allocation13 + $0xf8] sm:$0xff] }
 0x31c   :  { %1015 = vmatpush1.msra.mxu1 %v968_v23  ;;  %1092 = vmatpush1.msra.mxu0 %v851_v24  ;;  %v1469_v23 = vld [vmem:[#allocation13 + $0xf0] sm:$0xff]  ;;  %v1468_v24 = vld [vmem:[#allocation13 + $0xe8] sm:$0xff] }
 0x31d   :  { %1016 = vmatprep.subr.mxu1 %v967_v25  ;;  %1093 = vmatprep.subr.mxu0 %v850_v26  ;;  %v1467_v25 = vld [vmem:[#allocation13 + $0xe0] sm:$0xff]  ;;  %v1466_v26 = vld [vmem:[#allocation13 + $0xd8] sm:$0xff] }
 0x31e   :  { %1017 = vmatpush1.msra.mxu1 %v966_v27  ;;  %1094 = vmatpush1.msra.mxu0 %v849_v28  ;;  %v1465_v27 = vld [vmem:[#allocation13 + $0xd0] sm:$0xff]  ;;  %v1464_v28 = vld [vmem:[#allocation13 + $0xc8] sm:$0xff] }
 0x31f   :  { %1018 = vmatprep.subr.mxu1 %v965_v29  ;;  %1095 = vmatprep.subr.mxu0 %v848_v30  ;;  %v1463_v29 = vld [vmem:[#allocation13 + $0xc0] sm:$0xff]  ;;  %v1462_v30 = vld [vmem:[#allocation13 + $0xb8] sm:$0xff] }
 0x320   :  { %1019 = vmatpush1.msra.mxu1 %v964_v31  ;;  %1096 = vmatpush1.msra.mxu0 %v847_v32  ;;  %v1461_v31 = vld [vmem:[#allocation13 + $0xb0] sm:$0xff]  ;;  %v1460_v32 = vld [vmem:[#allocation13 + $0xa8] sm:$0xff] }
 0x321   :  { %1020 = vmatprep.subr.mxu1 %v963_v33  ;;  %1097 = vmatprep.subr.mxu0 %v846_v34  ;;  %v1459_v33 = vld [vmem:[#allocation13 + $0xa0] sm:$0xff]  ;;  %v1458_v34 = vld [vmem:[#allocation13 + $0x98] sm:$0xff] }
 0x322   :  { %1021 = vmatpush1.msra.mxu1 %v962_v35  ;;  %1098 = vmatpush1.msra.mxu0 %v845_v40  ;;  %v1457_v35 = vld [vmem:[#allocation13 + $0x90] sm:$0xff]  ;;  %v1454_v40 = vld [vmem:[#allocation13 + $0x78] sm:$0xff] }
 0x323   :  { %1022 = vmatprep.subr.mxu1 %v961_v37  ;;  %1099 = vmatprep.subr.mxu0 %v844_v41  ;;  %v1456_v37 = vld [vmem:[#allocation13 + $0x88] sm:$0xff]  ;;  %v1453_v41 = vld [vmem:[#allocation13 + $0x70] sm:$0xff] }
 0x324   :  { %1023 = vmatpush1.msra.mxu1 %v960_v39  ;;  %1056 = vmatprep.mubr.f32.mxu1 %v5245_v43  ;;  %v1455_v39 = vld [vmem:[#allocation13 + $0x80] sm:$0xff] }
 0x325   :  { %4722 = vmatprep.subr.mxu1 %v5433_v36  ;;  %1100 = vmatpush1.msra.mxu0 %v843_v42  ;;  %v1452_v42 = vld [vmem:[#allocation13 + $0x68] sm:$0xff] }
 0x326   :  { %1133 = vmatprep.mubr.f32.mxu0 %v5245_v43  ;;  %1263 = vmatprep.subr.mxu0 %v1262_v44  ;;  %v1451_v44 = vld [vmem:[#allocation13 + $0x60] sm:$0xff] }
 0x3c4   :  { %v4714_v45 = vpop.f32.mrf.mxu1  ;;  %v4721_v46 = vpop.f32.mrf.mxu0 }
 0x3c6   :  { %v834_v47 = vpop.f32.mrf.mxu1  ;;  %v950_v48 = vpop.f32.mrf.mxu0 }
 0x3c7   :  { %1057 = vmatmul.mubr.f32.vlgmr.msra.gmra.mxu1 %v950_v48  ;;  %1134 = vmatmul.mubr.f32.vlgmr.msra.gmra.mxu0 %v834_v47  ;;  %v1448_v47 = vld [vmem:[#allocation13 + $0x48] sm:$0xff]  ;;  %v1447_v48 = vld [vmem:[#allocation13 + $0x40] sm:$0xff] }
 0x3c8   :  { %4723 = vmatpush3.msra.mxu1 %v5433_v36  ;;  %1062 = vmatprep.mubr.f32.mxu1 %v5245_v43  ;;  %v1257_v36 = vld [vmem:[#allocation10 + $0x2d0] sm:$0xff] }
 0x3c9   :  { %4724 = vmatprep.subr.mxu1 %v5435_v38  ;;  %1139 = vmatprep.mubr.f32.mxu0 %v5245_v43 }
 0x3ca   :  { %4725 = vmatpush3.msra.mxu1 %v5435_v38  ;;  %1264 = vmatpush1.msra.mxu0 %v1261_v49  ;;  %v1254_v38 = vld [vmem:[#allocation10 + $0x2b8] sm:$0xff]  ;;  %v1446_v49 = vld [vmem:[#allocation13 + $0x38] sm:$0xff] }
 0x3cb   :  { %1063 = vmatmul.mubr.f32.gmra.mxu1 %v4721_v46  ;;  %1140 = vmatmul.mubr.f32.gmra.mxu0 %v4714_v45  ;;  %v1450_v45 = vld [vmem:[#allocation13 + $0x58] sm:$0xff]  ;;  %v1449_v46 = vld [vmem:[#allocation13 + $0x50] sm:$0xff] }
 0x3cc   :  { %4726 = vmatprep.mubr.msk.f32.mxu1 %vm416_vm1, %v1147_v50  ;;  %1265 = vmatprep.subr.mxu0 %v1260_v51  ;;  %v1445_v50 = vld [vmem:[#allocation13 + $0x30] sm:$0xff]  ;;  %v1444_v51 = vld [vmem:[#allocation13 + $0x28] sm:$0xff] }
 0x3cd   :  { %1266 = vmatpush1.msra.mxu0 %v1259_v52  ;;  %1327 = vmatprep.mubr.f32.mxu0 %v5245_v43  ;;  %v1443_v52 = vld [vmem:[#allocation13 + $0x20] sm:$0xff] }
 0x3ce   :  { %1267 = vmatprep.subr.mxu0 %v1258_v53  ;;  %v1442_v53 = vld [vmem:[#allocation13 + $0x18] sm:$0xff] }
 0x3cf   :  { %4727 = vmatmul.mubr.msk.f32.vlgmr.msra.gmra.mxu1 %vm416_vm1, %v1148_v54  ;;  %1268 = vmatpush1.msra.mxu0 %v1257_v36  ;;  %v1441_v54 = vld [vmem:[#allocation13 + $0x10] sm:$0xff]  ;;  %v1440_v36 = vld [vmem:[#allocation13 + $0x8] sm:$0xff] }
 0x3d0   :  { %1269 = vmatprep.subr.mxu0 %v1256_v55  ;;  %1432 = vmatprep.mubr.f32.mxu1 %v5245_v43 }
 0x3d1   :  { %1270 = vmatpush1.msra.mxu0 %v1255_v56  ;;  %v1439_v56 = vld [vmem:[#allocation13] sm:$0xff] }
 0x3d2   :  { %1271 = vmatprep.subr.mxu0 %v1254_v38  ;;  %v1502_v38 = vld [vmem:[#allocation13 + $0x1f8] sm:$0xff] }
 0x3d3   :  { %1272 = vmatpush1.msra.mxu0 %v1253_v57  ;;  %v1501_v57 = vld [vmem:[#allocation13 + $0x1f0] sm:$0xff] }
 0x3d4   :  { %1273 = vmatprep.subr.mxu0 %v1252_v58  ;;  %v1500_v58 = vld [vmem:[#allocation13 + $0x1e8] sm:$0xff] }
 0x3d5   :  { %1274 = vmatpush1.msra.mxu0 %v1251_v59 }
 0x3d6   :  { %1275 = vmatprep.subr.mxu0 %v1250_v60  ;;  %v1499_v60 = vld [vmem:[#allocation13 + $0x1e0] sm:$0xff] }
 0x3d7   :  { %1276 = vmatpush1.msra.mxu0 %v1249_v61  ;;  %v1498_v61 = vld [vmem:[#allocation13 + $0x1d8] sm:$0xff] }
 0x3d8   :  { %1277 = vmatprep.subr.mxu0 %v1248_v62  ;;  %v1497_v62 = vld [vmem:[#allocation13 + $0x1d0] sm:$0xff] }
 0x3d9   :  { %1278 = vmatpush1.msra.mxu0 %v1247_v63  ;;  %v1496_v63 = vld [vmem:[#allocation13 + $0x1c8] sm:$0xff] }
 0x3da   :  { %1279 = vmatprep.subr.mxu0 %v1246_v0 }
 0x3db   :  { %1280 = vmatpush1.msra.mxu0 %v1245_v1  ;;  %v1346_v1 = vlaneseq }
 0x3dc   :  { %1281 = vmatprep.subr.mxu0 %v1244_v2  ;;  %v1495_v2 = vld [vmem:[#allocation13 + $0x1c0] sm:$0xff] }
 0x3dd   :  { %1282 = vmatpush1.msra.mxu0 %v1243_v3  ;;  %v1494_v3 = vld [vmem:[#allocation13 + $0x1b8] sm:$0xff] }
 0x3de   :  { %1283 = vmatprep.subr.mxu0 %v1242_v4  ;;  %v1493_v4 = vld [vmem:[#allocation13 + $0x1b0] sm:$0xff] }
 0x3df   :  { %1284 = vmatpush1.msra.mxu0 %v1241_v5  ;;  %v1492_v5 = vld [vmem:[#allocation13 + $0x1a8] sm:$0xff] }
 0x3e0   :  { %1285 = vmatprep.subr.mxu0 %v1240_v6 }
 0x3e1   :  { %1286 = vmatpush1.msra.mxu0 %v1239_v7  ;;  %v1347_v7 = vshrl.u32 %v1346_v1, 7  ;;  %v1599_v1 = vld [vmem:[#allocation13 + $0x298] sm:$0xff] }
 0x3e2   :  { %1287 = vmatprep.subr.mxu0 %v1238_v8  ;;  %v1491_v8 = vld [vmem:[#allocation13 + $0x1a0] sm:$0xff] }
 0x3e3   :  { %1288 = vmatpush1.msra.mxu0 %v1237_v9  ;;  %v1490_v9 = vld [vmem:[#allocation13 + $0x198] sm:$0xff] }
 0x3e4   :  { %1289 = vmatprep.subr.mxu0 %v1236_v10 }
 0x3e5   :  { %1290 = vmatpush1.msra.mxu0 %v1235_v11  ;;  %v1489_v11 = vld [vmem:[#allocation13 + $0x190] sm:$0xff] }
 0x3e6   :  { %1291 = vmatprep.subr.mxu0 %v1234_v12  ;;  %v5468_v12 = vsub.s32 1, %v1347_v7 }
 0x3e7   :  { %1292 = vmatpush1.msra.mxu0 %v1233_v13  ;;  %v1488_v13 = vld [vmem:[#allocation13 + $0x188] sm:$0xff] }
 0x3e8   :  { %1293 = vmatprep.subr.mxu0 %v1232_v14  ;;  %v5470_v14 = vsub.s32 0, %v1347_v7  ;;  %v1593_v7 = vld [vmem:[#allocation13 + $0x268] sm:$0xff] }
 0x3e9   :  { %1294 = vmatpush1.msra.mxu0 %v1231_v15 }
 0x3ea   :  { %1715 = vmatprep.subr.mxu0 %v1470_v22 }
 0x487   :  { %v5459_v16 = vpop.f32.mrf.mxu1  ;;  %v1135_v55 = vpop.f32.mrf.mxu0 }
 0x489   :  { %v5461_v17 = vpop.f32.mrf.mxu1  ;;  %v1137_v59 = vpop.f32.mrf.mxu0 }
 0x48b   :  { %v5463_v18 = vpop.f32.mrf.mxu1  ;;  %v1141_v0 = vpop.f32.mrf.mxu0 }
 0x48c   :  { %v1142_v22 = vadd.f32 %v1141_v0, %v5463_v18  ;;  %v1600_v0 = vld [vmem:[#allocation13 + $0x2a0] sm:$0xff] }
 0x48d   :  { %v5465_v19 = vpop.f32.mrf.mxu1  ;;  %v1143_v6 = vpop.f32.mrf.mxu0 }
 0x48f   :  { %v4728_v20 = vpop.f32.mrf.mxu1 }
 0x491   :  { %v1221_v21 = vpop.f32.mrf.mxu1 }
 0x492   :  { %1328 = vmatmul.mubr.f32.vlgmr.msra.gmra.mxu0 %v1221_v21  ;;  %v1138_v21 = vadd.f32 %v1137_v59, %v5461_v17  ;;  %v1484_v17 = vld [vmem:[#allocation13 + $0x168] sm:$0xff] }
 0x493   :  { %1333 = vmatprep.mubr.f32.mxu0 %v5245_v43  ;;  %1716 = vmatpush1.msra.mxu0 %v1469_v23  ;;  %v1344_v23 = vld [vmem:[%s5674_s6] sm:$0x3]  ;;  %v1605_v59 = vld [vmem:[#allocation13 + $0x2c8] sm:$0xff] }
 0x494   :  { %1717 = vmatprep.subr.mxu0 %v1468_v24  ;;  %v1486_v24 = vld [vmem:[#allocation13 + $0x178] sm:$0xff] }
 0x495   :  { %1718 = vmatpush1.msra.mxu0 %v1467_v25  ;;  %v1136_v25 = vadd.f32 %v1135_v55, %v5459_v16  ;;  %v1482_v16 = vld [vmem:[#allocation13 + $0x158] sm:$0xff]  ;;  %v1610_v55 = vld [vmem:[#allocation13 + $0x2f0] sm:$0xff] }
 0x496   :  { %1334 = vmatmul.mubr.f32.gmra.mxu0 %v4728_v20  ;;  %1719 = vmatprep.subr.mxu0 %v1466_v26  ;;  %v1487_v20 = vld [vmem:[#allocation13 + $0x180] sm:$0xff] }
 0x497   :  { %1720 = vmatpush1.msra.mxu0 %v1465_v27  ;;  %v1485_v27 = vld [vmem:[#allocation13 + $0x170] sm:$0xff] }
 0x498   :  { %1721 = vmatprep.subr.mxu0 %v1464_v28  ;;  %v1144_v28 = vadd.f32 %v1143_v6, %v5465_v19  ;;  %v1594_v6 = vld [vmem:[#allocation13 + $0x270] sm:$0xff] }
 0x499   :  { %1722 = vmatpush1.msra.mxu0 %v1463_v29 }
 0x49a   :  { %1723 = vmatprep.subr.mxu0 %v1462_v30  ;;  %v1353_v30 = vrot.slane %v1344_v23, %v5468_v12 }
 0x49b   :  { %1724 = vmatpush1.msra.mxu0 %v1461_v31 }
 0x49c   :  { %1725 = vmatprep.subr.mxu0 %v1460_v32  ;;  %v1349_v32 = vrot.slane %v1344_v23, %v5470_v14  ;;  %v1583_v23 = vld [vmem:[#allocation13 + $0x218] sm:$0xff] }
 0x49d   :  { %1726 = vmatpush1.msra.mxu0 %v1459_v33 }
 0x49e   :  { %1727 = vmatprep.subr.mxu0 %v1458_v34  ;;  %v1483_v34 = vld [vmem:[#allocation13 + $0x160] sm:$0xff] }
 0x49f   :  { %1728 = vmatpush1.msra.mxu0 %v1457_v35 }
 0x4a0   :  { %1729 = vmatprep.subr.mxu0 %v1456_v37 }
 0x4a1   :  { %1730 = vmatpush1.msra.mxu0 %v1455_v39  ;;  %v1481_v39 = vld [vmem:[#allocation13 + $0x150] sm:$0xff] }
 0x4a2   :  { %1731 = vmatprep.subr.mxu0 %v1454_v40 }
 0x4a3   :  { %1732 = vmatpush1.msra.mxu0 %v1453_v41  ;;  %v1480_v41 = vld [vmem:[#allocation13 + $0x148] sm:$0xff] }
 0x4a4   :  { %1733 = vmatprep.subr.mxu0 %v1452_v42 }
 0x4a5   :  { %1734 = vmatpush1.msra.mxu0 %v1451_v44  ;;  %v1479_v44 = vld [vmem:[#allocation13 + $0x140] sm:$0xff] }
 0x4a6   :  { %1735 = vmatprep.subr.mxu0 %v1450_v45 }
 0x4a7   :  { %1736 = vmatpush1.msra.mxu0 %v1449_v46  ;;  %v1478_v46 = vld [vmem:[#allocation13 + $0x138] sm:$0xff] }
 0x4a8   :  { %1737 = vmatprep.subr.mxu0 %v1448_v47 }
 0x4a9   :  { %1738 = vmatpush1.msra.mxu0 %v1447_v48  ;;  %v1477_v48 = vld [vmem:[#allocation13 + $0x130] sm:$0xff] }
 0x4aa   :  { %1739 = vmatprep.subr.mxu0 %v1446_v49 }
 0x4ab   :  { %1740 = vmatpush1.msra.mxu0 %v1445_v50  ;;  %v1476_v50 = vld [vmem:[#allocation13 + $0x128] sm:$0xff] }
 0x4ac   :  { %1741 = vmatprep.subr.mxu0 %v1444_v51 }
 0x4ad   :  { %1742 = vmatpush1.msra.mxu0 %v1443_v52  ;;  %v1364_v52 = vld [vmem:[#allocation11] sm:$0xff] }
 0x4ae   :  { %1743 = vmatprep.subr.mxu0 %v1442_v53  ;;  %v1475_v53 = vld [vmem:[#allocation13 + $0x120] sm:$0xff] }
 0x4af   :  { %1744 = vmatpush1.msra.mxu0 %v1441_v54  ;;  %v1504_v54 = vld [vmem:[#allocation11 + $0x8] sm:$0xff] }
 0x4b0   :  { %1745 = vmatprep.subr.mxu0 %v1440_v36  ;;  %v1611_v36 = vld [vmem:[#allocation13 + $0x2f8] sm:$0xff] }
 0x4b1   :  { %1746 = vmatpush1.msra.mxu0 %v1439_v56  ;;  %v1609_v56 = vld [vmem:[#allocation13 + $0x2e8] sm:$0xff] }
 0x4b2   :  { %1747 = vmatprep.subr.mxu0 %v1502_v38  ;;  %v1608_v38 = vld [vmem:[#allocation13 + $0x2e0] sm:$0xff] }
 0x4b3   :  { %1748 = vmatpush2.msra.mxu0 %v1501_v57  ;;  %v1607_v57 = vld [vmem:[#allocation13 + $0x2d8] sm:$0xff] }
 0x4b4   :  { %1749 = vmatprep.subr.mxu0 %v1500_v58  ;;  %v1606_v58 = vld [vmem:[#allocation13 + $0x2d0] sm:$0xff] }
 0x4b5   :  { %1750 = vmatpush2.msra.mxu0 %v1499_v60  ;;  %v1604_v60 = vld [vmem:[#allocation13 + $0x2c0] sm:$0xff] }
 0x4b6   :  { %1751 = vmatprep.subr.mxu0 %v1498_v61  ;;  %v1603_v61 = vld [vmem:[#allocation13 + $0x2b8] sm:$0xff] }
 0x4b7   :  { %1752 = vmatpush2.msra.mxu0 %v1497_v62  ;;  %v1602_v62 = vld [vmem:[#allocation13 + $0x2b0] sm:$0xff] }
 0x4b8   :  { %1753 = vmatprep.subr.mxu0 %v1496_v63  ;;  %v1601_v63 = vld [vmem:[#allocation13 + $0x2a8] sm:$0xff] }
 0x4b9   :  { %1754 = vmatpush2.msra.mxu0 %v1495_v2  ;;  %v1598_v2 = vld [vmem:[#allocation13 + $0x290] sm:$0xff] }
 0x4ba   :  { %1755 = vmatprep.subr.mxu0 %v1494_v3  ;;  %v1597_v3 = vld [vmem:[#allocation13 + $0x288] sm:$0xff] }
 0x4bb   :  { %1756 = vmatpush2.msra.mxu0 %v1493_v4  ;;  %v1596_v4 = vld [vmem:[#allocation13 + $0x280] sm:$0xff] }
 0x4bc   :  { %1757 = vmatprep.subr.mxu0 %v1492_v5  ;;  %v1595_v5 = vld [vmem:[#allocation13 + $0x278] sm:$0xff] }
 0x4bd   :  { %1758 = vmatpush2.msra.mxu0 %v1491_v8  ;;  %v1592_v8 = vld [vmem:[#allocation13 + $0x260] sm:$0xff] }
 0x4be   :  { %1759 = vmatprep.subr.mxu0 %v1490_v9  ;;  %v1591_v9 = vld [vmem:[#allocation13 + $0x258] sm:$0xff] }
 0x4bf   :  { %1760 = vmatpush2.msra.mxu0 %v1489_v11  ;;  %v1589_v11 = vld [vmem:[#allocation13 + $0x248] sm:$0xff] }
 0x4c0   :  { %1761 = vmatprep.subr.mxu0 %v1488_v13  ;;  %v1588_v13 = vld [vmem:[#allocation13 + $0x240] sm:$0xff] }
 0x4c1   :  { %1762 = vmatpush2.msra.mxu0 %v1487_v20  ;;  %v1586_v20 = vld [vmem:[#allocation13 + $0x230] sm:$0xff] }
 0x4c2   :  { %1763 = vmatprep.subr.mxu0 %v1486_v24  ;;  %v1582_v24 = vld [vmem:[#allocation13 + $0x210] sm:$0xff] }
 0x4c3   :  { %1764 = vmatpush2.msra.mxu0 %v1485_v27  ;;  %v1643_v27 = vld [vmem:[#allocation13 + $0x3f8] sm:$0xff] }
 0x4c4   :  { %1765 = vmatprep.subr.mxu0 %v1484_v17  ;;  %v1638_v17 = vld [vmem:[#allocation13 + $0x3d0] sm:$0xff] }
 0x4c5   :  { %1766 = vmatpush2.msra.mxu0 %v1483_v34  ;;  %v1634_v34 = vld [vmem:[#allocation13 + $0x3b0] sm:$0xff] }
 0x4c6   :  { %1767 = vmatprep.subr.mxu0 %v1482_v16  ;;  %v1632_v16 = vld [vmem:[#allocation13 + $0x3a0] sm:$0xff] }
 0x4c7   :  { %1768 = vmatpush2.msra.mxu0 %v1481_v39  ;;  %v1630_v39 = vld [vmem:[#allocation13 + $0x390] sm:$0xff] }
 0x4c8   :  { %1769 = vmatprep.subr.mxu0 %v1480_v41  ;;  %v1627_v41 = vld [vmem:[#allocation13 + $0x378] sm:$0xff] }
 0x4c9   :  { %1770 = vmatpush2.msra.mxu0 %v1479_v44  ;;  %v1625_v44 = vld [vmem:[#allocation13 + $0x368] sm:$0xff] }
 0x4ca   :  { %1771 = vmatprep.subr.mxu0 %v1478_v46  ;;  %v1624_v46 = vld [vmem:[#allocation13 + $0x360] sm:$0xff] }
 0x4cb   :  { %1772 = vmatpush2.msra.mxu0 %v1477_v48  ;;  %v1623_v48 = vld [vmem:[#allocation13 + $0x358] sm:$0xff] }
 0x4cc   :  { %1773 = vmatprep.subr.mxu0 %v1476_v50  ;;  %v1622_v50 = vld [vmem:[#allocation13 + $0x350] sm:$0xff] }
 0x4cd   :  { %1774 = vmatpush2.msra.mxu0 %v1475_v53  ;;  %v1620_v53 = vld [vmem:[#allocation13 + $0x340] sm:$0xff] }
 0x552   :  { %v1329_v10 = vpop.f32.mrf.mxu0 }
 0x553   :  { %v1340_v18 = vadd.f32 %v1329_v10, %v1136_v25  ;;  %v1590_v10 = vld [vmem:[#allocation13 + $0x250] sm:$0xff]  ;;  %v1581_v25 = vld [vmem:[#allocation13 + $0x208] sm:$0xff] }
 0x554   :  { %v1331_v15 = vpop.f32.mrf.mxu0 }
 0x555   :  { %v1341_v29 = vadd.f32 %v1331_v15, %v1138_v21  ;;  %v1356_v42 = vadd.f32 %v1349_v32, %v1340_v18  ;;  %v1587_v15 = vld [vmem:[#allocation13 + $0x238] sm:$0xff]  ;;  %v1585_v21 = vld [vmem:[#allocation13 + $0x228] sm:$0xff] }
 0x556   :  { %v1335_v26 = vpop.f32.mrf.mxu0  ;;  %v1637_v18 = vld [vmem:[#allocation13 + $0x3c8] sm:$0xff] }
 0x557   :  { %v1342_v31 = vadd.f32 %v1335_v26, %v1142_v22  ;;  %v1357_v40 = vadd.f32 %v1353_v30, %v1341_v29  ;;  %v5488_v51 = vmax.f32 %v1356_v42, 0.0  ;;  %v1584_v22 = vld [vmem:[#allocation13 + $0x220] sm:$0xff]  ;;  %v1641_v29 = vld [vmem:[#allocation13 + $0x3e8] sm:$0xff]  ;;  %v1626_v42 = vld [vmem:[#allocation13 + $0x370] sm:$0xff] }
 0x558   :  { %v1337_v33 = vpop.f32.mrf.mxu0  ;;  %v1580_v26 = vld [vmem:[#allocation13 + $0x200] sm:$0xff] }
 0x559   :  { %v1343_v35 = vadd.f32 %v1337_v33, %v1144_v28  ;;  %v1358_v37 = vadd.f32 %v1349_v32, %v1342_v31  ;;  %v5485_v49 = vmax.f32 %v1357_v40, 0.0  ;;  %v1642_v28 = vld [vmem:[#allocation13 + $0x3f0] sm:$0xff]  ;;  %v1639_v31 = vld [vmem:[#allocation13 + $0x3d8] sm:$0xff]  ;;  %v1636_v32 = vld [vmem:[#allocation13 + $0x3c0] sm:$0xff] }
 0x55a   :  { %v1635_v33 = vld [vmem:[#allocation13 + $0x3b8] sm:$0xff]  ;;  %v1629_v40 = vld [vmem:[#allocation13 + $0x388] sm:$0xff] }
 0x55b   :  { %v1359_v19 = vadd.f32 %v1353_v30, %v1343_v35  ;;  %v5483_v47 = vmax.f32 %v1358_v37, 0.0  ;;  %v1640_v30 = vld [vmem:[#allocation13 + $0x3e0] sm:$0xff]  ;;  %v1633_v35 = vld [vmem:[#allocation13 + $0x3a8] sm:$0xff]  ;;  %v1631_v37 = vld [vmem:[#allocation13 + $0x398] sm:$0xff] }
 0x55d   :  { %v5481_v45 = vmax.f32 %v1359_v19, 0.0  ;;  %v1628_v19 = vld [vmem:[#allocation13 + $0x380] sm:$0xff] }
 0x55f   :  { %1396 = vmatprep.subr.mxu1 %v5481_v45 }
 0x560   :  { %1397 = vmatpush1.msra.mxu1 %v5483_v47 }
 0x561   :  { %1398 = vmatprep.subr.mxu1 %v5485_v49 }
 0x562   :  { %1399 = vmatpush1.msra.mxu1 %v5488_v51 }
 0x563   :  { %4367 = vmatmul.mubr.msk.f32.vlgmr.msra.gmra.mxu1 %vm416_vm1, %v1364_v52  ;;  %1536 = vmatprep.subr.mxu1 %v5481_v45  ;;  %v1621_v52 = vld [vmem:[#allocation13 + $0x348] sm:$0xff] }
 0x564   :  { %1537 = vmatpush1.msra.mxu1 %v5483_v47  ;;  %1572 = vmatprep.mubr.f32.mxu1 %v5245_v43 }
 0x565   :  { %1538 = vmatprep.subr.mxu1 %v5485_v49 }
 0x566   :  { %1539 = vmatpush1.msra.mxu1 %v5488_v51 }
 0x567   :  { %4368 = vmatmul.mubr.msk.f32.vlgmr.msra.gmra.mxu1 %vm416_vm1, %v1504_v54  ;;  %1644 = vmatprep.subr.mxu1 %v1611_v36  ;;  %v1619_v54 = vld [vmem:[#allocation13 + $0x338] sm:$0xff]  ;;  %v1618_v36 = vld [vmem:[#allocation13 + $0x330] sm:$0xff] }
 0x568   :  { %1645 = vmatpush1.msra.mxu1 %v1610_v55  ;;  %v1617_v55 = vld [vmem:[#allocation13 + $0x328] sm:$0xff] }
 0x569   :  { %1646 = vmatprep.subr.mxu1 %v1609_v56  ;;  %v1616_v56 = vld [vmem:[#allocation13 + $0x320] sm:$0xff] }
 0x56a   :  { %1647 = vmatpush1.msra.mxu1 %v1608_v38  ;;  %v1615_v38 = vld [vmem:[#allocation13 + $0x318] sm:$0xff] }
 0x56b   :  { %1648 = vmatprep.subr.mxu1 %v1607_v57  ;;  %v1614_v57 = vld [vmem:[#allocation13 + $0x310] sm:$0xff] }
 0x56c   :  { %1649 = vmatpush1.msra.mxu1 %v1606_v58  ;;  %v1613_v58 = vld [vmem:[#allocation13 + $0x308] sm:$0xff] }
 0x56d   :  { %1650 = vmatprep.subr.mxu1 %v1605_v59  ;;  %v1612_v59 = vld [vmem:[#allocation13 + $0x300] sm:$0xff] }
 0x56e   :  { %1651 = vmatpush1.msra.mxu1 %v1604_v60  ;;  %v1474_v60 = vld [vmem:[#allocation13 + $0x118] sm:$0xff] }
 0x56f   :  { %1652 = vmatprep.subr.mxu1 %v1603_v61  ;;  %v1473_v61 = vld [vmem:[#allocation13 + $0x110] sm:$0xff]  ;;  %1775 = vmatprep.subr.mxu0 %v1474_v60  ;;  %v1906_v60 = vld [vmem:[#allocation13 + $0x558] sm:$0xff] }
 0x570   :  { %1653 = vmatpush1.msra.mxu1 %v1602_v62  ;;  %1776 = vmatpush2.msra.mxu0 %v1473_v61  ;;  %v1472_v62 = vld [vmem:[#allocation13 + $0x108] sm:$0xff]  ;;  %v1905_v61 = vld [vmem:[#allocation13 + $0x550] sm:$0xff] }
 0x571   :  { %1654 = vmatprep.subr.mxu1 %v1601_v63  ;;  %v1471_v63 = vld [vmem:[#allocation13 + $0x100] sm:$0xff]  ;;  %1777 = vmatprep.subr.mxu0 %v1472_v62  ;;  %v1904_v62 = vld [vmem:[#allocation13 + $0x548] sm:$0xff] }
 0x572   :  { %1655 = vmatpush1.msra.mxu1 %v1600_v0  ;;  %1778 = vmatpush2.msra.mxu0 %v1471_v63  ;;  %v1903_v63 = vld [vmem:[#allocation13 + $0x540] sm:$0xff] }
 0x573   :  { %1656 = vmatprep.subr.mxu1 %v1599_v1 }
 0x574   :  { %1657 = vmatpush1.msra.mxu1 %v1598_v2 }
 0x575   :  { %1658 = vmatprep.subr.mxu1 %v1597_v3 }
 0x576   :  { %1659 = vmatpush1.msra.mxu1 %v1596_v4  ;;  %v1787_v4 = vld [vmem:[#allocation11 + $0x10] sm:$0xff] }
 0x577   :  { %1660 = vmatprep.subr.mxu1 %v1595_v5  ;;  %v1894_v5 = vld [vmem:[#allocation13 + $0x4f8] sm:$0xff] }
 0x578   :  { %1661 = vmatpush1.msra.mxu1 %v1594_v6  ;;  %v1893_v6 = vld [vmem:[#allocation13 + $0x4f0] sm:$0xff] }
 0x579   :  { %1662 = vmatprep.subr.mxu1 %v1593_v7  ;;  %v1891_v7 = vld [vmem:[#allocation13 + $0x4e0] sm:$0xff] }
 0x57a   :  { %1663 = vmatpush1.msra.mxu1 %v1592_v8  ;;  %v1890_v8 = vld [vmem:[#allocation13 + $0x4d8] sm:$0xff] }
 0x57b   :  { %1664 = vmatprep.subr.mxu1 %v1591_v9  ;;  %v1889_v9 = vld [vmem:[#allocation13 + $0x4d0] sm:$0xff] }
 0x57c   :  { %1665 = vmatpush1.msra.mxu1 %v1590_v10  ;;  %v1887_v10 = vld [vmem:[#allocation13 + $0x4c0] sm:$0xff] }
 0x57d   :  { %1666 = vmatprep.subr.mxu1 %v1589_v11  ;;  %v1886_v11 = vld [vmem:[#allocation13 + $0x4b8] sm:$0xff] }
 0x57e   :  { %1667 = vmatpush1.msra.mxu1 %v1588_v13  ;;  %v1884_v13 = vld [vmem:[#allocation13 + $0x4a8] sm:$0xff] }
 0x57f   :  { %1668 = vmatprep.subr.mxu1 %v1587_v15  ;;  %v1882_v15 = vld [vmem:[#allocation13 + $0x498] sm:$0xff] }
 0x580   :  { %1669 = vmatpush1.msra.mxu1 %v1586_v20  ;;  %v1881_v20 = vld [vmem:[#allocation13 + $0x490] sm:$0xff] }
 0x581   :  { %1670 = vmatprep.subr.mxu1 %v1585_v21  ;;  %v1880_v21 = vld [vmem:[#allocation13 + $0x488] sm:$0xff] }
 0x582   :  { %1671 = vmatpush1.msra.mxu1 %v1584_v22  ;;  %v1879_v22 = vld [vmem:[#allocation13 + $0x480] sm:$0xff] }
 0x583   :  { %1672 = vmatprep.subr.mxu1 %v1583_v23  ;;  %v1878_v23 = vld [vmem:[#allocation13 + $0x478] sm:$0xff] }
 0x584   :  { %1673 = vmatpush1.msra.mxu1 %v1582_v24  ;;  %v1877_v24 = vld [vmem:[#allocation13 + $0x470] sm:$0xff] }
 0x585   :  { %1674 = vmatprep.subr.mxu1 %v1581_v25  ;;  %v1876_v25 = vld [vmem:[#allocation13 + $0x468] sm:$0xff] }
 0x586   :  { %1675 = vmatpush1.msra.mxu1 %v1580_v26  ;;  %v1875_v26 = vld [vmem:[#allocation13 + $0x460] sm:$0xff] }
 0x587   :  { %1676 = vmatprep.subr.mxu1 %v1643_v27  ;;  %v1874_v27 = vld [vmem:[#allocation13 + $0x458] sm:$0xff] }
 0x588   :  { %1677 = vmatpush2.msra.mxu1 %v1642_v28  ;;  %v1873_v28 = vld [vmem:[#allocation13 + $0x450] sm:$0xff] }
 0x589   :  { %1678 = vmatprep.subr.mxu1 %v1641_v29  ;;  %v1872_v29 = vld [vmem:[#allocation13 + $0x448] sm:$0xff] }
 0x58a   :  { %1679 = vmatpush2.msra.mxu1 %v1640_v30  ;;  %v1871_v30 = vld [vmem:[#allocation13 + $0x440] sm:$0xff] }
 0x58b   :  { %1680 = vmatprep.subr.mxu1 %v1639_v31  ;;  %v1870_v31 = vld [vmem:[#allocation13 + $0x438] sm:$0xff] }
 0x58c   :  { %1681 = vmatpush2.msra.mxu1 %v1638_v17  ;;  %v1869_v17 = vld [vmem:[#allocation13 + $0x430] sm:$0xff] }
 0x58d   :  { %1682 = vmatprep.subr.mxu1 %v1637_v18  ;;  %v1868_v18 = vld [vmem:[#allocation13 + $0x428] sm:$0xff] }
 0x58e   :  { %1683 = vmatpush2.msra.mxu1 %v1636_v32  ;;  %v1867_v32 = vld [vmem:[#allocation13 + $0x420] sm:$0xff] }
 0x58f   :  { %1684 = vmatprep.subr.mxu1 %v1635_v33  ;;  %v1866_v33 = vld [vmem:[#allocation13 + $0x418] sm:$0xff] }
 0x590   :  { %1685 = vmatpush2.msra.mxu1 %v1634_v34  ;;  %v1865_v34 = vld [vmem:[#allocation13 + $0x410] sm:$0xff] }
 0x591   :  { %1686 = vmatprep.subr.mxu1 %v1633_v35  ;;  %v1864_v35 = vld [vmem:[#allocation13 + $0x408] sm:$0xff] }
 0x592   :  { %1687 = vmatpush2.msra.mxu1 %v1632_v16  ;;  %v1863_v16 = vld [vmem:[#allocation13 + $0x400] sm:$0xff] }
 0x593   :  { %1688 = vmatprep.subr.mxu1 %v1631_v37  ;;  %v1926_v37 = vld [vmem:[#allocation13 + $0x5f8] sm:$0xff] }
 0x594   :  { %1689 = vmatpush2.msra.mxu1 %v1630_v39  ;;  %v1925_v39 = vld [vmem:[#allocation13 + $0x5f0] sm:$0xff] }
 0x595   :  { %1690 = vmatprep.subr.mxu1 %v1629_v40  ;;  %v1924_v40 = vld [vmem:[#allocation13 + $0x5e8] sm:$0xff] }
 0x596   :  { %1691 = vmatpush2.msra.mxu1 %v1628_v19  ;;  %v1923_v19 = vld [vmem:[#allocation13 + $0x5e0] sm:$0xff] }
 0x597   :  { %1692 = vmatprep.subr.mxu1 %v1627_v41  ;;  %v1922_v41 = vld [vmem:[#allocation13 + $0x5d8] sm:$0xff] }
 0x598   :  { %1693 = vmatpush2.msra.mxu1 %v1626_v42  ;;  %v1921_v42 = vld [vmem:[#allocation13 + $0x5d0] sm:$0xff] }
 0x599   :  { %1694 = vmatprep.subr.mxu1 %v1625_v44  ;;  %v1920_v44 = vld [vmem:[#allocation13 + $0x5c8] sm:$0xff] }
 0x59a   :  { %1695 = vmatpush2.msra.mxu1 %v1624_v46  ;;  %v1919_v46 = vld [vmem:[#allocation13 + $0x5c0] sm:$0xff] }
 0x59b   :  { %1696 = vmatprep.subr.mxu1 %v1623_v48  ;;  %v1918_v48 = vld [vmem:[#allocation13 + $0x5b8] sm:$0xff] }
 0x59c   :  { %1697 = vmatpush2.msra.mxu1 %v1622_v50  ;;  %v1917_v50 = vld [vmem:[#allocation13 + $0x5b0] sm:$0xff] }
 0x59d   :  { %1698 = vmatprep.subr.mxu1 %v1621_v52  ;;  %v1916_v52 = vld [vmem:[#allocation13 + $0x5a8] sm:$0xff] }
 0x59e   :  { %1699 = vmatpush2.msra.mxu1 %v1620_v53  ;;  %v1915_v53 = vld [vmem:[#allocation13 + $0x5a0] sm:$0xff] }
 0x59f   :  { %1700 = vmatprep.subr.mxu1 %v1619_v54  ;;  %v1914_v54 = vld [vmem:[#allocation13 + $0x598] sm:$0xff] }
 0x5a0   :  { %1701 = vmatpush2.msra.mxu1 %v1618_v36  ;;  %v1913_v36 = vld [vmem:[#allocation13 + $0x590] sm:$0xff] }
 0x5a1   :  { %1702 = vmatprep.subr.mxu1 %v1617_v55  ;;  %v1912_v55 = vld [vmem:[#allocation13 + $0x588] sm:$0xff] }
 0x5a2   :  { %1703 = vmatpush2.msra.mxu1 %v1616_v56  ;;  %v1911_v56 = vld [vmem:[#allocation13 + $0x580] sm:$0xff] }
 0x5a3   :  { %1704 = vmatprep.subr.mxu1 %v1615_v38  ;;  %v1910_v38 = vld [vmem:[#allocation13 + $0x578] sm:$0xff] }
 0x5a4   :  { %1705 = vmatpush2.msra.mxu1 %v1614_v57  ;;  %v1909_v57 = vld [vmem:[#allocation13 + $0x570] sm:$0xff] }
 0x5a5   :  { %1706 = vmatprep.subr.mxu1 %v1613_v58  ;;  %v1908_v58 = vld [vmem:[#allocation13 + $0x568] sm:$0xff] }
 0x5a6   :  { %1707 = vmatpush2.msra.mxu1 %v1612_v59  ;;  %v1907_v59 = vld [vmem:[#allocation13 + $0x560] sm:$0xff] }
 0x5a7   :  { %1819 = vmatprep.subr.mxu1 %v5481_v45  ;;  %v1892_v45 = vld [vmem:[#allocation13 + $0x4e8] sm:$0xff] }
 0x623   :  { %v1434_v0 = vpop.f32.mrf.mxu1 }
 0x625   :  { %v1436_v1 = vpop.f32.mrf.mxu1 }
 0x626   :  { %1779 = vmatprep.mubr.f32.mxu0 %v1436_v1  ;;  %v1901_v1 = vld [vmem:[#allocation13 + $0x530] sm:$0xff] }
 0x627   :  { %v1574_v2 = vpop.f32.mrf.mxu1  ;;  %1780 = vmatmul.mubr.f32.vlgmr.msra.gmra.mxu0 %v1434_v0  ;;  %v1902_v0 = vld [vmem:[#allocation13 + $0x538] sm:$0xff] }
 0x629   :  { %v1576_v3 = vpop.f32.mrf.mxu1 }
 0x62a   :  { %1708 = vmatprep.mubr.f32.mxu1 %v1576_v3  ;;  %v1899_v3 = vld [vmem:[#allocation13 + $0x520] sm:$0xff] }
 0x62b   :  { %1709 = vmatmul.mubr.f32.vlgmr.msra.gmra.mxu1 %v1574_v2  ;;  %v1900_v2 = vld [vmem:[#allocation13 + $0x528] sm:$0xff] }
 0x62c   :  { %1820 = vmatpush1.msra.mxu1 %v5483_v47  ;;  %1855 = vmatprep.mubr.f32.mxu1 %v5245_v43  ;;  %v1888_v47 = vld [vmem:[#allocation13 + $0x4c8] sm:$0xff] }
 0x62d   :  { %1821 = vmatprep.subr.mxu1 %v5485_v49  ;;  %v1885_v49 = vld [vmem:[#allocation13 + $0x4b0] sm:$0xff] }
 0x62e   :  { %1822 = vmatpush1.msra.mxu1 %v5488_v51  ;;  %v1883_v51 = vld [vmem:[#allocation13 + $0x4a0] sm:$0xff] }
 0x62f   :  { %4369 = vmatmul.mubr.msk.f32.vlgmr.msra.gmra.mxu1 %vm416_vm1, %v1787_v4  ;;  %1927 = vmatprep.subr.mxu1 %v1894_v5  ;;  %v1898_v4 = vld [vmem:[#allocation13 + $0x518] sm:$0xff]  ;;  %v1897_v5 = vld [vmem:[#allocation13 + $0x510] sm:$0xff] }
 0x630   :  { %1928 = vmatpush1.msra.mxu1 %v1893_v6  ;;  %v1896_v6 = vld [vmem:[#allocation13 + $0x508] sm:$0xff] }
 0x631   :  { %1929 = vmatprep.subr.mxu1 %v1892_v45  ;;  %v1895_v45 = vld [vmem:[#allocation13 + $0x500] sm:$0xff] }
 0x632   :  { %1930 = vmatpush1.msra.mxu1 %v1891_v7  ;;  %v2047_v7 = vld [vmem:[#allocation16 + $0xf8] sm:$0xff] }
 0x633   :  { %1931 = vmatprep.subr.mxu1 %v1890_v8  ;;  %v2185_v8 = vld [vmem:[#allocation16 + $0x2f8] sm:$0xff]  ;;  %2080 = vmatprep.subr.mxu0 %v2047_v7  ;;  %v2182_v7 = vld [vmem:[#allocation16 + $0x2e0] sm:$0xff] }
 0x634   :  { %1932 = vmatpush1.msra.mxu1 %v1889_v9  ;;  %v2046_v9 = vld [vmem:[#allocation16 + $0xf0] sm:$0xff] }
 0x635   :  { %1933 = vmatprep.subr.mxu1 %v1888_v47  ;;  %v2045_v47 = vld [vmem:[#allocation16 + $0xe8] sm:$0xff]  ;;  %2081 = vmatpush1.msra.mxu0 %v2046_v9  ;;  %v2180_v9 = vld [vmem:[#allocation16 + $0x2d0] sm:$0xff] }
 0x636   :  { %1934 = vmatpush1.msra.mxu1 %v1887_v10  ;;  %v2044_v10 = vld [vmem:[#allocation16 + $0xe0] sm:$0xff]  ;;  %2082 = vmatprep.subr.mxu0 %v2045_v47  ;;  %v2179_v47 = vld [vmem:[#allocation16 + $0x2c8] sm:$0xff] }
 0x637   :  { %1935 = vmatprep.subr.mxu1 %v1886_v11  ;;  %v2043_v11 = vld [vmem:[#allocation16 + $0xd8] sm:$0xff]  ;;  %2083 = vmatpush1.msra.mxu0 %v2044_v10  ;;  %v2178_v10 = vld [vmem:[#allocation16 + $0x2c0] sm:$0xff] }
 0x638   :  { %1936 = vmatpush1.msra.mxu1 %v1885_v49  ;;  %v2042_v49 = vld [vmem:[#allocation16 + $0xd0] sm:$0xff]  ;;  %2084 = vmatprep.subr.mxu0 %v2043_v11  ;;  %v2177_v11 = vld [vmem:[#allocation16 + $0x2b8] sm:$0xff] }
 0x639   :  { %1937 = vmatprep.subr.mxu1 %v1884_v13  ;;  %v2041_v13 = vld [vmem:[#allocation16 + $0xc8] sm:$0xff]  ;;  %2085 = vmatpush1.msra.mxu0 %v2042_v49  ;;  %v2176_v49 = vld [vmem:[#allocation16 + $0x2b0] sm:$0xff] }
 0x63a   :  { %1938 = vmatpush1.msra.mxu1 %v1883_v51  ;;  %v2040_v51 = vld [vmem:[#allocation16 + $0xc0] sm:$0xff]  ;;  %2086 = vmatprep.subr.mxu0 %v2041_v13  ;;  %v2175_v13 = vld [vmem:[#allocation16 + $0x2a8] sm:$0xff] }
 0x63b   :  { %1939 = vmatprep.subr.mxu1 %v1882_v15  ;;  %v2039_v15 = vld [vmem:[#allocation16 + $0xb8] sm:$0xff]  ;;  %2087 = vmatpush1.msra.mxu0 %v2040_v51  ;;  %v2174_v51 = vld [vmem:[#allocation16 + $0x2a0] sm:$0xff] }
 0x63c   :  { %1940 = vmatpush1.msra.mxu1 %v1881_v20  ;;  %v2038_v20 = vld [vmem:[#allocation16 + $0xb0] sm:$0xff]  ;;  %2088 = vmatprep.subr.mxu0 %v2039_v15  ;;  %v2173_v15 = vld [vmem:[#allocation16 + $0x298] sm:$0xff] }
 0x63d   :  { %1941 = vmatprep.subr.mxu1 %v1880_v21  ;;  %v2037_v21 = vld [vmem:[#allocation16 + $0xa8] sm:$0xff]  ;;  %2089 = vmatpush1.msra.mxu0 %v2038_v20  ;;  %v2172_v20 = vld [vmem:[#allocation16 + $0x290] sm:$0xff] }
 0x63e   :  { %1942 = vmatpush1.msra.mxu1 %v1879_v22  ;;  %v2036_v22 = vld [vmem:[#allocation16 + $0xa0] sm:$0xff]  ;;  %2090 = vmatprep.subr.mxu0 %v2037_v21  ;;  %v2171_v21 = vld [vmem:[#allocation16 + $0x288] sm:$0xff] }
 0x63f   :  { %1943 = vmatprep.subr.mxu1 %v1878_v23  ;;  %v2035_v23 = vld [vmem:[#allocation16 + $0x98] sm:$0xff]  ;;  %2091 = vmatpush1.msra.mxu0 %v2036_v22  ;;  %v2170_v22 = vld [vmem:[#allocation16 + $0x280] sm:$0xff] }
 0x640   :  { %1944 = vmatpush1.msra.mxu1 %v1877_v24  ;;  %v2034_v24 = vld [vmem:[#allocation16 + $0x90] sm:$0xff]  ;;  %2092 = vmatprep.subr.mxu0 %v2035_v23  ;;  %v2169_v23 = vld [vmem:[#allocation16 + $0x278] sm:$0xff] }
 0x641   :  { %1945 = vmatprep.subr.mxu1 %v1876_v25  ;;  %v2033_v25 = vld [vmem:[#allocation16 + $0x88] sm:$0xff]  ;;  %2093 = vmatpush1.msra.mxu0 %v2034_v24  ;;  %v2168_v24 = vld [vmem:[#allocation16 + $0x270] sm:$0xff] }
 0x642   :  { %1946 = vmatpush1.msra.mxu1 %v1875_v26  ;;  %v2032_v26 = vld [vmem:[#allocation16 + $0x80] sm:$0xff]  ;;  %2094 = vmatprep.subr.mxu0 %v2033_v25  ;;  %v2167_v25 = vld [vmem:[#allocation16 + $0x268] sm:$0xff] }
 0x643   :  { %1947 = vmatprep.subr.mxu1 %v1874_v27  ;;  %v2031_v27 = vld [vmem:[#allocation16 + $0x78] sm:$0xff]  ;;  %2095 = vmatpush1.msra.mxu0 %v2032_v26  ;;  %v2166_v26 = vld [vmem:[#allocation16 + $0x260] sm:$0xff] }
 0x644   :  { %1948 = vmatpush1.msra.mxu1 %v1873_v28  ;;  %v2030_v28 = vld [vmem:[#allocation16 + $0x70] sm:$0xff]  ;;  %2096 = vmatprep.subr.mxu0 %v2031_v27  ;;  %v2165_v27 = vld [vmem:[#allocation16 + $0x258] sm:$0xff] }
 0x645   :  { %1949 = vmatprep.subr.mxu1 %v1872_v29  ;;  %v2029_v29 = vld [vmem:[#allocation16 + $0x68] sm:$0xff]  ;;  %2097 = vmatpush1.msra.mxu0 %v2030_v28  ;;  %v2164_v28 = vld [vmem:[#allocation16 + $0x250] sm:$0xff] }
 0x646   :  { %1950 = vmatpush1.msra.mxu1 %v1871_v30  ;;  %v2028_v30 = vld [vmem:[#allocation16 + $0x60] sm:$0xff]  ;;  %2098 = vmatprep.subr.mxu0 %v2029_v29  ;;  %v2163_v29 = vld [vmem:[#allocation16 + $0x248] sm:$0xff] }
 0x647   :  { %1951 = vmatprep.subr.mxu1 %v1870_v31  ;;  %v2027_v31 = vld [vmem:[#allocation16 + $0x58] sm:$0xff]  ;;  %2099 = vmatpush1.msra.mxu0 %v2028_v30  ;;  %v2162_v30 = vld [vmem:[#allocation16 + $0x240] sm:$0xff] }
 0x648   :  { %1952 = vmatpush1.msra.mxu1 %v1869_v17  ;;  %v2026_v17 = vld [vmem:[#allocation16 + $0x50] sm:$0xff]  ;;  %2100 = vmatprep.subr.mxu0 %v2027_v31  ;;  %v2161_v31 = vld [vmem:[#allocation16 + $0x238] sm:$0xff] }
 0x649   :  { %1953 = vmatprep.subr.mxu1 %v1868_v18  ;;  %v2025_v18 = vld [vmem:[#allocation16 + $0x48] sm:$0xff]  ;;  %2101 = vmatpush1.msra.mxu0 %v2026_v17  ;;  %v2160_v17 = vld [vmem:[#allocation16 + $0x230] sm:$0xff] }
 0x64a   :  { %1954 = vmatpush1.msra.mxu1 %v1867_v32  ;;  %v2024_v32 = vld [vmem:[#allocation16 + $0x40] sm:$0xff]  ;;  %2102 = vmatprep.subr.mxu0 %v2025_v18  ;;  %v2159_v18 = vld [vmem:[#allocation16 + $0x228] sm:$0xff] }
 0x64b   :  { %1955 = vmatprep.subr.mxu1 %v1866_v33  ;;  %v2023_v33 = vld [vmem:[#allocation16 + $0x38] sm:$0xff]  ;;  %2103 = vmatpush1.msra.mxu0 %v2024_v32  ;;  %v2158_v32 = vld [vmem:[#allocation16 + $0x220] sm:$0xff] }
 0x64c   :  { %1956 = vmatpush1.msra.mxu1 %v1865_v34  ;;  %v2022_v34 = vld [vmem:[#allocation16 + $0x30] sm:$0xff]  ;;  %2104 = vmatprep.subr.mxu0 %v2023_v33  ;;  %v2157_v33 = vld [vmem:[#allocation16 + $0x218] sm:$0xff] }
 0x64d   :  { %1957 = vmatprep.subr.mxu1 %v1864_v35  ;;  %v2021_v35 = vld [vmem:[#allocation16 + $0x28] sm:$0xff]  ;;  %2105 = vmatpush1.msra.mxu0 %v2022_v34  ;;  %v2156_v34 = vld [vmem:[#allocation16 + $0x210] sm:$0xff] }
 0x64e   :  { %1958 = vmatpush1.msra.mxu1 %v1863_v16  ;;  %v2020_v16 = vld [vmem:[#allocation16 + $0x20] sm:$0xff]  ;;  %2106 = vmatprep.subr.mxu0 %v2021_v35  ;;  %v2155_v35 = vld [vmem:[#allocation16 + $0x208] sm:$0xff] }
 0x64f   :  { %1959 = vmatprep.subr.mxu1 %v1926_v37  ;;  %v2019_v37 = vld [vmem:[#allocation16 + $0x18] sm:$0xff]  ;;  %2107 = vmatpush1.msra.mxu0 %v2020_v16  ;;  %v2154_v16 = vld [vmem:[#allocation16 + $0x200] sm:$0xff] }
 0x650   :  { %1960 = vmatpush2.msra.mxu1 %v1925_v39  ;;  %v2018_v39 = vld [vmem:[#allocation16 + $0x10] sm:$0xff]  ;;  %2108 = vmatprep.subr.mxu0 %v2019_v37  ;;  %v2217_v37 = vld [vmem:[#allocation16 + $0x3f8] sm:$0xff] }
 0x651   :  { %1961 = vmatprep.subr.mxu1 %v1924_v40  ;;  %v2017_v40 = vld [vmem:[#allocation16 + $0x8] sm:$0xff]  ;;  %2109 = vmatpush1.msra.mxu0 %v2018_v39  ;;  %v2216_v39 = vld [vmem:[#allocation16 + $0x3f0] sm:$0xff] }
 0x652   :  { %1962 = vmatpush2.msra.mxu1 %v1923_v19  ;;  %v2016_v19 = vld [vmem:[#allocation16] sm:$0xff]  ;;  %2110 = vmatprep.subr.mxu0 %v2017_v40  ;;  %v2215_v40 = vld [vmem:[#allocation16 + $0x3e8] sm:$0xff] }
 0x653   :  { %1963 = vmatprep.subr.mxu1 %v1922_v41  ;;  %v2079_v41 = vld [vmem:[#allocation16 + $0x1f8] sm:$0xff]  ;;  %2111 = vmatpush1.msra.mxu0 %v2016_v19  ;;  %v2214_v19 = vld [vmem:[#allocation16 + $0x3e0] sm:$0xff] }
 0x654   :  { %1964 = vmatpush2.msra.mxu1 %v1921_v42  ;;  %v2078_v42 = vld [vmem:[#allocation16 + $0x1f0] sm:$0xff]  ;;  %2112 = vmatprep.subr.mxu0 %v2079_v41  ;;  %v2213_v41 = vld [vmem:[#allocation16 + $0x3d8] sm:$0xff] }
 0x655   :  { %1965 = vmatprep.subr.mxu1 %v1920_v44  ;;  %v2077_v44 = vld [vmem:[#allocation16 + $0x1e8] sm:$0xff]  ;;  %2113 = vmatpush2.msra.mxu0 %v2078_v42  ;;  %v2212_v42 = vld [vmem:[#allocation16 + $0x3d0] sm:$0xff] }
 0x656   :  { %1966 = vmatpush2.msra.mxu1 %v1919_v46  ;;  %v2076_v46 = vld [vmem:[#allocation16 + $0x1e0] sm:$0xff]  ;;  %2114 = vmatprep.subr.mxu0 %v2077_v44  ;;  %v2211_v44 = vld [vmem:[#allocation16 + $0x3c8] sm:$0xff] }
 0x657   :  { %1967 = vmatprep.subr.mxu1 %v1918_v48  ;;  %v2075_v48 = vld [vmem:[#allocation16 + $0x1d8] sm:$0xff]  ;;  %2115 = vmatpush2.msra.mxu0 %v2076_v46  ;;  %v2210_v46 = vld [vmem:[#allocation16 + $0x3c0] sm:$0xff] }
 0x658   :  { %1968 = vmatpush2.msra.mxu1 %v1917_v50  ;;  %v2074_v50 = vld [vmem:[#allocation16 + $0x1d0] sm:$0xff]  ;;  %2116 = vmatprep.subr.mxu0 %v2075_v48  ;;  %v2209_v48 = vld [vmem:[#allocation16 + $0x3b8] sm:$0xff] }
 0x659   :  { %1969 = vmatprep.subr.mxu1 %v1916_v52  ;;  %v2073_v52 = vld [vmem:[#allocation16 + $0x1c8] sm:$0xff]  ;;  %2117 = vmatpush2.msra.mxu0 %v2074_v50  ;;  %v2208_v50 = vld [vmem:[#allocation16 + $0x3b0] sm:$0xff] }
 0x65a   :  { %1970 = vmatpush2.msra.mxu1 %v1915_v53  ;;  %v2072_v53 = vld [vmem:[#allocation16 + $0x1c0] sm:$0xff]  ;;  %2118 = vmatprep.subr.mxu0 %v2073_v52  ;;  %v2207_v52 = vld [vmem:[#allocation16 + $0x3a8] sm:$0xff] }
 0x65b   :  { %1971 = vmatprep.subr.mxu1 %v1914_v54  ;;  %v2071_v54 = vld [vmem:[#allocation16 + $0x1b8] sm:$0xff]  ;;  %2119 = vmatpush2.msra.mxu0 %v2072_v53  ;;  %v2206_v53 = vld [vmem:[#allocation16 + $0x3a0] sm:$0xff] }
 0x65c   :  { %1972 = vmatpush2.msra.mxu1 %v1913_v36  ;;  %v2070_v36 = vld [vmem:[#allocation16 + $0x1b0] sm:$0xff]  ;;  %2120 = vmatprep.subr.mxu0 %v2071_v54  ;;  %v2205_v54 = vld [vmem:[#allocation16 + $0x398] sm:$0xff] }
 0x65d   :  { %1973 = vmatprep.subr.mxu1 %v1912_v55  ;;  %v2069_v55 = vld [vmem:[#allocation16 + $0x1a8] sm:$0xff]  ;;  %2121 = vmatpush2.msra.mxu0 %v2070_v36  ;;  %v2204_v36 = vld [vmem:[#allocation16 + $0x390] sm:$0xff] }
 0x65e   :  { %1974 = vmatpush2.msra.mxu1 %v1911_v56  ;;  %v2068_v56 = vld [vmem:[#allocation16 + $0x1a0] sm:$0xff]  ;;  %2122 = vmatprep.subr.mxu0 %v2069_v55  ;;  %v2203_v55 = vld [vmem:[#allocation16 + $0x388] sm:$0xff] }
 0x65f   :  { %1975 = vmatprep.subr.mxu1 %v1910_v38  ;;  %v2067_v38 = vld [vmem:[#allocation16 + $0x198] sm:$0xff]  ;;  %2123 = vmatpush2.msra.mxu0 %v2068_v56  ;;  %v2202_v56 = vld [vmem:[#allocation16 + $0x380] sm:$0xff] }
 0x660   :  { %1976 = vmatpush2.msra.mxu1 %v1909_v57  ;;  %v2066_v57 = vld [vmem:[#allocation16 + $0x190] sm:$0xff]  ;;  %2124 = vmatprep.subr.mxu0 %v2067_v38  ;;  %v2201_v38 = vld [vmem:[#allocation16 + $0x378] sm:$0xff] }
 0x661   :  { %1977 = vmatprep.subr.mxu1 %v1908_v58  ;;  %v2065_v58 = vld [vmem:[#allocation16 + $0x188] sm:$0xff]  ;;  %2125 = vmatpush2.msra.mxu0 %v2066_v57  ;;  %v2200_v57 = vld [vmem:[#allocation16 + $0x370] sm:$0xff] }
 0x662   :  { %1978 = vmatpush2.msra.mxu1 %v1907_v59  ;;  %v2064_v59 = vld [vmem:[#allocation16 + $0x180] sm:$0xff]  ;;  %2126 = vmatprep.subr.mxu0 %v2065_v58  ;;  %v2199_v58 = vld [vmem:[#allocation16 + $0x368] sm:$0xff] }
 0x663   :  { %1979 = vmatprep.subr.mxu1 %v1906_v60  ;;  %v2063_v60 = vld [vmem:[#allocation16 + $0x178] sm:$0xff]  ;;  %2127 = vmatpush2.msra.mxu0 %v2064_v59  ;;  %v2198_v59 = vld [vmem:[#allocation16 + $0x360] sm:$0xff] }
 0x664   :  { %1980 = vmatpush2.msra.mxu1 %v1905_v61  ;;  %v2062_v61 = vld [vmem:[#allocation16 + $0x170] sm:$0xff]  ;;  %2128 = vmatprep.subr.mxu0 %v2063_v60  ;;  %v2197_v60 = vld [vmem:[#allocation16 + $0x358] sm:$0xff] }
 0x665   :  { %1981 = vmatprep.subr.mxu1 %v1904_v62  ;;  %v2061_v62 = vld [vmem:[#allocation16 + $0x168] sm:$0xff]  ;;  %2129 = vmatpush2.msra.mxu0 %v2062_v61  ;;  %v2196_v61 = vld [vmem:[#allocation16 + $0x350] sm:$0xff] }
 0x666   :  { %1982 = vmatpush2.msra.mxu1 %v1903_v63  ;;  %v2060_v63 = vld [vmem:[#allocation16 + $0x160] sm:$0xff]  ;;  %2130 = vmatprep.subr.mxu0 %v2061_v62  ;;  %v2057_v62 = vld [vmem:[#allocation16 + $0x148] sm:$0xff] }
 0x667   :  { %1983 = vmatprep.subr.mxu1 %v1902_v0  ;;  %v2059_v0 = vld [vmem:[#allocation16 + $0x158] sm:$0xff]  ;;  %2131 = vmatpush2.msra.mxu0 %v2060_v63  ;;  %v2195_v63 = vld [vmem:[#allocation16 + $0x348] sm:$0xff] }
 0x668   :  { %1984 = vmatpush2.msra.mxu1 %v1901_v1  ;;  %v2058_v1 = vld [vmem:[#allocation16 + $0x150] sm:$0xff]  ;;  %2132 = vmatprep.subr.mxu0 %v2059_v0  ;;  %v2056_v0 = vld [vmem:[#allocation16 + $0x140] sm:$0xff] }
 0x669   :  { %1985 = vmatprep.subr.mxu1 %v1900_v2  ;;  %2133 = vmatpush2.msra.mxu0 %v2058_v1  ;;  %v2194_v1 = vld [vmem:[#allocation16 + $0x340] sm:$0xff] }
 0x66a   :  { %1986 = vmatpush2.msra.mxu1 %v1899_v3  ;;  %2134 = vmatprep.subr.mxu0 %v2057_v62  ;;  %v2473_v62 = vld [vmem:[#allocation16 + $0x468] sm:$0xff] }
 0x66b   :  { %1987 = vmatprep.subr.mxu1 %v1898_v4  ;;  %2135 = vmatpush2.msra.mxu0 %v2056_v0  ;;  %v2471_v0 = vld [vmem:[#allocation16 + $0x458] sm:$0xff] }
 0x66c   :  { %1988 = vmatpush2.msra.mxu1 %v1897_v5 }
 0x66d   :  { %1989 = vmatprep.subr.mxu1 %v1896_v6  ;;  %v2184_v6 = vld [vmem:[#allocation16 + $0x2f0] sm:$0xff] }
 0x66e   :  { %1990 = vmatpush2.msra.mxu1 %v1895_v45  ;;  %v2183_v45 = vld [vmem:[#allocation16 + $0x2e8] sm:$0xff] }
 0x66f   :  { %2218 = vmatprep.subr.mxu1 %v2185_v8  ;;  %v2181_v8 = vld [vmem:[#allocation16 + $0x2d8] sm:$0xff] }
 0x6eb   :  { %v5506_v2 = vpop.f32.mrf.mxu1 }
 0x6ed   :  { %v5508_v3 = vpop.f32.mrf.mxu1 }
 0x6ef   :  { %v1857_v4 = vpop.f32.mrf.mxu1 }
 0x6f1   :  { %v1859_v5 = vpop.f32.mrf.mxu1 }
 0x6f2   :  { %1991 = vmatprep.mubr.f32.mxu1 %v1859_v5  ;;  %v2193_v5 = vld [vmem:[#allocation16 + $0x338] sm:$0xff] }
 0x6f3   :  { %1992 = vmatmul.mubr.f32.vlgmr.msra.gmra.mxu1 %v1857_v4  ;;  %v2055_v4 = vld [vmem:[#allocation16 + $0x138] sm:$0xff] }
 0x6f4   :  { %2219 = vmatpush1.msra.mxu1 %v2184_v6  ;;  %2136 = vmatprep.subr.mxu0 %v2055_v4  ;;  %v2054_v6 = vld [vmem:[#allocation16 + $0x130] sm:$0xff]  ;;  %v2469_v4 = vld [vmem:[#allocation16 + $0x448] sm:$0xff] }
 0x6f5   :  { %2220 = vmatprep.subr.mxu1 %v2183_v45  ;;  %v2192_v45 = vld [vmem:[#allocation16 + $0x330] sm:$0xff]  ;;  %2137 = vmatpush2.msra.mxu0 %v2054_v6  ;;  %v2467_v6 = vld [vmem:[#allocation16 + $0x438] sm:$0xff] }
 0x6f6   :  { %2221 = vmatpush1.msra.mxu1 %v2182_v7  ;;  %v2053_v7 = vld [vmem:[#allocation16 + $0x128] sm:$0xff] }
 0x6f7   :  { %2222 = vmatprep.subr.mxu1 %v2181_v8  ;;  %v2191_v8 = vld [vmem:[#allocation16 + $0x328] sm:$0xff]  ;;  %2138 = vmatprep.subr.mxu0 %v2053_v7 }
 0x6f8   :  { %2223 = vmatpush1.msra.mxu1 %v2180_v9  ;;  %v2052_v9 = vld [vmem:[#allocation16 + $0x120] sm:$0xff]  ;;  %v2465_v7 = vld [vmem:[#allocation16 + $0x428] sm:$0xff] }
 0x6f9   :  { %2224 = vmatprep.subr.mxu1 %v2179_v47  ;;  %v2190_v47 = vld [vmem:[#allocation16 + $0x320] sm:$0xff]  ;;  %2139 = vmatpush2.msra.mxu0 %v2052_v9  ;;  %v2463_v9 = vld [vmem:[#allocation16 + $0x418] sm:$0xff] }
 0x6fa   :  { %2225 = vmatpush1.msra.mxu1 %v2178_v10  ;;  %v2051_v10 = vld [vmem:[#allocation16 + $0x118] sm:$0xff] }
 0x6fb   :  { %2226 = vmatprep.subr.mxu1 %v2177_v11  ;;  %v2189_v11 = vld [vmem:[#allocation16 + $0x318] sm:$0xff]  ;;  %2140 = vmatprep.subr.mxu0 %v2051_v10  ;;  %v2461_v10 = vld [vmem:[#allocation16 + $0x408] sm:$0xff] }
 0x6fc   :  { %2227 = vmatpush1.msra.mxu1 %v2176_v49  ;;  %v2050_v49 = vld [vmem:[#allocation16 + $0x110] sm:$0xff] }
 0x6fd   :  { %2228 = vmatprep.subr.mxu1 %v2175_v13  ;;  %v2188_v13 = vld [vmem:[#allocation16 + $0x310] sm:$0xff]  ;;  %2141 = vmatpush2.msra.mxu0 %v2050_v49  ;;  %v2523_v49 = vld [vmem:[#allocation16 + $0x5f8] sm:$0xff] }
 0x6fe   :  { %2229 = vmatpush1.msra.mxu1 %v2174_v51  ;;  %v2049_v51 = vld [vmem:[#allocation16 + $0x108] sm:$0xff] }
 0x6ff   :  { %2230 = vmatprep.subr.mxu1 %v2173_v15  ;;  %v2187_v15 = vld [vmem:[#allocation16 + $0x308] sm:$0xff]  ;;  %2142 = vmatprep.subr.mxu0 %v2049_v51 }
 0x700   :  { %2231 = vmatpush1.msra.mxu1 %v2172_v20  ;;  %v2048_v20 = vld [vmem:[#allocation16 + $0x100] sm:$0xff]  ;;  %v2521_v51 = vld [vmem:[#allocation16 + $0x5e8] sm:$0xff] }
 0x701   :  { %2232 = vmatprep.subr.mxu1 %v2171_v21  ;;  %v2186_v21 = vld [vmem:[#allocation16 + $0x300] sm:$0xff]  ;;  %2143 = vmatpush2.msra.mxu0 %v2048_v20  ;;  %v2519_v20 = vld [vmem:[#allocation16 + $0x5d8] sm:$0xff] }
 0x702   :  { %2233 = vmatpush1.msra.mxu1 %v2170_v22  ;;  %v1781_v22 = vpop.f32.mrf.mxu0 }
 0x703   :  { %2234 = vmatprep.subr.mxu1 %v2169_v23  ;;  %v2000_v23 = vld [vmem:[%s5677_s9] sm:$0x3] }
 0x704   :  { %2235 = vmatpush1.msra.mxu1 %v2168_v24  ;;  %v1782_v24 = vadd.f32 %v1781_v22, %v5506_v2  ;;  %v2517_v22 = vld [vmem:[#allocation16 + $0x5c8] sm:$0xff] }
 0x705   :  { %2236 = vmatprep.subr.mxu1 %v2167_v25  ;;  %v1783_v25 = vpop.f32.mrf.mxu0 }
 0x706   :  { %2237 = vmatpush1.msra.mxu1 %v2166_v26 }
 0x707   :  { %2238 = vmatprep.subr.mxu1 %v2165_v27  ;;  %v2005_v27 = vrot.slane %v2000_v23, %v5470_v14 }
 0x708   :  { %2239 = vmatpush1.msra.mxu1 %v2164_v28  ;;  %v1784_v28 = vadd.f32 %v1783_v25, %v5508_v3  ;;  %v2514_v25 = vld [vmem:[#allocation16 + $0x5b0] sm:$0xff] }
 0x709   :  { %2240 = vmatprep.subr.mxu1 %v2163_v29 }
 0x70a   :  { %2241 = vmatpush1.msra.mxu1 %v2162_v30  ;;  %v2009_v30 = vrot.slane %v2000_v23, %v5468_v12  ;;  %v2516_v23 = vld [vmem:[#allocation16 + $0x5c0] sm:$0xff] }
 0x70b   :  { %2242 = vmatprep.subr.mxu1 %v2161_v31 }
 0x70c   :  { %2243 = vmatpush1.msra.mxu1 %v2160_v17 }
 0x70d   :  { %2244 = vmatprep.subr.mxu1 %v2159_v18 }
 0x70e   :  { %2245 = vmatpush1.msra.mxu1 %v2158_v32 }
 0x70f   :  { %2246 = vmatprep.subr.mxu1 %v2157_v33 }
 0x710   :  { %2247 = vmatpush1.msra.mxu1 %v2156_v34 }
 0x711   :  { %2248 = vmatprep.subr.mxu1 %v2155_v35 }
 0x712   :  { %2249 = vmatpush1.msra.mxu1 %v2154_v16  ;;  %v2290_v16 = vld [vmem:[#allocation14 + $0x10] sm:$0xff] }
 0x713   :  { %2250 = vmatprep.subr.mxu1 %v2217_v37 }
 0x714   :  { %2251 = vmatpush2.msra.mxu1 %v2216_v39  ;;  %v2491_v39 = vld [vmem:[#allocation16 + $0x4f8] sm:$0xff] }
 0x715   :  { %2252 = vmatprep.subr.mxu1 %v2215_v40  ;;  %v2291_v40 = vld [vmem:[#allocation14 + $0x18] sm:$0xff] }
 0x716   :  { %2253 = vmatpush2.msra.mxu1 %v2214_v19  ;;  %v2151_v19 = vld [vmem:[#allocation14] sm:$0xff] }
 0x717   :  { %2254 = vmatprep.subr.mxu1 %v2213_v41  ;;  %v2490_v41 = vld [vmem:[#allocation16 + $0x4f0] sm:$0xff] }
 0x718   :  { %2255 = vmatpush2.msra.mxu1 %v2212_v42  ;;  %v2489_v42 = vld [vmem:[#allocation16 + $0x4e8] sm:$0xff] }
 0x719   :  { %2256 = vmatprep.subr.mxu1 %v2211_v44  ;;  %v2488_v44 = vld [vmem:[#allocation16 + $0x4e0] sm:$0xff] }
 0x71a   :  { %2257 = vmatpush2.msra.mxu1 %v2210_v46  ;;  %v2487_v46 = vld [vmem:[#allocation16 + $0x4d8] sm:$0xff] }
 0x71b   :  { %2258 = vmatprep.subr.mxu1 %v2209_v48  ;;  %v2152_v48 = vld [vmem:[#allocation14 + $0x8] sm:$0xff] }
 0x71c   :  { %2259 = vmatpush2.msra.mxu1 %v2208_v50  ;;  %v2486_v50 = vld [vmem:[#allocation16 + $0x4d0] sm:$0xff] }
 0x71d   :  { %2260 = vmatprep.subr.mxu1 %v2207_v52  ;;  %v2485_v52 = vld [vmem:[#allocation16 + $0x4c8] sm:$0xff] }
 0x71e   :  { %2261 = vmatpush2.msra.mxu1 %v2206_v53  ;;  %v2484_v53 = vld [vmem:[#allocation16 + $0x4c0] sm:$0xff] }
 0x71f   :  { %2262 = vmatprep.subr.mxu1 %v2205_v54  ;;  %v2483_v54 = vld [vmem:[#allocation16 + $0x4b8] sm:$0xff] }
 0x720   :  { %2263 = vmatpush2.msra.mxu1 %v2204_v36  ;;  %v2482_v36 = vld [vmem:[#allocation16 + $0x4b0] sm:$0xff] }
 0x721   :  { %2264 = vmatprep.subr.mxu1 %v2203_v55  ;;  %v2481_v55 = vld [vmem:[#allocation16 + $0x4a8] sm:$0xff] }
 0x722   :  { %2265 = vmatpush2.msra.mxu1 %v2202_v56  ;;  %v2480_v56 = vld [vmem:[#allocation16 + $0x4a0] sm:$0xff] }
 0x723   :  { %2266 = vmatprep.subr.mxu1 %v2201_v38  ;;  %v2479_v38 = vld [vmem:[#allocation16 + $0x498] sm:$0xff] }
 0x724   :  { %2267 = vmatpush2.msra.mxu1 %v2200_v57  ;;  %v2478_v57 = vld [vmem:[#allocation16 + $0x490] sm:$0xff] }
 0x725   :  { %2268 = vmatprep.subr.mxu1 %v2199_v58  ;;  %v2477_v58 = vld [vmem:[#allocation16 + $0x488] sm:$0xff] }
 0x726   :  { %2269 = vmatpush2.msra.mxu1 %v2198_v59  ;;  %v2476_v59 = vld [vmem:[#allocation16 + $0x480] sm:$0xff] }
 0x727   :  { %2270 = vmatprep.subr.mxu1 %v2197_v60  ;;  %v2475_v60 = vld [vmem:[#allocation16 + $0x478] sm:$0xff] }
 0x728   :  { %2271 = vmatpush2.msra.mxu1 %v2196_v61  ;;  %v2474_v61 = vld [vmem:[#allocation16 + $0x470] sm:$0xff] }
 0x729   :  { %2272 = vmatprep.subr.mxu1 %v2195_v63  ;;  %v2472_v63 = vld [vmem:[#allocation16 + $0x460] sm:$0xff] }
 0x72a   :  { %2273 = vmatpush2.msra.mxu1 %v2194_v1  ;;  %v2470_v1 = vld [vmem:[#allocation16 + $0x450] sm:$0xff] }
 0x72b   :  { %2274 = vmatprep.subr.mxu1 %v2193_v5  ;;  %v2468_v5 = vld [vmem:[#allocation16 + $0x440] sm:$0xff] }
 0x72c   :  { %2275 = vmatpush2.msra.mxu1 %v2192_v45  ;;  %v2466_v45 = vld [vmem:[#allocation16 + $0x430] sm:$0xff] }
 0x72d   :  { %2276 = vmatprep.subr.mxu1 %v2191_v8  ;;  %v2464_v8 = vld [vmem:[#allocation16 + $0x420] sm:$0xff] }
 0x72e   :  { %2277 = vmatpush2.msra.mxu1 %v2190_v47  ;;  %v2462_v47 = vld [vmem:[#allocation16 + $0x410] sm:$0xff] }
 0x72f   :  { %2278 = vmatprep.subr.mxu1 %v2189_v11  ;;  %v2460_v11 = vld [vmem:[#allocation16 + $0x400] sm:$0xff] }
 0x730   :  { %2279 = vmatpush2.msra.mxu1 %v2188_v13  ;;  %v2522_v13 = vld [vmem:[#allocation16 + $0x5f0] sm:$0xff] }
 0x731   :  { %2280 = vmatprep.subr.mxu1 %v2187_v15  ;;  %v2520_v15 = vld [vmem:[#allocation16 + $0x5e0] sm:$0xff] }
 0x732   :  { %2281 = vmatpush2.msra.mxu1 %v2186_v21  ;;  %v2518_v21 = vld [vmem:[#allocation16 + $0x5d0] sm:$0xff] }
 0x7b3   :  { %v1993_v26 = vpop.f32.mrf.mxu1 }
 0x7b4   :  { %v1998_v29 = vadd.f32 %v1993_v26, %v1782_v24  ;;  %v2515_v24 = vld [vmem:[#allocation16 + $0x5b8] sm:$0xff]  ;;  %v2513_v26 = vld [vmem:[#allocation16 + $0x5a8] sm:$0xff] }
 0x7b5   :  { %v1995_v31 = vpop.f32.mrf.mxu1 }
 0x7b6   :  { %v1999_v17 = vadd.f32 %v1995_v31, %v1784_v28  ;;  %v2012_v18 = vadd.f32 %v2005_v27, %v1998_v29  ;;  %v2512_v27 = vld [vmem:[#allocation16 + $0x5a0] sm:$0xff]  ;;  %v2511_v28 = vld [vmem:[#allocation16 + $0x598] sm:$0xff]  ;;  %v2510_v29 = vld [vmem:[#allocation16 + $0x590] sm:$0xff] }
 0x7b7   :  { %v2508_v31 = vld [vmem:[#allocation16 + $0x580] sm:$0xff] }
 0x7b8   :  { %v2013_v32 = vadd.f32 %v2009_v30, %v1999_v17  ;;  %v5519_v34 = vmax.f32 %v2012_v18, 0.0  ;;  %v2509_v30 = vld [vmem:[#allocation16 + $0x588] sm:$0xff]  ;;  %v2507_v17 = vld [vmem:[#allocation16 + $0x578] sm:$0xff]  ;;  %v2506_v18 = vld [vmem:[#allocation16 + $0x570] sm:$0xff] }
 0x7ba   :  { %v5517_v33 = vmax.f32 %v2013_v32, 0.0  ;;  %v2505_v32 = vld [vmem:[#allocation16 + $0x568] sm:$0xff] }
 0x7bc   :  { %2144 = vmatprep.mubr.f32.mxu0 %v5517_v33  ;;  %2282 = vmatprep.mubr.f32.mxu1 %v5517_v33 }
 0x7bd   :  { %2145 = vmatmul.mubr.f32.vlgmr.msra.gmra.mxu0 %v5519_v34  ;;  %2283 = vmatmul.mubr.f32.vlgmr.msra.gmra.mxu1 %v5519_v34 }
 0x7be   :  { %2363 = vmatprep.mubr.f32.mxu0 %v5245_v43  ;;  %2668 = vmatprep.mubr.f32.mxu1 %v5245_v43 }
 0x87d   :  { %v2146_v2 = vpop.f32.mrf.mxu0  ;;  %v2284_v3 = vpop.f32.mrf.mxu1 }
 0x87f   :  { %v2286_v35 = vpop.f32.mrf.mxu1  ;;  %v2148_v37 = vpop.f32.mrf.mxu0 }
 0x880   :  { %2329 = vmatprep.subr.mxu0 %v2286_v35  ;;  %v2502_v35 = vld [vmem:[#allocation16 + $0x550] sm:$0xff] }
 0x881   :  { %2330 = vmatpush1.msra.mxu0 %v2284_v3  ;;  %v2503_v3 = vld [vmem:[#allocation16 + $0x558] sm:$0xff] }
 0x882   :  { %4370 = vmatmul.mubr.msk.f32.vlgmr.msra.gmra.mxu0 %vm2292_vm2, %v2290_v16  ;;  %2412 = vmatprep.subr.mxu0 %v2148_v37  ;;  %v2501_v16 = vld [vmem:[#allocation16 + $0x548] sm:$0xff]  ;;  %v2500_v37 = vld [vmem:[#allocation16 + $0x540] sm:$0xff] }
 0x883   :  { %2413 = vmatpush1.msra.mxu0 %v2146_v2  ;;  %2369 = vmatprep.mubr.f32.mxu0 %v5245_v43  ;;  %v2504_v2 = vld [vmem:[#allocation16 + $0x560] sm:$0xff] }
 0x884   :  { %2524 = vmatprep.subr.mxu0 %v2491_v39  ;;  %v2499_v39 = vld [vmem:[#allocation16 + $0x538] sm:$0xff] }
 0x886   :  { %4371 = vmatmul.mubr.msk.f32.gmra.mxu0 %vm2292_vm2, %v2291_v40  ;;  %v2498_v40 = vld [vmem:[#allocation16 + $0x530] sm:$0xff] }
 0x887   :  { %2446 = vmatprep.mubr.f32.mxu0 %v5245_v43 }
 0x88a   :  { %4372 = vmatmul.mubr.msk.f32.vlgmr.msra.gmra.mxu0 %vm2292_vm2, %v2151_v19  ;;  %v2497_v19 = vld [vmem:[#allocation16 + $0x528] sm:$0xff] }
 0x88b   :  { %2525 = vmatpush1.msra.mxu0 %v2490_v41  ;;  %2452 = vmatprep.mubr.f32.mxu0 %v5245_v43  ;;  %v2496_v41 = vld [vmem:[#allocation16 + $0x520] sm:$0xff] }
 0x88c   :  { %2526 = vmatprep.subr.mxu0 %v2489_v42  ;;  %v2495_v42 = vld [vmem:[#allocation16 + $0x518] sm:$0xff] }
 0x88d   :  { %2527 = vmatpush1.msra.mxu0 %v2488_v44  ;;  %v2494_v44 = vld [vmem:[#allocation16 + $0x510] sm:$0xff] }
 0x88e   :  { %2528 = vmatprep.subr.mxu0 %v2487_v46  ;;  %4373 = vmatmul.mubr.msk.f32.gmra.mxu0 %vm2292_vm2, %v2152_v48  ;;  %v2493_v46 = vld [vmem:[#allocation16 + $0x508] sm:$0xff]  ;;  %v2492_v48 = vld [vmem:[#allocation16 + $0x500] sm:$0xff] }
 0x88f   :  { %2529 = vmatpush1.msra.mxu0 %v2486_v50  ;;  %2588 = vmatprep.mubr.f32.mxu0 %v5517_v33 }
 0x890   :  { %2530 = vmatprep.subr.mxu0 %v2485_v52 }
 0x891   :  { %2531 = vmatpush1.msra.mxu0 %v2484_v53 }
 0x892   :  { %2532 = vmatprep.subr.mxu0 %v2483_v54 }
 0x893   :  { %2533 = vmatpush1.msra.mxu0 %v2482_v36 }
 0x894   :  { %2534 = vmatprep.subr.mxu0 %v2481_v55 }
 0x895   :  { %2535 = vmatpush1.msra.mxu0 %v2480_v56 }
 0x896   :  { %2536 = vmatprep.subr.mxu0 %v2479_v38 }
 0x897   :  { %2537 = vmatpush1.msra.mxu0 %v2478_v57 }
 0x898   :  { %2538 = vmatprep.subr.mxu0 %v2477_v58 }
 0x899   :  { %2539 = vmatpush1.msra.mxu0 %v2476_v59 }
 0x89a   :  { %2540 = vmatprep.subr.mxu0 %v2475_v60 }
 0x89b   :  { %2541 = vmatpush1.msra.mxu0 %v2474_v61 }
 0x89c   :  { %2542 = vmatprep.subr.mxu0 %v2473_v62 }
 0x89d   :  { %2543 = vmatpush1.msra.mxu0 %v2472_v63  ;;  %v2596_v63 = vld [vmem:[#allocation14 + $0x20] sm:$0xff] }
 0x89e   :  { %2544 = vmatprep.subr.mxu0 %v2471_v0  ;;  %v2717_v0 = vld [vmem:[#allocation16 + $0x6f8] sm:$0xff] }
 0x89f   :  { %2545 = vmatpush1.msra.mxu0 %v2470_v1  ;;  %v2716_v1 = vld [vmem:[#allocation16 + $0x6f0] sm:$0xff] }
 0x8a0   :  { %2546 = vmatprep.subr.mxu0 %v2469_v4  ;;  %v2715_v4 = vld [vmem:[#allocation16 + $0x6e8] sm:$0xff] }
 0x8a1   :  { %2547 = vmatpush1.msra.mxu0 %v2468_v5  ;;  %v2714_v5 = vld [vmem:[#allocation16 + $0x6e0] sm:$0xff] }
 0x8a2   :  { %2548 = vmatprep.subr.mxu0 %v2467_v6  ;;  %v2597_v6 = vld [vmem:[#allocation14 + $0x28] sm:$0xff] }
 0x8a3   :  { %2549 = vmatpush1.msra.mxu0 %v2466_v45  ;;  %v2713_v45 = vld [vmem:[#allocation16 + $0x6d8] sm:$0xff] }
 0x8a4   :  { %2550 = vmatprep.subr.mxu0 %v2465_v7  ;;  %v2712_v7 = vld [vmem:[#allocation16 + $0x6d0] sm:$0xff] }
 0x8a5   :  { %2551 = vmatpush1.msra.mxu0 %v2464_v8  ;;  %v2711_v8 = vld [vmem:[#allocation16 + $0x6c8] sm:$0xff] }
 0x8a6   :  { %2552 = vmatprep.subr.mxu0 %v2463_v9  ;;  %v2710_v9 = vld [vmem:[#allocation16 + $0x6c0] sm:$0xff] }
 0x8a7   :  { %2553 = vmatpush1.msra.mxu0 %v2462_v47  ;;  %v2709_v47 = vld [vmem:[#allocation16 + $0x6b8] sm:$0xff] }
 0x8a8   :  { %2554 = vmatprep.subr.mxu0 %v2461_v10  ;;  %v2708_v10 = vld [vmem:[#allocation16 + $0x6b0] sm:$0xff] }
 0x8a9   :  { %2555 = vmatpush1.msra.mxu0 %v2460_v11  ;;  %v2707_v11 = vld [vmem:[#allocation16 + $0x6a8] sm:$0xff] }
 0x8aa   :  { %2556 = vmatprep.subr.mxu0 %v2523_v49  ;;  %v2706_v49 = vld [vmem:[#allocation16 + $0x6a0] sm:$0xff] }
 0x8ab   :  { %2557 = vmatpush2.msra.mxu0 %v2522_v13  ;;  %v2705_v13 = vld [vmem:[#allocation16 + $0x698] sm:$0xff] }
 0x8ac   :  { %2558 = vmatprep.subr.mxu0 %v2521_v51  ;;  %v2704_v51 = vld [vmem:[#allocation16 + $0x690] sm:$0xff] }
 0x8ad   :  { %2559 = vmatpush2.msra.mxu0 %v2520_v15  ;;  %v2703_v15 = vld [vmem:[#allocation16 + $0x688] sm:$0xff] }
 0x8ae   :  { %2560 = vmatprep.subr.mxu0 %v2519_v20  ;;  %v2702_v20 = vld [vmem:[#allocation16 + $0x680] sm:$0xff] }
 0x8af   :  { %2561 = vmatpush2.msra.mxu0 %v2518_v21  ;;  %v2701_v21 = vld [vmem:[#allocation16 + $0x678] sm:$0xff] }
 0x8b0   :  { %2562 = vmatprep.subr.mxu0 %v2517_v22  ;;  %v2700_v22 = vld [vmem:[#allocation16 + $0x670] sm:$0xff] }
 0x8b1   :  { %2563 = vmatpush2.msra.mxu0 %v2516_v23  ;;  %v2698_v23 = vld [vmem:[#allocation16 + $0x660] sm:$0xff] }
 0x8b2   :  { %2564 = vmatprep.subr.mxu0 %v2515_v24  ;;  %v2697_v24 = vld [vmem:[#allocation16 + $0x658] sm:$0xff] }
 0x8b3   :  { %2565 = vmatpush2.msra.mxu0 %v2514_v25  ;;  %v2696_v25 = vld [vmem:[#allocation16 + $0x650] sm:$0xff] }
 0x8b4   :  { %2566 = vmatprep.subr.mxu0 %v2513_v26  ;;  %v2695_v26 = vld [vmem:[#allocation16 + $0x648] sm:$0xff] }
 0x8b5   :  { %2567 = vmatpush2.msra.mxu0 %v2512_v27  ;;  %v2694_v27 = vld [vmem:[#allocation16 + $0x640] sm:$0xff] }
 0x8b6   :  { %2568 = vmatprep.subr.mxu0 %v2511_v28  ;;  %v2693_v28 = vld [vmem:[#allocation16 + $0x638] sm:$0xff] }
 0x8b7   :  { %2569 = vmatpush2.msra.mxu0 %v2510_v29  ;;  %v2692_v29 = vld [vmem:[#allocation16 + $0x630] sm:$0xff] }
 0x8b8   :  { %2570 = vmatprep.subr.mxu0 %v2509_v30  ;;  %v2691_v30 = vld [vmem:[#allocation16 + $0x628] sm:$0xff] }
 0x8b9   :  { %2571 = vmatpush2.msra.mxu0 %v2508_v31  ;;  %v2690_v31 = vld [vmem:[#allocation16 + $0x620] sm:$0xff] }
 0x8ba   :  { %2572 = vmatprep.subr.mxu0 %v2507_v17  ;;  %v2689_v17 = vld [vmem:[#allocation16 + $0x618] sm:$0xff] }
 0x8bb   :  { %2573 = vmatpush2.msra.mxu0 %v2506_v18  ;;  %v2688_v18 = vld [vmem:[#allocation16 + $0x610] sm:$0xff] }
 0x8bc   :  { %2574 = vmatprep.subr.mxu0 %v2505_v32  ;;  %v2687_v32 = vld [vmem:[#allocation16 + $0x608] sm:$0xff] }
 0x8bd   :  { %2575 = vmatpush2.msra.mxu0 %v2504_v2  ;;  %v2686_v2 = vld [vmem:[#allocation16 + $0x600] sm:$0xff] }
 0x8be   :  { %2576 = vmatprep.subr.mxu0 %v2503_v3  ;;  %v2749_v3 = vld [vmem:[#allocation16 + $0x7f8] sm:$0xff] }
 0x8bf   :  { %2577 = vmatpush2.msra.mxu0 %v2502_v35  ;;  %v2748_v35 = vld [vmem:[#allocation16 + $0x7f0] sm:$0xff] }
 0x8c0   :  { %2578 = vmatprep.subr.mxu0 %v2501_v16  ;;  %v2747_v16 = vld [vmem:[#allocation16 + $0x7e8] sm:$0xff] }
 0x8c1   :  { %2579 = vmatpush2.msra.mxu0 %v2500_v37  ;;  %v2746_v37 = vld [vmem:[#allocation16 + $0x7e0] sm:$0xff] }
 0x8c2   :  { %2580 = vmatprep.subr.mxu0 %v2499_v39  ;;  %v2745_v39 = vld [vmem:[#allocation16 + $0x7d8] sm:$0xff] }
 0x8c3   :  { %2581 = vmatpush2.msra.mxu0 %v2498_v40  ;;  %v2744_v40 = vld [vmem:[#allocation16 + $0x7d0] sm:$0xff] }
 0x8c4   :  { %2582 = vmatprep.subr.mxu0 %v2497_v19  ;;  %v2743_v19 = vld [vmem:[#allocation16 + $0x7c8] sm:$0xff] }
 0x8c5   :  { %2583 = vmatpush2.msra.mxu0 %v2496_v41  ;;  %v2742_v41 = vld [vmem:[#allocation16 + $0x7c0] sm:$0xff] }
 0x8c6   :  { %2584 = vmatprep.subr.mxu0 %v2495_v42  ;;  %v2741_v42 = vld [vmem:[#allocation16 + $0x7b8] sm:$0xff] }
 0x8c7   :  { %2585 = vmatpush2.msra.mxu0 %v2494_v44  ;;  %v2740_v44 = vld [vmem:[#allocation16 + $0x7b0] sm:$0xff] }
 0x8c8   :  { %2586 = vmatprep.subr.mxu0 %v2493_v46  ;;  %v2739_v46 = vld [vmem:[#allocation16 + $0x7a8] sm:$0xff] }
 0x8c9   :  { %2587 = vmatpush2.msra.mxu0 %v2492_v48  ;;  %v2738_v48 = vld [vmem:[#allocation16 + $0x7a0] sm:$0xff] }
 0x8ca   :  { %2589 = vmatmul.mubr.f32.vlgmr.msra.gmra.mxu0 %v5519_v34 }
 0x8cb   :  { %2894 = vmatprep.mubr.f32.mxu0 %v5245_v43 }
 0x942   :  { %v2365_v50 = vpop.f32.mrf.mxu0 }
 0x944   :  { %v2367_v52 = vpop.f32.mrf.mxu0 }
 0x946   :  { %v2371_v53 = vpop.f32.mrf.mxu0 }
 0x948   :  { %v2373_v54 = vpop.f32.mrf.mxu0 }
 0x94a   :  { %v2448_v36 = vpop.f32.mrf.mxu0 }
 0x94b   :  { %v5537_v55 = vadd.f32 %v2448_v36, %v2365_v50  ;;  %v2737_v50 = vld [vmem:[#allocation16 + $0x798] sm:$0xff] }
 0x94c   :  { %v2450_v56 = vpop.f32.mrf.mxu0  ;;  %v2733_v36 = vld [vmem:[#allocation16 + $0x778] sm:$0xff] }
 0x94d   :  { %v5539_v38 = vadd.f32 %v2450_v56, %v2367_v52  ;;  %v2736_v52 = vld [vmem:[#allocation16 + $0x790] sm:$0xff] }
 0x94e   :  { %v2454_v57 = vpop.f32.mrf.mxu0  ;;  %v2732_v56 = vld [vmem:[#allocation16 + $0x770] sm:$0xff] }
 0x94f   :  { %v5541_v58 = vadd.f32 %v2454_v57, %v2371_v53  ;;  %v2735_v53 = vld [vmem:[#allocation16 + $0x788] sm:$0xff] }
 0x950   :  { %v2456_v59 = vpop.f32.mrf.mxu0  ;;  %v2731_v57 = vld [vmem:[#allocation16 + $0x768] sm:$0xff] }
 0x951   :  { %v5543_v60 = vadd.f32 %v2456_v59, %v2373_v54  ;;  %v2734_v54 = vld [vmem:[#allocation16 + $0x780] sm:$0xff] }
 0x952   :  { %v2730_v59 = vld [vmem:[#allocation16 + $0x760] sm:$0xff] }
 0x98a   :  { %v2590_v61 = vpop.f32.mrf.mxu0 }
 0x98c   :  { %v2592_v62 = vpop.f32.mrf.mxu0 }
 0x98d   :  { %2634 = vmatprep.subr.mxu1 %v2592_v62  ;;  %v2728_v62 = vld [vmem:[#allocation16 + $0x750] sm:$0xff] }
 0x98e   :  { %2635 = vmatpush1.msra.mxu1 %v2590_v61  ;;  %v2729_v61 = vld [vmem:[#allocation16 + $0x758] sm:$0xff] }
 0x98f   :  { %4374 = vmatmul.mubr.msk.f32.vlgmr.msra.gmra.mxu1 %vm2292_vm2, %v2596_v63  ;;  %2750 = vmatprep.subr.mxu1 %v2717_v0  ;;  %v2727_v63 = vld [vmem:[#allocation16 + $0x748] sm:$0xff]  ;;  %v2726_v0 = vld [vmem:[#allocation16 + $0x740] sm:$0xff] }
 0x990   :  { %2751 = vmatpush1.msra.mxu1 %v2716_v1  ;;  %2674 = vmatprep.mubr.f32.mxu1 %v5245_v43  ;;  %v2725_v1 = vld [vmem:[#allocation16 + $0x738] sm:$0xff] }
 0x991   :  { %2752 = vmatprep.subr.mxu1 %v2715_v4  ;;  %v2724_v4 = vld [vmem:[#allocation16 + $0x730] sm:$0xff] }
 0x992   :  { %2753 = vmatpush1.msra.mxu1 %v2714_v5  ;;  %v2723_v5 = vld [vmem:[#allocation16 + $0x728] sm:$0xff] }
 0x993   :  { %4375 = vmatmul.mubr.msk.f32.gmra.mxu1 %vm2292_vm2, %v2597_v6  ;;  %2754 = vmatprep.subr.mxu1 %v2713_v45  ;;  %v2722_v6 = vld [vmem:[#allocation16 + $0x720] sm:$0xff]  ;;  %v2721_v45 = vld [vmem:[#allocation16 + $0x718] sm:$0xff] }
 0x994   :  { %2755 = vmatpush1.msra.mxu1 %v2712_v7  ;;  %2814 = vmatprep.mubr.f32.mxu1 %v5517_v33  ;;  %v2699_v33 = vld [vmem:[#allocation16 + $0x668] sm:$0xff]  ;;  %v2720_v7 = vld [vmem:[#allocation16 + $0x710] sm:$0xff] }
 0x995   :  { %2756 = vmatprep.subr.mxu1 %v2711_v8  ;;  %v2719_v8 = vld [vmem:[#allocation16 + $0x708] sm:$0xff] }
 0x996   :  { %2757 = vmatpush1.msra.mxu1 %v2710_v9  ;;  %v2718_v9 = vld [vmem:[#allocation16 + $0x700] sm:$0xff] }
 0x997   :  { %2758 = vmatprep.subr.mxu1 %v2709_v47 }
 0x998   :  { %2759 = vmatpush1.msra.mxu1 %v2708_v10 }
 0x999   :  { %2760 = vmatprep.subr.mxu1 %v2707_v11 }
 0x99a   :  { %2761 = vmatpush1.msra.mxu1 %v2706_v49 }
 0x99b   :  { %2762 = vmatprep.subr.mxu1 %v2705_v13 }
 0x99c   :  { %2763 = vmatpush1.msra.mxu1 %v2704_v51 }
 0x99d   :  { %2764 = vmatprep.subr.mxu1 %v2703_v15 }
 0x99e   :  { %2765 = vmatpush1.msra.mxu1 %v2702_v20 }
 0x99f   :  { %2766 = vmatprep.subr.mxu1 %v2701_v21 }
 0x9a0   :  { %2767 = vmatpush1.msra.mxu1 %v2700_v22 }
 0x9a1   :  { %2768 = vmatprep.subr.mxu1 %v2699_v33  ;;  %v2822_v33 = vld [vmem:[#allocation14 + $0x30] sm:$0xff] }
 0x9a2   :  { %2769 = vmatpush1.msra.mxu1 %v2698_v23  ;;  %v3045_v23 = vld [vmem:[#allocation19 + $0xe8] sm:$0xff] }
 0x9a3   :  { %2770 = vmatprep.subr.mxu1 %v2697_v24  ;;  %v3029_v24 = vld [vmem:[#allocation19 + $0x68] sm:$0xff] }
 0x9a4   :  { %2771 = vmatpush1.msra.mxu1 %v2696_v25  ;;  %v3044_v25 = vld [vmem:[#allocation19 + $0xe0] sm:$0xff] }
 0x9a5   :  { %2772 = vmatprep.subr.mxu1 %v2695_v26  ;;  %v3028_v26 = vld [vmem:[#allocation19 + $0x60] sm:$0xff] }
 0x9a6   :  { %2773 = vmatpush1.msra.mxu1 %v2694_v27  ;;  %v3043_v27 = vld [vmem:[#allocation19 + $0xd8] sm:$0xff] }
 0x9a7   :  { %2774 = vmatprep.subr.mxu1 %v2693_v28  ;;  %v3027_v28 = vld [vmem:[#allocation19 + $0x58] sm:$0xff] }
 0x9a8   :  { %2775 = vmatpush1.msra.mxu1 %v2692_v29  ;;  %v3042_v29 = vld [vmem:[#allocation19 + $0xd0] sm:$0xff] }
 0x9a9   :  { %2776 = vmatprep.subr.mxu1 %v2691_v30  ;;  %v3026_v30 = vld [vmem:[#allocation19 + $0x50] sm:$0xff] }
 0x9aa   :  { %2777 = vmatpush1.msra.mxu1 %v2690_v31  ;;  %v3041_v31 = vld [vmem:[#allocation19 + $0xc8] sm:$0xff] }
 0x9ab   :  { %2778 = vmatprep.subr.mxu1 %v2689_v17  ;;  %v3025_v17 = vld [vmem:[#allocation19 + $0x48] sm:$0xff] }
 0x9ac   :  { %2779 = vmatpush1.msra.mxu1 %v2688_v18  ;;  %v3040_v18 = vld [vmem:[#allocation19 + $0xc0] sm:$0xff] }
 0x9ad   :  { %2780 = vmatprep.subr.mxu1 %v2687_v32  ;;  %v3024_v32 = vld [vmem:[#allocation19 + $0x40] sm:$0xff] }
 0x9ae   :  { %2781 = vmatpush1.msra.mxu1 %v2686_v2  ;;  %v3039_v2 = vld [vmem:[#allocation19 + $0xb8] sm:$0xff] }
 0x9af   :  { %2782 = vmatprep.subr.mxu1 %v2749_v3  ;;  %v3023_v3 = vld [vmem:[#allocation19 + $0x38] sm:$0xff] }
 0x9b0   :  { %2783 = vmatpush2.msra.mxu1 %v2748_v35  ;;  %v3038_v35 = vld [vmem:[#allocation19 + $0xb0] sm:$0xff] }
 0x9b1   :  { %2784 = vmatprep.subr.mxu1 %v2747_v16  ;;  %v3022_v16 = vld [vmem:[#allocation19 + $0x30] sm:$0xff] }
 0x9b2   :  { %2785 = vmatpush2.msra.mxu1 %v2746_v37  ;;  %v3037_v37 = vld [vmem:[#allocation19 + $0xa8] sm:$0xff] }
 0x9b3   :  { %2786 = vmatprep.subr.mxu1 %v2745_v39  ;;  %v3021_v39 = vld [vmem:[#allocation19 + $0x28] sm:$0xff] }
 0x9b4   :  { %2787 = vmatpush2.msra.mxu1 %v2744_v40  ;;  %v3036_v40 = vld [vmem:[#allocation19 + $0xa0] sm:$0xff] }
 0x9b5   :  { %2788 = vmatprep.subr.mxu1 %v2743_v19  ;;  %v3020_v19 = vld [vmem:[#allocation19 + $0x20] sm:$0xff] }
 0x9b6   :  { %2789 = vmatpush2.msra.mxu1 %v2742_v41  ;;  %v3035_v41 = vld [vmem:[#allocation19 + $0x98] sm:$0xff] }
 0x9b7   :  { %2790 = vmatprep.subr.mxu1 %v2741_v42  ;;  %v3019_v42 = vld [vmem:[#allocation19 + $0x18] sm:$0xff] }
 0x9b8   :  { %2791 = vmatpush2.msra.mxu1 %v2740_v44  ;;  %v3034_v44 = vld [vmem:[#allocation19 + $0x90] sm:$0xff] }
 0x9b9   :  { %2792 = vmatprep.subr.mxu1 %v2739_v46  ;;  %v3018_v46 = vld [vmem:[#allocation19 + $0x10] sm:$0xff] }
 0x9ba   :  { %2793 = vmatpush2.msra.mxu1 %v2738_v48 }
 0x9bb   :  { %2794 = vmatprep.subr.mxu1 %v2737_v50 }
 0x9bc   :  { %2795 = vmatpush2.msra.mxu1 %v2736_v52  ;;  %v2911_v52 = vld [vmem:[%s5680_s12] sm:$0x3] }
 0x9bd   :  { %2796 = vmatprep.subr.mxu1 %v2735_v53 }
 0x9be   :  { %2797 = vmatpush2.msra.mxu1 %v2734_v54 }
 0x9bf   :  { %2798 = vmatprep.subr.mxu1 %v2733_v36  ;;  %v2920_v36 = vrot.slane %v2911_v52, %v5468_v12 }
 0x9c0   :  { %2799 = vmatpush2.msra.mxu1 %v2732_v56 }
 0x9c1   :  { %2800 = vmatprep.subr.mxu1 %v2731_v57 }
 0x9c2   :  { %2801 = vmatpush2.msra.mxu1 %v2730_v59  ;;  %v2916_v59 = vrot.slane %v2911_v52, %v5470_v14  ;;  %v2931_v14 = vld [vmem:[#allocation17] sm:$0xff] }
 0x9c3   :  { %2802 = vmatprep.subr.mxu1 %v2729_v61 }
 0x9c4   :  { %2803 = vmatpush2.msra.mxu1 %v2728_v62 }
 0x9c5   :  { %2804 = vmatprep.subr.mxu1 %v2727_v63 }
 0x9c6   :  { %2805 = vmatpush2.msra.mxu1 %v2726_v0 }
 0x9c7   :  { %2806 = vmatprep.subr.mxu1 %v2725_v1 }
 0x9c8   :  { %2807 = vmatpush2.msra.mxu1 %v2724_v4 }
 0x9c9   :  { %2808 = vmatprep.subr.mxu1 %v2723_v5 }
 0x9ca   :  { %2809 = vmatpush2.msra.mxu1 %v2722_v6 }
 0x9cb   :  { %2810 = vmatprep.subr.mxu1 %v2721_v45 }
 0x9cc   :  { %2811 = vmatpush2.msra.mxu1 %v2720_v7  ;;  %v2932_v7 = vld [vmem:[#allocation17 + $0x8] sm:$0xff] }
 0x9cd   :  { %2812 = vmatprep.subr.mxu1 %v2719_v8  ;;  %v3166_v8 = vld [vmem:[#allocation19 + $0x1f8] sm:$0xff] }
 0x9ce   :  { %2813 = vmatpush2.msra.mxu1 %v2718_v9  ;;  %v3049_v9 = vld [vmem:[#allocation17 + $0x10] sm:$0xff] }
 0x9cf   :  { %2815 = vmatmul.mubr.f32.vlgmr.msra.gmra.mxu1 %v5519_v34  ;;  %v2823_v34 = vld [vmem:[#allocation14 + $0x38] sm:$0xff] }
 0xa4f   :  { %v2670_v47 = vpop.f32.mrf.mxu1 }
 0xa50   :  { %v5551_v10 = vadd.f32 %v2670_v47, %v5537_v55  ;;  %v3047_v55 = vld [vmem:[#allocation19 + $0xf8] sm:$0xff] }
 0xa51   :  { %v2672_v11 = vpop.f32.mrf.mxu1  ;;  %4482 = vmatprep.subr.mxu1 %v3047_v55  ;;  %v3150_v47 = vld [vmem:[#allocation19 + $0x178] sm:$0xff]  ;;  %v3160_v55 = vld [vmem:[#allocation19 + $0x1c8] sm:$0xff] }
 0xa52   :  { %v5554_v49 = vadd.f32 %v2672_v11, %v5539_v38  ;;  %v3031_v38 = vld [vmem:[#allocation19 + $0x78] sm:$0xff]  ;;  %v3149_v11 = vld [vmem:[#allocation19 + $0x170] sm:$0xff] }
 0xa53   :  { %v2676_v13 = vpop.f32.mrf.mxu1  ;;  %4483 = vmatpush3.msra.mxu1 %v3031_v38  ;;  %v3144_v38 = vld [vmem:[#allocation19 + $0x148] sm:$0xff] }
 0xa54   :  { %v5557_v51 = vadd.f32 %v2676_v13, %v5541_v58  ;;  %v3046_v58 = vld [vmem:[#allocation19 + $0xf0] sm:$0xff]  ;;  %v3050_v13 = vld [vmem:[#allocation17 + $0x18] sm:$0xff] }
 0xa55   :  { %v2678_v15 = vpop.f32.mrf.mxu1  ;;  %4484 = vmatprep.subr.mxu1 %v3046_v58  ;;  %v3159_v58 = vld [vmem:[#allocation19 + $0x1c0] sm:$0xff] }
 0xa56   :  { %v5560_v20 = vadd.f32 %v2678_v15, %v5543_v60  ;;  %v3030_v60 = vld [vmem:[#allocation19 + $0x70] sm:$0xff]  ;;  %v3163_v15 = vld [vmem:[#allocation19 + $0x1e0] sm:$0xff] }
 0xa57   :  { %4485 = vmatpush3.msra.mxu1 %v3030_v60  ;;  %v3143_v60 = vld [vmem:[#allocation19 + $0x140] sm:$0xff] }
 0xa58   :  { %4486 = vmatprep.subr.mxu1 %v3045_v23  ;;  %v3158_v23 = vld [vmem:[#allocation19 + $0x1b8] sm:$0xff] }
 0xa59   :  { %4487 = vmatpush3.msra.mxu1 %v3029_v24  ;;  %v3142_v24 = vld [vmem:[#allocation19 + $0x138] sm:$0xff] }
 0xa5a   :  { %4488 = vmatprep.subr.mxu1 %v3044_v25  ;;  %v3157_v25 = vld [vmem:[#allocation19 + $0x1b0] sm:$0xff] }
 0xa5b   :  { %4489 = vmatpush3.msra.mxu1 %v3028_v26  ;;  %v3141_v26 = vld [vmem:[#allocation19 + $0x130] sm:$0xff] }
 0xa5c   :  { %4490 = vmatprep.subr.mxu1 %v3043_v27  ;;  %v3156_v27 = vld [vmem:[#allocation19 + $0x1a8] sm:$0xff] }
 0xa5d   :  { %4491 = vmatpush3.msra.mxu1 %v3027_v28  ;;  %v3140_v28 = vld [vmem:[#allocation19 + $0x128] sm:$0xff] }
 0xa5e   :  { %4492 = vmatprep.subr.mxu1 %v3042_v29  ;;  %v3155_v29 = vld [vmem:[#allocation19 + $0x1a0] sm:$0xff] }
 0xa5f   :  { %4493 = vmatpush3.msra.mxu1 %v3026_v30  ;;  %v3139_v30 = vld [vmem:[#allocation19 + $0x120] sm:$0xff] }
 0xa60   :  { %4494 = vmatprep.subr.mxu1 %v3041_v31  ;;  %v3154_v31 = vld [vmem:[#allocation19 + $0x198] sm:$0xff] }
 0xa61   :  { %4495 = vmatpush3.msra.mxu1 %v3025_v17  ;;  %v3138_v17 = vld [vmem:[#allocation19 + $0x118] sm:$0xff] }
 0xa62   :  { %4496 = vmatprep.subr.mxu1 %v3040_v18  ;;  %v3153_v18 = vld [vmem:[#allocation19 + $0x190] sm:$0xff] }
 0xa63   :  { %4497 = vmatpush3.msra.mxu1 %v3024_v32  ;;  %v3137_v32 = vld [vmem:[#allocation19 + $0x110] sm:$0xff] }
 0xa64   :  { %4498 = vmatprep.subr.mxu1 %v3039_v2  ;;  %v3152_v2 = vld [vmem:[#allocation19 + $0x188] sm:$0xff] }
 0xa65   :  { %4499 = vmatpush3.msra.mxu1 %v3023_v3  ;;  %v3136_v3 = vld [vmem:[#allocation19 + $0x108] sm:$0xff] }
 0xa66   :  { %4500 = vmatprep.subr.mxu1 %v3038_v35  ;;  %v3151_v35 = vld [vmem:[#allocation19 + $0x180] sm:$0xff] }
 0xa67   :  { %4501 = vmatpush3.msra.mxu1 %v3022_v16  ;;  %v3135_v16 = vld [vmem:[#allocation19 + $0x100] sm:$0xff] }
 0xa68   :  { %4502 = vmatprep.subr.mxu1 %v3037_v37  ;;  %v3033_v37 = vld [vmem:[#allocation19 + $0x88] sm:$0xff] }
 0xa69   :  { %4503 = vmatpush3.msra.mxu1 %v3021_v39  ;;  %v3017_v39 = vld [vmem:[#allocation19 + $0x8] sm:$0xff] }
 0xa6a   :  { %4504 = vmatprep.subr.mxu1 %v3036_v40  ;;  %v3032_v40 = vld [vmem:[#allocation19 + $0x80] sm:$0xff] }
 0xa6b   :  { %4505 = vmatpush3.msra.mxu1 %v3020_v19  ;;  %v3016_v19 = vld [vmem:[#allocation19] sm:$0xff] }
 0xa6c   :  { %4506 = vmatprep.subr.mxu1 %v3035_v41 }
 0xa6d   :  { %4507 = vmatpush3.msra.mxu1 %v3019_v42 }
 0xa6e   :  { %4508 = vmatprep.subr.mxu1 %v3034_v44 }
 0xa6f   :  { %4509 = vmatpush3.msra.mxu1 %v3018_v46 }
 0xa70   :  { %4510 = vmatprep.subr.mxu1 %v3033_v37  ;;  %v3634_v37 = vld [vmem:[#allocation22 + $0xf0] sm:$0xff] }
 0xa71   :  { %4511 = vmatpush3.msra.mxu1 %v3017_v39 }
 0xa72   :  { %4512 = vmatprep.subr.mxu1 %v3032_v40  ;;  %v3633_v40 = vld [vmem:[#allocation22 + $0xe8] sm:$0xff] }
 0xa73   :  { %4513 = vmatpush3.msra.mxu1 %v3016_v19 }
 0xa8f   :  { %v2816_v21 = vpop.f32.mrf.mxu1 }
 0xa91   :  { %v2818_v22 = vpop.f32.mrf.mxu1 }
 0xa92   :  { %2860 = vmatprep.subr.mxu0 %v2818_v22  ;;  %v3146_v22 = vld [vmem:[#allocation19 + $0x158] sm:$0xff] }
 0xa93   :  { %2861 = vmatpush1.msra.mxu0 %v2816_v21  ;;  %v3162_v21 = vld [vmem:[#allocation19 + $0x1d8] sm:$0xff] }
 0xa94   :  { %4376 = vmatmul.mubr.msk.f32.vlgmr.msra.gmra.mxu0 %vm2292_vm2, %v2822_v33  ;;  %v3161_v33 = vld [vmem:[#allocation19 + $0x1d0] sm:$0xff] }
 0xa95   :  { %2900 = vmatprep.mubr.f32.mxu0 %v5245_v43 }
 0xa98   :  { %4377 = vmatmul.mubr.msk.f32.gmra.mxu0 %vm2292_vm2, %v2823_v34  ;;  %v3145_v34 = vld [vmem:[#allocation19 + $0x150] sm:$0xff] }
 0xa99   :  { %3003 = vmatprep.mubr.f32.mxu0 %v5245_v43 }
 0xb54   :  { %v2896_v48 = vpop.f32.mrf.mxu0 }
 0xb55   :  { %v2907_v57 = vadd.f32 %v2896_v48, %v5551_v10  ;;  %v3165_v10 = vld [vmem:[#allocation19 + $0x1f0] sm:$0xff] }
 0xb56   :  { %v2898_v50 = vpop.f32.mrf.mxu0 }
 0xb57   :  { %v2908_v54 = vadd.f32 %v2898_v50, %v5554_v49  ;;  %v2923_v4 = vadd.f32 %v2916_v59, %v2907_v57  ;;  %v3164_v49 = vld [vmem:[#allocation19 + $0x1e8] sm:$0xff]  ;;  %v3434_v57 = vld [vmem:[#allocation19 + $0x2f0] sm:$0xff] }
 0xb58   :  { %v2902_v53 = vpop.f32.mrf.mxu0 }
 0xb59   :  { %v2909_v56 = vadd.f32 %v2902_v53, %v5557_v51  ;;  %v2924_v0 = vadd.f32 %v2920_v36, %v2908_v54  ;;  %v5582_v12 = vmax.f32 %v2923_v4, 0.0  ;;  %v3148_v51 = vld [vmem:[#allocation19 + $0x168] sm:$0xff]  ;;  %v3435_v53 = vld [vmem:[#allocation19 + $0x2f8] sm:$0xff] }
 0xb5a   :  { %v2904_v61 = vpop.f32.mrf.mxu0  ;;  %v3431_v4 = vld [vmem:[#allocation19 + $0x2d8] sm:$0xff] }
 0xb5b   :  { %v2910_v62 = vadd.f32 %v2904_v61, %v5560_v20  ;;  %v2925_v63 = vadd.f32 %v2916_v59, %v2909_v56  ;;  %v5579_v45 = vmax.f32 %v2924_v0, 0.0  ;;  %v3147_v20 = vld [vmem:[#allocation19 + $0x160] sm:$0xff]  ;;  %v3419_v56 = vld [vmem:[#allocation19 + $0x278] sm:$0xff]  ;;  %v3418_v59 = vld [vmem:[#allocation19 + $0x270] sm:$0xff] }
 0xb5c   :  { %v3319_v61 = vld [vmem:[#allocation17 + $0x28] sm:$0xff]  ;;  %v3432_v0 = vld [vmem:[#allocation19 + $0x2e0] sm:$0xff] }
 0xb5d   :  { %v2926_v1 = vadd.f32 %v2920_v36, %v2910_v62  ;;  %v5577_v6 = vmax.f32 %v2925_v63, 0.0  ;;  %v3318_v36 = vld [vmem:[#allocation17 + $0x20] sm:$0xff]  ;;  %v3433_v62 = vld [vmem:[#allocation19 + $0x2e8] sm:$0xff] }
 0xb5e   :  { %v3417_v63 = vld [vmem:[#allocation19 + $0x268] sm:$0xff] }
 0xb5f   :  { %v5575_v5 = vmax.f32 %v2926_v1, 0.0  ;;  %v3416_v1 = vld [vmem:[#allocation19 + $0x260] sm:$0xff] }
 0xb61   :  { %2967 = vmatprep.subr.mxu0 %v5575_v5 }
 0xb62   :  { %2968 = vmatpush1.msra.mxu0 %v5577_v6 }
 0xb63   :  { %2969 = vmatprep.subr.mxu0 %v5579_v45 }
 0xb64   :  { %2970 = vmatpush1.msra.mxu0 %v5582_v12 }
 0xb65   :  { %4378 = vmatmul.mubr.msk.f32.vlgmr.msra.gmra.mxu0 %vm416_vm1, %v2931_v14  ;;  %3085 = vmatprep.subr.mxu0 %v5575_v5  ;;  %v3428_v14 = vld [vmem:[#allocation19 + $0x2c0] sm:$0xff] }
 0xb66   :  { %3086 = vmatpush1.msra.mxu0 %v5577_v6  ;;  %3009 = vmatprep.mubr.f32.mxu0 %v5245_v43 }
 0xb67   :  { %3087 = vmatprep.subr.mxu0 %v5579_v45 }
 0xb68   :  { %3088 = vmatpush1.msra.mxu0 %v5582_v12 }
 0xb69   :  { %4379 = vmatmul.mubr.msk.f32.gmra.mxu0 %vm416_vm1, %v2932_v7  ;;  %4444 = vmatprep.subr.mxu0 %v3166_v8  ;;  %v3412_v7 = vld [vmem:[#allocation19 + $0x240] sm:$0xff]  ;;  %v3427_v8 = vld [vmem:[#allocation19 + $0x2b8] sm:$0xff] }
 0xb6a   :  { %3121 = vmatprep.mubr.f32.mxu0 %v5245_v43 }
 0xb6d   :  { %4380 = vmatmul.mubr.msk.f32.vlgmr.msra.gmra.mxu0 %vm416_vm1, %v3049_v9  ;;  %v3411_v9 = vld [vmem:[#allocation19 + $0x238] sm:$0xff] }
 0xb6e   :  { %4445 = vmatpush3.msra.mxu0 %v3150_v47  ;;  %3127 = vmatprep.mubr.f32.mxu0 %v5245_v43  ;;  %v3426_v47 = vld [vmem:[#allocation19 + $0x2b0] sm:$0xff] }
 0xb6f   :  { %4446 = vmatprep.subr.mxu0 %v3165_v10  ;;  %v3410_v10 = vld [vmem:[#allocation19 + $0x230] sm:$0xff] }
 0xb70   :  { %4447 = vmatpush3.msra.mxu0 %v3149_v11  ;;  %v3425_v11 = vld [vmem:[#allocation19 + $0x2a8] sm:$0xff] }
 0xb71   :  { %4448 = vmatprep.subr.mxu0 %v3164_v49  ;;  %4381 = vmatmul.mubr.msk.f32.gmra.mxu0 %vm416_vm1, %v3050_v13  ;;  %v3409_v49 = vld [vmem:[#allocation19 + $0x228] sm:$0xff]  ;;  %v3424_v13 = vld [vmem:[#allocation19 + $0x2a0] sm:$0xff] }
 0xb72   :  { %4449 = vmatpush3.msra.mxu0 %v3148_v51  ;;  %v3408_v51 = vld [vmem:[#allocation19 + $0x220] sm:$0xff] }
 0xb73   :  { %4450 = vmatprep.subr.mxu0 %v3163_v15  ;;  %v3423_v15 = vld [vmem:[#allocation19 + $0x298] sm:$0xff] }
 0xb74   :  { %4451 = vmatpush3.msra.mxu0 %v3147_v20  ;;  %v3407_v20 = vld [vmem:[#allocation19 + $0x218] sm:$0xff] }
 0xb75   :  { %4452 = vmatprep.subr.mxu0 %v3162_v21  ;;  %v3422_v21 = vld [vmem:[#allocation19 + $0x290] sm:$0xff] }
 0xb76   :  { %4453 = vmatpush3.msra.mxu0 %v3146_v22  ;;  %v3406_v22 = vld [vmem:[#allocation19 + $0x210] sm:$0xff] }
 0xb77   :  { %4454 = vmatprep.subr.mxu0 %v3161_v33  ;;  %v3421_v33 = vld [vmem:[#allocation19 + $0x288] sm:$0xff] }
 0xb78   :  { %4455 = vmatpush3.msra.mxu0 %v3145_v34  ;;  %v3405_v34 = vld [vmem:[#allocation19 + $0x208] sm:$0xff] }
 0xb79   :  { %4456 = vmatprep.subr.mxu0 %v3160_v55  ;;  %v3420_v55 = vld [vmem:[#allocation19 + $0x280] sm:$0xff] }
 0xb7a   :  { %4457 = vmatpush3.msra.mxu0 %v3144_v38  ;;  %v3404_v38 = vld [vmem:[#allocation19 + $0x200] sm:$0xff] }
 0xb7b   :  { %4458 = vmatprep.subr.mxu0 %v3159_v58  ;;  %v3539_v58 = vld [vmem:[#allocation22 + $0x78] sm:$0xff] }
 0xb7c   :  { %4459 = vmatpush3.msra.mxu0 %v3143_v60  ;;  %v3635_v60 = vld [vmem:[#allocation22 + $0xf8] sm:$0xff]  ;;  %4729 = vmatprep.subr.mxu1 %v3539_v58 }
 0xb7d   :  { %4460 = vmatprep.subr.mxu0 %v3158_v23  ;;  %v3538_v23 = vld [vmem:[#allocation22 + $0x70] sm:$0xff] }
 0xb7e   :  { %4461 = vmatpush3.msra.mxu0 %v3142_v24  ;;  %v3537_v24 = vld [vmem:[#allocation22 + $0x68] sm:$0xff] }
 0xb7f   :  { %4462 = vmatprep.subr.mxu0 %v3157_v25  ;;  %v3536_v25 = vld [vmem:[#allocation22 + $0x60] sm:$0xff] }
 0xb80   :  { %4463 = vmatpush3.msra.mxu0 %v3141_v26  ;;  %v3535_v26 = vld [vmem:[#allocation22 + $0x58] sm:$0xff] }
 0xb81   :  { %4464 = vmatprep.subr.mxu0 %v3156_v27  ;;  %v3534_v27 = vld [vmem:[#allocation22 + $0x50] sm:$0xff] }
 0xb82   :  { %4465 = vmatpush3.msra.mxu0 %v3140_v28  ;;  %v3533_v28 = vld [vmem:[#allocation22 + $0x48] sm:$0xff] }
 0xb83   :  { %4466 = vmatprep.subr.mxu0 %v3155_v29  ;;  %v3532_v29 = vld [vmem:[#allocation22 + $0x40] sm:$0xff] }
 0xb84   :  { %4467 = vmatpush3.msra.mxu0 %v3139_v30  ;;  %v3531_v30 = vld [vmem:[#allocation22 + $0x38] sm:$0xff] }
 0xb85   :  { %4468 = vmatprep.subr.mxu0 %v3154_v31 }
 0xb86   :  { %4469 = vmatpush3.msra.mxu0 %v3138_v17 }
 0xb87   :  { %4470 = vmatprep.subr.mxu0 %v3153_v18 }
 0xb88   :  { %4471 = vmatpush3.msra.mxu0 %v3137_v32 }
 0xb89   :  { %4472 = vmatprep.subr.mxu0 %v3152_v2 }
 0xb8a   :  { %4473 = vmatpush3.msra.mxu0 %v3136_v3 }
 0xb8b   :  { %4474 = vmatprep.subr.mxu0 %v3151_v35 }
 0xb8c   :  { %4475 = vmatpush3.msra.mxu0 %v3135_v16 }
 0xb8d   :  { %3354 = vmatprep.subr.mxu0 %v5575_v5  ;;  %v3415_v5 = vld [vmem:[#allocation19 + $0x258] sm:$0xff] }
 0xc25   :  { %v3005_v41 = vpop.f32.mrf.mxu0 }
 0xc27   :  { %v3007_v42 = vpop.f32.mrf.mxu0 }
 0xc28   :  { %3306 = vmatprep.mubr.f32.mxu1 %v3007_v42  ;;  %v3631_v42 = vld [vmem:[#allocation22 + $0xd8] sm:$0xff] }
 0xc29   :  { %v3011_v44 = vpop.f32.mrf.mxu0  ;;  %3307 = vmatmul.mubr.f32.vlgmr.msra.gmra.mxu1 %v3005_v41  ;;  %v3632_v41 = vld [vmem:[#allocation22 + $0xe0] sm:$0xff] }
 0xc2a   :  { %4730 = vmatpush3.msra.mxu1 %v3539_v58 }
 0xc2b   :  { %v3013_v46 = vpop.f32.mrf.mxu0  ;;  %4731 = vmatprep.subr.mxu1 %v3538_v23 }
 0xc2c   :  { %3311 = vmatprep.mubr.f32.mxu1 %v3013_v46  ;;  %4732 = vmatpush3.msra.mxu1 %v3538_v23  ;;  %v3629_v46 = vld [vmem:[#allocation22 + $0xc8] sm:$0xff] }
 0xc2d   :  { %v3123_v48 = vpop.f32.mrf.mxu0  ;;  %3312 = vmatmul.mubr.f32.gmra.mxu1 %v3011_v44  ;;  %4733 = vmatprep.subr.mxu1 %v3537_v24  ;;  %v3630_v44 = vld [vmem:[#allocation22 + $0xd0] sm:$0xff] }
 0xc2e   :  { %4734 = vmatpush3.msra.mxu1 %v3537_v24  ;;  %v3713_v24 = vld [vmem:[#allocation20 + $0x28] sm:$0xff] }
 0xc2f   :  { %v3125_v50 = vpop.f32.mrf.mxu0  ;;  %4735 = vmatprep.subr.mxu1 %v3536_v25 }
 0xc30   :  { %3231 = vmatprep.mubr.f32.mxu0 %v3125_v50  ;;  %4736 = vmatpush3.msra.mxu1 %v3536_v25  ;;  %v3627_v50 = vld [vmem:[#allocation22 + $0xb8] sm:$0xff]  ;;  %v3714_v25 = vld [vmem:[#allocation20 + $0x30] sm:$0xff] }
 0xc31   :  { %v3129_v52 = vpop.f32.mrf.mxu0  ;;  %3232 = vmatmul.mubr.f32.vlgmr.msra.gmra.mxu0 %v3123_v48  ;;  %4737 = vmatprep.subr.mxu1 %v3535_v26  ;;  %v3628_v48 = vld [vmem:[#allocation22 + $0xc0] sm:$0xff] }
 0xc32   :  { %3355 = vmatpush1.msra.mxu0 %v5577_v6  ;;  %v3430_v6 = vld [vmem:[#allocation19 + $0x2d0] sm:$0xff]  ;;  %4738 = vmatpush3.msra.mxu1 %v3535_v26 }
 0xc33   :  { %3356 = vmatprep.subr.mxu0 %v5579_v45  ;;  %v3131_v54 = vpop.f32.mrf.mxu0  ;;  %v3414_v45 = vld [vmem:[#allocation19 + $0x250] sm:$0xff]  ;;  %4739 = vmatprep.subr.mxu1 %v3534_v27 }
 0xc34   :  { %3357 = vmatpush1.msra.mxu0 %v5582_v12  ;;  %3236 = vmatprep.mubr.f32.mxu0 %v3131_v54  ;;  %v3413_v12 = vld [vmem:[#allocation19 + $0x248] sm:$0xff] }
 0xc35   :  { %3237 = vmatmul.mubr.f32.gmra.mxu0 %v3129_v52  ;;  %4520 = vmatprep.subr.mxu0 %v3435_v53  ;;  %v3530_v52 = vld [vmem:[#allocation22 + $0x30] sm:$0xff]  ;;  %v3529_v54 = vld [vmem:[#allocation22 + $0x28] sm:$0xff] }
 0xc36   :  { %3390 = vmatprep.mubr.f32.mxu0 %v5245_v43  ;;  %4740 = vmatpush3.msra.mxu1 %v3534_v27  ;;  %v3626_v53 = vld [vmem:[#allocation22 + $0xb0] sm:$0xff]  ;;  %v3715_v27 = vld [vmem:[#allocation20 + $0x38] sm:$0xff] }
 0xc37   :  { %4741 = vmatprep.subr.mxu1 %v3533_v28 }
 0xc38   :  { %4742 = vmatpush3.msra.mxu1 %v3533_v28  ;;  %v3926_v28 = vld [vmem:[#allocation22 + $0x178] sm:$0xff] }
 0xc39   :  { %4382 = vmatmul.mubr.msk.f32.vlgmr.msra.gmra.mxu0 %vm416_vm1, %v3318_v36  ;;  %4743 = vmatprep.subr.mxu1 %v3532_v29  ;;  %v3625_v36 = vld [vmem:[#allocation22 + $0xa8] sm:$0xff] }
 0xc3a   :  { %3396 = vmatprep.mubr.f32.mxu0 %v5245_v43  ;;  %4521 = vmatpush3.msra.mxu0 %v3419_v56  ;;  %v3429_v43 = vld [vmem:[#allocation19 + $0x2c8] sm:$0xff]  ;;  %v3528_v56 = vld [vmem:[#allocation22 + $0x20] sm:$0xff] }
 0xc3b   :  { %4522 = vmatprep.subr.mxu0 %v3434_v57  ;;  %4744 = vmatpush3.msra.mxu1 %v3532_v29  ;;  %v3624_v57 = vld [vmem:[#allocation22 + $0xa0] sm:$0xff] }
 0xc3c   :  { %4523 = vmatpush3.msra.mxu0 %v3418_v59  ;;  %4745 = vmatprep.subr.mxu1 %v3531_v30  ;;  %v3527_v59 = vld [vmem:[#allocation22 + $0x18] sm:$0xff]  ;;  %v3615_v29 = vld [vmem:[#allocation20] sm:$0xff] }
 0xc3d   :  { %4383 = vmatmul.mubr.msk.f32.gmra.mxu0 %vm416_vm1, %v3319_v61  ;;  %4524 = vmatprep.subr.mxu0 %v3433_v62  ;;  %v3623_v61 = vld [vmem:[#allocation22 + $0x98] sm:$0xff]  ;;  %v3526_v62 = vld [vmem:[#allocation22 + $0x10] sm:$0xff] }
 0xc3e   :  { %4525 = vmatpush3.msra.mxu0 %v3417_v63  ;;  %4746 = vmatpush3.msra.mxu1 %v3531_v30  ;;  %v3622_v63 = vld [vmem:[#allocation22 + $0x90] sm:$0xff]  ;;  %v3616_v30 = vld [vmem:[#allocation20 + $0x8] sm:$0xff] }
 0xc3f   :  { %4526 = vmatprep.subr.mxu0 %v3432_v0  ;;  %4747 = vmatprep.subr.mxu1 %v3530_v52  ;;  %v3525_v0 = vld [vmem:[#allocation22 + $0x8] sm:$0xff] }
 0xc40   :  { %4527 = vmatpush3.msra.mxu0 %v3416_v1  ;;  %4748 = vmatpush3.msra.mxu1 %v3530_v52  ;;  %v3621_v1 = vld [vmem:[#allocation22 + $0x88] sm:$0xff] }
 0xc41   :  { %4528 = vmatprep.subr.mxu0 %v3431_v4  ;;  %4749 = vmatprep.subr.mxu1 %v3529_v54  ;;  %v3524_v4 = vld [vmem:[#allocation22] sm:$0xff] }
 0xc42   :  { %4529 = vmatpush3.msra.mxu0 %v3415_v5  ;;  %4750 = vmatpush3.msra.mxu1 %v3529_v54  ;;  %v3620_v5 = vld [vmem:[#allocation22 + $0x80] sm:$0xff] }
 0xc43   :  { %4530 = vmatprep.subr.mxu0 %v3430_v6  ;;  %4751 = vmatprep.subr.mxu1 %v3528_v56 }
 0xc44   :  { %4531 = vmatpush3.msra.mxu0 %v3414_v45  ;;  %4752 = vmatpush3.msra.mxu1 %v3528_v56 }
 0xc45   :  { %4532 = vmatprep.subr.mxu0 %v3429_v43  ;;  %4753 = vmatprep.subr.mxu1 %v3527_v59 }
 0xc46   :  { %4533 = vmatpush3.msra.mxu0 %v3413_v12  ;;  %4754 = vmatpush3.msra.mxu1 %v3527_v59 }
 0xc47   :  { %4534 = vmatprep.subr.mxu0 %v3428_v14  ;;  %4755 = vmatprep.subr.mxu1 %v3526_v62 }
 0xc48   :  { %4535 = vmatpush3.msra.mxu0 %v3412_v7  ;;  %4756 = vmatpush3.msra.mxu1 %v3526_v62 }
 0xc49   :  { %4536 = vmatprep.subr.mxu0 %v3427_v8  ;;  %4757 = vmatprep.subr.mxu1 %v3525_v0 }
 0xc4a   :  { %4537 = vmatpush3.msra.mxu0 %v3411_v9  ;;  %4758 = vmatpush3.msra.mxu1 %v3525_v0 }
 0xc4b   :  { %4538 = vmatprep.subr.mxu0 %v3426_v47  ;;  %4759 = vmatprep.subr.mxu1 %v3524_v4 }
 0xc4c   :  { %4539 = vmatpush3.msra.mxu0 %v3410_v10  ;;  %4760 = vmatpush3.msra.mxu1 %v3524_v4  ;;  %v4384_v10 = vld [vmem:[%s5683_s15] ss:$0 sm:$0xff] }
 0xc4d   :  { %4540 = vmatprep.subr.mxu0 %v3425_v11 }
 0xc4e   :  { %4541 = vmatpush3.msra.mxu0 %v3409_v49 }
 0xc4f   :  { %4542 = vmatprep.subr.mxu0 %v3424_v13 }
 0xc50   :  { %4543 = vmatpush3.msra.mxu0 %v3408_v51 }
 0xc51   :  { %4544 = vmatprep.subr.mxu0 %v3423_v15 }
 0xc52   :  { %4545 = vmatpush3.msra.mxu0 %v3407_v20 }
 0xc53   :  { %4546 = vmatprep.subr.mxu0 %v3422_v21 }
 0xc54   :  { %4547 = vmatpush3.msra.mxu0 %v3406_v22 }
 0xc55   :  { %4548 = vmatprep.subr.mxu0 %v3421_v33 }
 0xc56   :  { %4549 = vmatpush3.msra.mxu0 %v3405_v34 }
 0xc57   :  { %4550 = vmatprep.subr.mxu0 %v3420_v55 }
 0xc58   :  { %4551 = vmatpush3.msra.mxu0 %v3404_v38  ;;  %v3712_v38 = vld [vmem:[#allocation20 + $0x20] sm:$0xff] }
 0xc59   :  { %4764 = vmatprep.subr.mxu0 %v3635_v60 }
 0xce9   :  { %v4514_v6 = vpop.f32.mrf.mxu1 }
 0xceb   :  { %v4515_v45 = vpop.f32.mrf.mxu1 }
 0xcec   :  { %v4516_v14 = vadd.f32 %v4515_v45, %v4514_v6  ;;  %v4004_v6 = vld [vmem:[#allocation20 + $0x48] sm:$0xff]  ;;  %v4124_v45 = vld [vmem:[#allocation22 + $0x1f8] sm:$0xff] }
 0xced   :  { %v4517_v43 = vpop.f32.mrf.mxu1 }
 0xcef   :  { %v4518_v7 = vpop.f32.mrf.mxu1 }
 0xcf0   :  { %v4519_v49 = vadd.f32 %v4518_v7, %v4517_v43  ;;  %v4005_v43 = vld [vmem:[#allocation20 + $0x50] sm:$0xff]  ;;  %v4122_v7 = vld [vmem:[#allocation22 + $0x1e8] sm:$0xff] }
 0xcf1   :  { %v4476_v31 = vpop.f32.mrf.mxu0 }
 0xcf3   :  { %v4477_v17 = vpop.f32.mrf.mxu0 }
 0xcf4   :  { %v5606_v18 = vadd.f32 %v4477_v17, %v4476_v31  ;;  %v3617_v31 = vld [vmem:[#allocation20 + $0x10] sm:$0xff] }
 0xcf5   :  { %v4479_v32 = vpop.f32.mrf.mxu0  ;;  %v3925_v17 = vld [vmem:[#allocation22 + $0x170] sm:$0xff] }
 0xcf6   :  { %v3309_v9 = vadd.f32 %v4516_v14, %v5606_v18  ;;  %v3924_v18 = vld [vmem:[#allocation22 + $0x168] sm:$0xff]  ;;  %v4006_v14 = vld [vmem:[#allocation20 + $0x58] sm:$0xff] }
 0xcf7   :  { %v4480_v2 = vpop.f32.mrf.mxu0 }
 0xcf8   :  { %v5608_v3 = vadd.f32 %v4480_v2, %v4479_v32  ;;  %v3618_v32 = vld [vmem:[#allocation20 + $0x18] sm:$0xff]  ;;  %v3923_v2 = vld [vmem:[#allocation22 + $0x160] sm:$0xff] }
 0xcf9   :  { %v3392_v35 = vpop.f32.mrf.mxu0 }
 0xcfa   :  { %v3314_v15 = vadd.f32 %v4519_v49, %v5608_v3  ;;  %v3922_v3 = vld [vmem:[#allocation22 + $0x158] sm:$0xff] }
 0xcfb   :  { %v3394_v16 = vpop.f32.mrf.mxu0  ;;  %v4116_v49 = vld [vmem:[#allocation22 + $0x1b8] sm:$0xff] }
 0xcfc   :  { %3500 = vmatprep.mubr.f32.mxu0 %v3394_v16  ;;  %v3920_v16 = vld [vmem:[#allocation22 + $0x148] sm:$0xff] }
 0xcfd   :  { %v3398_v39 = vpop.f32.mrf.mxu0  ;;  %3501 = vmatmul.mubr.f32.vlgmr.msra.gmra.mxu0 %v3392_v35  ;;  %v3921_v35 = vld [vmem:[#allocation22 + $0x150] sm:$0xff] }
 0xcfe   :  { %4765 = vmatpush3.msra.mxu0 %v3635_v60 }
 0xcff   :  { %v3400_v19 = vpop.f32.mrf.mxu0  ;;  %4766 = vmatprep.subr.mxu0 %v3634_v37 }
 0xd00   :  { %3505 = vmatprep.mubr.f32.mxu0 %v3400_v19  ;;  %4767 = vmatpush3.msra.mxu0 %v3634_v37  ;;  %v3919_v37 = vld [vmem:[#allocation22 + $0x140] sm:$0xff]  ;;  %v3916_v19 = vld [vmem:[#allocation22 + $0x128] sm:$0xff] }
 0xd01   :  { %3506 = vmatmul.mubr.f32.gmra.mxu0 %v3398_v39  ;;  %4768 = vmatprep.subr.mxu0 %v3633_v40  ;;  %v3918_v39 = vld [vmem:[#allocation22 + $0x138] sm:$0xff] }
 0xd02   :  { %4769 = vmatpush3.msra.mxu0 %v3633_v40  ;;  %v3917_v40 = vld [vmem:[#allocation22 + $0x130] sm:$0xff] }
 0xd03   :  { %4770 = vmatprep.subr.mxu0 %v3632_v41 }
 0xd04   :  { %4771 = vmatpush3.msra.mxu0 %v3632_v41  ;;  %v3915_v41 = vld [vmem:[#allocation22 + $0x120] sm:$0xff] }
 0xd05   :  { %4772 = vmatprep.subr.mxu0 %v3631_v42 }
 0xd06   :  { %4773 = vmatpush3.msra.mxu0 %v3631_v42  ;;  %v3914_v42 = vld [vmem:[#allocation22 + $0x118] sm:$0xff] }
 0xd07   :  { %4774 = vmatprep.subr.mxu0 %v3630_v44 }
 0xd08   :  { %4775 = vmatpush3.msra.mxu0 %v3630_v44  ;;  %v3913_v44 = vld [vmem:[#allocation22 + $0x110] sm:$0xff] }
 0xd09   :  { %4776 = vmatprep.subr.mxu0 %v3629_v46 }
 0xd0a   :  { %4777 = vmatpush3.msra.mxu0 %v3629_v46  ;;  %v3912_v46 = vld [vmem:[#allocation22 + $0x108] sm:$0xff] }
 0xd0b   :  { %4778 = vmatprep.subr.mxu0 %v3628_v48 }
 0xd0c   :  { %4779 = vmatpush3.msra.mxu0 %v3628_v48  ;;  %v3911_v48 = vld [vmem:[#allocation22 + $0x100] sm:$0xff] }
 0xd0d   :  { %4780 = vmatprep.subr.mxu0 %v3627_v50 }
 0xd0e   :  { %4781 = vmatpush3.msra.mxu0 %v3627_v50  ;;  %v4003_v50 = vld [vmem:[#allocation20 + $0x40] sm:$0xff] }
 0xd0f   :  { %4782 = vmatprep.subr.mxu0 %v3626_v53 }
 0xd10   :  { %4783 = vmatpush3.msra.mxu0 %v3626_v53 }
 0xd11   :  { %4784 = vmatprep.subr.mxu0 %v3625_v36 }
 0xd12   :  { %4785 = vmatpush3.msra.mxu0 %v3625_v36 }
 0xd13   :  { %4786 = vmatprep.subr.mxu0 %v3624_v57 }
 0xd14   :  { %4787 = vmatpush3.msra.mxu0 %v3624_v57 }
 0xd15   :  { %4788 = vmatprep.subr.mxu0 %v3623_v61 }
 0xd16   :  { %4789 = vmatpush3.msra.mxu0 %v3623_v61 }
 0xd17   :  { %4790 = vmatprep.subr.mxu0 %v3622_v63 }
 0xd18   :  { %4791 = vmatpush3.msra.mxu0 %v3622_v63 }
 0xd19   :  { %4792 = vmatprep.subr.mxu0 %v3621_v1 }
 0xd1a   :  { %4793 = vmatpush3.msra.mxu0 %v3621_v1 }
 0xd1b   :  { %4794 = vmatprep.subr.mxu0 %v3620_v5 }
 0xd1c   :  { %4795 = vmatpush3.msra.mxu0 %v3620_v5 }
 0xdbd   :  { %v4552_v12 = vpop.f32.mrf.mxu0 }
 0xdbf   :  { %v4553_v8 = vpop.f32.mrf.mxu0 }
 0xdc0   :  { %v4554_v47 = vadd.f32 %v4553_v8, %v4552_v12  ;;  %v4123_v12 = vld [vmem:[#allocation22 + $0x1f0] sm:$0xff]  ;;  %v4121_v8 = vld [vmem:[#allocation22 + $0x1e0] sm:$0xff] }
 0xdc1   :  { %v4555_v11 = vpop.f32.mrf.mxu0 }
 0xdc2   :  { %v3511_v13 = vadd.f32 %v4554_v47, %v3309_v9  ;;  %v4120_v9 = vld [vmem:[#allocation22 + $0x1d8] sm:$0xff]  ;;  %v4119_v47 = vld [vmem:[#allocation22 + $0x1d0] sm:$0xff] }
 0xdc3   :  { %v4556_v51 = vpop.f32.mrf.mxu0 }
 0xdc4   :  { %v3520_v20 = vadd.f32 %v4384_v10, %v3511_v13  ;;  %v4557_v21 = vadd.f32 %v4556_v51, %v4555_v11  ;;  %v4117_v11 = vld [vmem:[#allocation22 + $0x1c0] sm:$0xff]  ;;  %v4115_v13 = vld [vmem:[#allocation22 + $0x1b0] sm:$0xff]  ;;  %v4114_v51 = vld [vmem:[#allocation22 + $0x1a8] sm:$0xff] }
 0xdc6   :  { %v5615_v22 = vmax.f32 %v3520_v20, 0.0  ;;  %v3512_v33 = vadd.f32 %v4557_v21, %v3314_v15  ;;  %v4113_v15 = vld [vmem:[#allocation22 + $0x1a0] sm:$0xff]  ;;  %v4112_v20 = vld [vmem:[#allocation22 + $0x198] sm:$0xff]  ;;  %v4111_v21 = vld [vmem:[#allocation22 + $0x190] sm:$0xff] }
 0xdc8   :  { %v3521_v34 = vadd.f32 %v4384_v10, %v3512_v33  ;;  %4761 = vmatprep.mubr.f32.mxu1 %v5615_v22  ;;  %4796 = vmatprep.mubr.f32.mxu0 %v5615_v22  ;;  %v4118_v10 = vld [vmem:[#allocation22 + $0x1c8] sm:$0xff]  ;;  %v4109_v33 = vld [vmem:[#allocation22 + $0x180] sm:$0xff] }
 0xdca   :  { %v5619_v55 = vmax.f32 %v3521_v34, 0.0  ;;  %v4201_v34 = vld [vmem:[#allocation20 + $0x60] sm:$0xff] }
 0xdcc   :  { %4762 = vmatmul.mubr.f32.vlgmr.msra.gmra.mxu1 %v5619_v55  ;;  %4797 = vmatmul.mubr.f32.vlgmr.msra.gmra.mxu0 %v5619_v55 }
 0xdcd   :  { %4803 = vmatprep.mubr.msk.f32.mxu1 %vm416_vm1, %v3712_v38  ;;  %4858 = vmatprep.mubr.msk.f32.mxu0 %vm416_vm1, %v4003_v50  ;;  %v4930_v50 = vld [vmem:[#allocation2 + $0x18] sm:$0xff] }
 0xe8c   :  { %v4798_v58 = vpop.f32.mrf.mxu0  ;;  %v4763_v60 = vpop.f32.mrf.mxu1 }
 0xe8d   :  { %4799 = vmatprep.subr.mxu1 %v4798_v58 }
 0xe8e   :  { %v3702_v23 = vpop.f32.mrf.mxu0  ;;  %4800 = vmatpush3.msra.mxu1 %v4798_v58  ;;  %v3606_v26 = vpop.f32.mrf.mxu1 }
 0xe8f   :  { %4801 = vmatprep.subr.mxu1 %v3702_v23 }
 0xe90   :  { %4802 = vmatpush3.msra.mxu1 %v3702_v23 }
 0xe91   :  { %4804 = vmatmul.mubr.msk.f32.vlgmr.msra.gmra.mxu1 %vm416_vm1, %v3713_v24  ;;  %4809 = vmatprep.subr.mxu1 %v4763_v60 }
 0xe92   :  { %4810 = vmatpush3.msra.mxu1 %v4763_v60  ;;  %4806 = vmatprep.mubr.msk.f32.mxu1 %vm416_vm1, %v3714_v25 }
 0xe93   :  { %4811 = vmatprep.subr.mxu1 %v3606_v26 }
 0xe94   :  { %4812 = vmatpush3.msra.mxu1 %v3606_v26 }
 0xe95   :  { %4807 = vmatmul.mubr.msk.f32.gmra.mxu1 %vm416_vm1, %v3715_v27  ;;  %4819 = vmatprep.subr.mxu1 %v3926_v28 }
 0xe96   :  { %4813 = vmatprep.mubr.msk.f32.mxu1 %vm416_vm1, %v3615_v29 }
 0xe99   :  { %4814 = vmatmul.mubr.msk.f32.vlgmr.msra.gmra.mxu1 %vm416_vm1, %v3616_v30  ;;  %v4203_v30 = vld [vmem:[#allocation20 + $0x70] sm:$0xff] }
 0xe9a   :  { %4820 = vmatpush3.msra.mxu1 %v3926_v28  ;;  %4816 = vmatprep.mubr.msk.f32.mxu1 %vm416_vm1, %v3617_v31  ;;  %v4204_v31 = vld [vmem:[#allocation20 + $0x78] sm:$0xff] }
 0xe9b   :  { %4821 = vmatprep.subr.mxu1 %v3925_v17 }
 0xe9c   :  { %4822 = vmatpush3.msra.mxu1 %v3925_v17 }
 0xe9d   :  { %4823 = vmatprep.subr.mxu1 %v3924_v18  ;;  %4817 = vmatmul.mubr.msk.f32.gmra.mxu1 %vm416_vm1, %v3618_v32 }
 0xe9e   :  { %4824 = vmatpush3.msra.mxu1 %v3924_v18  ;;  %4851 = vmatprep.mubr.f32.mxu1 %v5615_v22  ;;  %v4401_v18 = vld [vmem:[%s5686_s18] ss:$0 sm:$0xff]  ;;  %s5192_s18 = scalar_lea.vmem %s4331_s16, 512 }
 0xe9f   :  { %4825 = vmatprep.subr.mxu1 %v3923_v2  ;;  %p5193_p9 = scmp.ne.s32.totalorder %s4331_s16, %s5192_s18  ;;  %p5198_p11 = scmp.lt.s32.totalorder %s5192_s18, %s5192_s18 }
 0xea0   :  { %4826 = vmatpush3.msra.mxu1 %v3923_v2 }
 0xea1   :  { %4827 = vmatprep.subr.mxu1 %v3922_v3  ;;  %p5199_p12 = por %p5198_p11, %p5197_p10 }
 0xea2   :  { %4828 = vmatpush3.msra.mxu1 %v3922_v3 }
 0xea3   :  { %4829 = vmatprep.subr.mxu1 %v3921_v35  ;;  %p5200_p13 = pnand %p5199_p12, %p5193_p9 }
 0xea4   :  { %4830 = vmatpush3.msra.mxu1 %v3921_v35 }
 0xea5   :  { %4831 = vmatprep.subr.mxu1 %v3920_v16 }
 0xea6   :  { %4832 = vmatpush3.msra.mxu1 %v3920_v16 }
 0xea7   :  { %4833 = vmatprep.subr.mxu1 %v3919_v37 }
 0xea8   :  { %4834 = vmatpush3.msra.mxu1 %v3919_v37  ;;  %v4928_v37 = vld [vmem:[#allocation2 + $0x8] sm:$0xff] }
 0xea9   :  { %4835 = vmatprep.subr.mxu1 %v3918_v39 }
 0xeaa   :  { %4836 = vmatpush3.msra.mxu1 %v3918_v39 }
 0xeab   :  { %4837 = vmatprep.subr.mxu1 %v3917_v40 }
 0xeac   :  { %4838 = vmatpush3.msra.mxu1 %v3917_v40 }
 0xead   :  { %4839 = vmatprep.subr.mxu1 %v3916_v19 }
 0xeae   :  { %4840 = vmatpush3.msra.mxu1 %v3916_v19 }
 0xeaf   :  { %4841 = vmatprep.subr.mxu1 %v3915_v41 }
 0xeb0   :  { %4842 = vmatpush3.msra.mxu1 %v3915_v41 }
 0xeb1   :  { %4843 = vmatprep.subr.mxu1 %v3914_v42 }
 0xeb2   :  { %4844 = vmatpush3.msra.mxu1 %v3914_v42  ;;  %v4929_v42 = vld [vmem:[#allocation2] sm:$0xff] }
 0xeb3   :  { %4845 = vmatprep.subr.mxu1 %v3913_v44 }
 0xeb4   :  { %4846 = vmatpush3.msra.mxu1 %v3913_v44 }
 0xeb5   :  { %4847 = vmatprep.subr.mxu1 %v3912_v46 }
 0xeb6   :  { %4848 = vmatpush3.msra.mxu1 %v3912_v46 }
 0xeb7   :  { %4849 = vmatprep.subr.mxu1 %v3911_v48 }
 0xeb8   :  { %4850 = vmatpush3.msra.mxu1 %v3911_v48 }
 0xeb9   :  { %4852 = vmatmul.mubr.f32.vlgmr.msra.gmra.mxu1 %v5619_v55 }
 0xeba   :  { %4903 = vmatprep.mubr.msk.f32.mxu1 %vm416_vm1, %v4201_v34 }
 0xf51   :  { %v4805_v52 = vpop.f32.mrf.mxu1 }
 0xf53   :  { %v3794_v53 = vpop.f32.mrf.mxu1 }
 0xf55   :  { %v4808_v54 = vpop.f32.mrf.mxu1 }
 0xf57   :  { %v3804_v36 = vpop.f32.mrf.mxu1 }
 0xf59   :  { %v4815_v56 = vpop.f32.mrf.mxu1 }
 0xf5a   :  { %v5634_v57 = vadd.f32 %v4815_v56, %v4805_v52 }
 0xf5b   :  { %v3891_v59 = vpop.f32.mrf.mxu1 }
 0xf5c   :  { %v5636_v61 = vadd.f32 %v3891_v59, %v3794_v53 }
 0xf5d   :  { %v4818_v62 = vpop.f32.mrf.mxu1 }
 0xf5e   :  { %v5638_v63 = vadd.f32 %v4818_v62, %v4808_v54  ;;  %v4931_v54 = vld [vmem:[#allocation2 + $0x10] sm:$0xff] }
 0xf5f   :  { %v3901_v0 = vpop.f32.mrf.mxu1 }
 0xf60   :  { %v5640_v1 = vadd.f32 %v3901_v0, %v3804_v36 }
 0xf79   :  { %v4853_v4 = vpop.f32.mrf.mxu1 }
 0xf7a   :  { %4854 = vmatprep.subr.mxu0 %v4853_v4 }
 0xf7b   :  { %v3993_v5 = vpop.f32.mrf.mxu1  ;;  %4855 = vmatpush3.msra.mxu0 %v4853_v4 }
 0xf7c   :  { %4856 = vmatprep.subr.mxu0 %v3993_v5 }
 0xf7d   :  { %4857 = vmatpush3.msra.mxu0 %v3993_v5 }
 0xf7e   :  { %4859 = vmatmul.mubr.msk.f32.vlgmr.msra.gmra.mxu0 %vm416_vm1, %v4004_v6  ;;  %4864 = vmatprep.subr.mxu0 %v4124_v45 }
 0xf7f   :  { %4865 = vmatpush3.msra.mxu0 %v4124_v45  ;;  %4861 = vmatprep.mubr.msk.f32.mxu0 %vm416_vm1, %v4005_v43 }
 0xf80   :  { %4866 = vmatprep.subr.mxu0 %v4123_v12 }
 0xf81   :  { %4867 = vmatpush3.msra.mxu0 %v4123_v12 }
 0xf82   :  { %4862 = vmatmul.mubr.msk.f32.gmra.mxu0 %vm416_vm1, %v4006_v14  ;;  %4868 = vmatprep.subr.mxu0 %v4122_v7 }
 0xf83   :  { %4869 = vmatpush3.msra.mxu0 %v4122_v7  ;;  %4896 = vmatprep.mubr.f32.mxu0 %v5615_v22  ;;  %v4110_v22 = vld [vmem:[#allocation22 + $0x188] sm:$0xff] }
 0xf84   :  { %4870 = vmatprep.subr.mxu0 %v4121_v8 }
 0xf85   :  { %4871 = vmatpush3.msra.mxu0 %v4121_v8 }
 0xf86   :  { %4872 = vmatprep.subr.mxu0 %v4120_v9 }
 0xf87   :  { %4873 = vmatpush3.msra.mxu0 %v4120_v9 }
 0xf88   :  { %4874 = vmatprep.subr.mxu0 %v4119_v47 }
 0xf89   :  { %4875 = vmatpush3.msra.mxu0 %v4119_v47 }
 0xf8a   :  { %4876 = vmatprep.subr.mxu0 %v4118_v10 }
 0xf8b   :  { %4877 = vmatpush3.msra.mxu0 %v4118_v10 }
 0xf8c   :  { %4878 = vmatprep.subr.mxu0 %v4117_v11 }
 0xf8d   :  { %4879 = vmatpush3.msra.mxu0 %v4117_v11 }
 0xf8e   :  { %4880 = vmatprep.subr.mxu0 %v4116_v49 }
 0xf8f   :  { %4881 = vmatpush3.msra.mxu0 %v4116_v49 }
 0xf90   :  { %4882 = vmatprep.subr.mxu0 %v4115_v13 }
 0xf91   :  { %4883 = vmatpush3.msra.mxu0 %v4115_v13 }
 0xf92   :  { %4884 = vmatprep.subr.mxu0 %v4114_v51 }
 0xf93   :  { %4885 = vmatpush3.msra.mxu0 %v4114_v51 }
 0xf94   :  { %4886 = vmatprep.subr.mxu0 %v4113_v15 }
 0xf95   :  { %4887 = vmatpush3.msra.mxu0 %v4113_v15 }
 0xf96   :  { %4888 = vmatprep.subr.mxu0 %v4112_v20 }
 0xf97   :  { %4889 = vmatpush3.msra.mxu0 %v4112_v20 }
 0xf98   :  { %4890 = vmatprep.subr.mxu0 %v4111_v21 }
 0xf99   :  { %4891 = vmatpush3.msra.mxu0 %v4111_v21 }
 0xf9a   :  { %4892 = vmatprep.subr.mxu0 %v4110_v22 }
 0xf9b   :  { %4893 = vmatpush3.msra.mxu0 %v4110_v22 }
 0xf9c   :  { %4894 = vmatprep.subr.mxu0 %v4109_v33 }
 0xf9d   :  { %4895 = vmatpush3.msra.mxu0 %v4109_v33 }
 0xf9e   :  { %4897 = vmatmul.mubr.f32.vlgmr.msra.gmra.mxu0 %v5619_v55  ;;  %v4202_v55 = vld [vmem:[#allocation20 + $0x68] sm:$0xff] }
0x103e   :  { %v4860_v38 = vpop.f32.mrf.mxu0 }
0x103f   :  { %v4105_v58 = vadd.f32 %v4860_v38, %v5634_v57 }
0x1040   :  { %v4085_v60 = vpop.f32.mrf.mxu0 }
0x1041   :  { %v4104_v23 = vadd.f32 %v4085_v60, %v5636_v61 }
0x1042   :  { %v4863_v24 = vpop.f32.mrf.mxu0 }
0x1043   :  { %v4107_v25 = vadd.f32 %v4863_v24, %v5638_v63 }
0x1044   :  { %v4095_v26 = vpop.f32.mrf.mxu0 }
0x1045   :  { %v4106_v27 = vadd.f32 %v4095_v26, %v5640_v1 }
0x105e   :  { %v4898_v28 = vpop.f32.mrf.mxu0 }
0x105f   :  { %4899 = vmatprep.subr.mxu1 %v4898_v28 }
0x1060   :  { %v4191_v29 = vpop.f32.mrf.mxu0  ;;  %4900 = vmatpush3.msra.mxu1 %v4898_v28 }
0x1061   :  { %4901 = vmatprep.subr.mxu1 %v4191_v29 }
0x1062   :  { %4902 = vmatpush3.msra.mxu1 %v4191_v29 }
0x1063   :  { %4904 = vmatmul.mubr.msk.f32.vlgmr.msra.gmra.mxu1 %vm416_vm1, %v4202_v55 }
0x1064   :  { %4906 = vmatprep.mubr.msk.f32.mxu1 %vm416_vm1, %v4203_v30 }
0x1067   :  { %4907 = vmatmul.mubr.msk.f32.gmra.mxu1 %vm416_vm1, %v4204_v31 }
0x1123   :  { %v4905_v17 = vpop.f32.mrf.mxu1 }
0x1124   :  { %v4303_v32 = vadd.f32 %v4905_v17, %v4105_v58 }
0x1125   :  { %v4283_v2 = vpop.f32.mrf.mxu1 }
0x1126   :  { %v4314_v3 = vadd.f32 %v4401_v18, %v4303_v32  ;;  %v4302_v35 = vadd.f32 %v4283_v2, %v4104_v23 }
0x1127   :  { %v4908_v16 = vpop.f32.mrf.mxu1 }
0x1128   :  { %v4318_v39 = vadd.f32 %v4928_v37, %v4314_v3  ;;  %v4313_v40 = vadd.f32 %v4401_v18, %v4302_v35  ;;  %v4305_v19 = vadd.f32 %v4908_v16, %v4107_v25 }
0x1129   :  { %v4293_v41 = vpop.f32.mrf.mxu1 }
0x112a   :  { %4322 = vst.msk [vmem:[#allocation23 + $0x8] sm:$0xff] %vm416_vm1, %v4318_v39  ;;  %v4317_v44 = vadd.f32 %v4929_v42, %v4313_v40  ;;  %v4316_v46 = vadd.f32 %v4401_v18, %v4305_v19  ;;  %v4304_v48 = vadd.f32 %v4293_v41, %v4106_v27 }
0x112c   :  { %4321 = vst.msk [vmem:[#allocation23] sm:$0xff] %vm416_vm1, %v4317_v44  ;;  %v4320_v52 = vadd.f32 %v4930_v50, %v4316_v46  ;;  %v4315_v53 = vadd.f32 %v4401_v18, %v4304_v48 }
0x112e   :  { %4324 = vst.msk [vmem:[#allocation23 + $0x18] sm:$0xff] %vm416_vm1, %v4320_v52  ;;  %v4319_v36 = vadd.f32 %v4931_v54, %v4315_v53 }
0x1130   :  { %4323 = vst.msk [vmem:[#allocation23 + $0x10] sm:$0xff] %vm416_vm1, %v4319_v36 }
0x1131   :  { %5203 = shalt.err (!%p5200_p13)
}
0x1132   :  { %4336 = dma.vmem_to_hbm [thread:$0]  %s4331_s16, 512, %s5687_s19, [#allocation4], %s5230_s22, %s5230_s22, %s5231_s2  }
0x1133   :  { %5226 = dma.done.wait [#allocation4], 512  }
0x1134   :  { %5227 = vsyncadd [#allocation4], 4294966784 }
0x1135   :  { %4340 = vsyncpa [#allocation3], 1 }
0x1136   :  { %4341 = vsyncpa [#allocation6], 1 }
0x1137   :  { %4342 = vsyncpa [#allocation9], 1 }
0x1138   :  { %4343 = vsyncpa [#allocation12], 1 }
0x1139   :  { %4344 = vsyncpa [#allocation15], 1 }
0x113a   :  { %4345 = vsyncpa [#allocation18], 1 }
0x113b   :  { %4346 = vsyncpa [#allocation21], 1 }
0x113c   :  { %4347 = vsyncpa [#allocation4], 1 }

</bundles_post_ra>
